<compile_context>
chip_gen: v7x
topology: tpu7x:2x2x1
jax: 0.10.0
libtpu: 0.0.40
codegen_flags: <defaults>
</compile_context>

<pallas_src>
import functools

import jax
import jax.numpy as jnp
from jax.experimental import pallas as pl
from jax.experimental.pallas import tpu as pltpu


# STGCN's layers.py builds nn.LayerNorm([n_vertex, C], eps=1e-12); both the
# kernel and the reference below use the same value.
_EPS = 1e-12
_HI = jax.lax.Precision.HIGHEST


# ==========================================================================
# In-kernel building blocks (traced inside the single Pallas kernel body)
# ==========================================================================

def _glu_temporal(x, wp, bp, wq, bq):
    # Causal temporal conv folded into block-Toeplitz weights; the Align residual
    # is pre-folded into (wp, bp):  out = (conv_P + x_res) * sigmoid(conv_Q).
    p = jnp.dot(x, wp, preferred_element_type=jnp.float32) + bp
    q = jnp.dot(x, wq, preferred_element_type=jnp.float32) + bq
    return p * jax.nn.sigmoid(q)


def _cheb_gc_relu(x, gso, a_w, a_b, cheb_w_ref, cheb_b):
    # Align(1x1) -> Chebyshev recursion on the (block-diagonal) GSO (one dense
    # matmul per order, covering every batch & time step) -> per-order weight
    # contraction with kron(I_T, W_k) block-diag weights -> bias -> GraphConvLayer
    # residual -> STConvBlock ReLU, all fused.
    x0 = jnp.dot(x, a_w, preferred_element_type=jnp.float32) + a_b
    Ks = cheb_w_ref.shape[0]
    acc = jnp.dot(x0, cheb_w_ref[0], preferred_element_type=jnp.float32)
    if Ks >= 2:
        x1 = jnp.dot(gso, x0, preferred_element_type=jnp.float32)
        acc = acc + jnp.dot(x1, cheb_w_ref[1], preferred_element_type=jnp.float32)
        xkm2, xkm1 = x0, x1
        for k in range(2, Ks):
            xk = 2.0 * jnp.dot(gso, xkm1, preferred_element_type=jnp.float32) - xkm2
            acc = acc + jnp.dot(xk, cheb_w_ref[k], preferred_element_type=jnp.float32)
            xkm2, xkm1 = xkm1, xk
    return jnp.maximum(acc + cheb_b + x0, 0.0)


def _group_layernorm(x, gamma, beta, rows, pavg, eps):
    # LayerNorm over [n_vertex, C] per (batch, time) group, computed directly in
    # the stacked (bt*N, T*C) layout.  rows = kron(I_bt, 1_{NxN})/N broadcasts the
    # per-batch vertex mean across sublanes; pavg = kron(I_T, 1_{CxC})/C
    # broadcasts the per-time-step channel mean across lanes.  No reshapes.
    s = jnp.dot(rows, x, preferred_element_type=jnp.float32)
    mean = jnp.dot(s, pavg, preferred_element_type=jnp.float32)
    xc = x - mean
    sv = jnp.dot(rows, xc * xc, preferred_element_type=jnp.float32)
    var = jnp.dot(sv, pavg, preferred_element_type=jnp.float32)
    return xc * jax.lax.rsqrt(var + eps) * gamma + beta


def _stgcn_kernel(*refs, n_st, eps):
    # refs = (x_ref, gso_ref, rows_ref, <folded weight refs>, o_ref)
    x_ref, gso_ref, rows_ref = refs[0], refs[1], refs[2]
    o_ref = refs[-1]
    w = refs[3:-1]

    x = x_ref[0]                 # (bt*N, T*C_in) slab for this batch tile
    gso = gso_ref[...]           # (bt*N, bt*N) block-diagonal GSO
    rows = rows_ref[...]         # (bt*N, bt*N) per-batch vertex-mean broadcaster

    i = 0
    for _ in range(n_st):
        (wp1, bp1, wq1, bq1, agw, agb, chw, chb,
         wp2, bp2, wq2, bq2, lng, lnb, lnp) = w[i:i + 15]
        i += 15
        x = _glu_temporal(x, wp1[...], bp1[...], wq1[...], bq1[...])   # tmp_conv1
        x = _cheb_gc_relu(x, gso, agw[...], agb[...], chw, chb[...])   # graph_conv + relu
        x = _glu_temporal(x, wp2[...], bp2[...], wq2[...], bq2[...])   # tmp_conv2
        x = _group_layernorm(x, lng[...], lnb[...], rows, lnp[...], eps)  # tc2_ln
        # TODO(synk): nn.Dropout is identity at inference; train-mode dropout not implemented.

    (wpo, bpo, wqo, bqo, lng, lnb, lnp, f1w, f1b, f2w, f2b) = w[i:i + 11]
    x = _glu_temporal(x, wpo[...], bpo[...], wqo[...], bqo[...])       # output tmp_conv1
    x = _group_layernorm(x, lng[...], lnb[...], rows, lnp[...], eps)   # tc1_ln
    x = jnp.maximum(jnp.dot(x, f1w[...], preferred_element_type=jnp.float32) + f1b[...], 0.0)
    x = jnp.dot(x, f2w[...], preferred_element_type=jnp.float32) + f2b[...]
    o_ref[0] = x.astype(o_ref.dtype)


# ==========================================================================
# Trace-time weight folding (tiny arrays; runs once outside the kernel)
# ==========================================================================

def _align_matrix(c_in, c_out, aw=None, ab=None):
    # layers.Align as a (c_in, c_out) matrix + bias:
    #   c_in > c_out : 1x1 conv weights;  c_in <= c_out : identity / zero-pad.
    if c_in > c_out:
        return jnp.transpose(aw[:, :, 0, 0]), ab
    return (jnp.eye(c_in, c_out, dtype=jnp.float32),
            jnp.zeros((c_out,), jnp.float32))


def fold_temporal_glu(p, t_in):
    # Fold the causal Conv2d((K,1)) + GLU residual into block-Toeplitz weights
    # acting on the (rows, T*C) slab.  Column order: (t_out outer, c_out inner).
    co2, ci, K, _ = p['conv_w'].shape
    co = co2 // 2
    t_out = t_in - K + 1
    w = p['conv_w'][:, :, :, 0]                                   # (2co, ci, K)
    wp = jnp.transpose(w[:co], (2, 1, 0))                         # (K, ci, co)
    wq = jnp.transpose(w[co:], (2, 1, 0))
    A, a_b = _align_matrix(ci, co, p.get('align_w'), p.get('align_b'))
    wp = wp.at[K - 1].add(A)                                      # fold residual into last tap

    Wp = jnp.zeros((t_in * ci, t_out * co), jnp.float32)
    Wq = jnp.zeros((t_in * ci, t_out * co), jnp.float32)
    for t in range(t_out):
        for k in range(K):
            r, c = (t + k) * ci, t * co
            Wp = Wp.at[r:r + ci, c:c + co].set(wp[k])
            Wq = Wq.at[r:r + ci, c:c + co].set(wq[k])
    bp = jnp.tile(p['conv_b'][:co] + a_b, t_out).reshape(1, -1)
    bq = jnp.tile(p['conv_b'][co:], t_out).reshape(1, -1)
    return Wp, bp, Wq, bq, t_out


def fold_graph_conv(p, c_in, T):
    cg = p['cheb_w'].shape[-1]
    A, a_b = _align_matrix(c_in, cg, p.get('align_w'), p.get('align_b'))
    eye_t = jnp.eye(T, dtype=jnp.float32)
    Ag = jnp.kron(eye_t, A)                                       # (T*c_in, T*cg)
    agb = jnp.tile(a_b, T).reshape(1, -1)
    Wk = jnp.stack([jnp.kron(eye_t, p['cheb_w'][k])
                    for k in range(p['cheb_w'].shape[0])])        # (Ks, T*cg, T*cg)
    cb = jnp.tile(p['cheb_b'], T).reshape(1, -1)
    return Ag, agb, Wk, cb


def fold_layernorm(gamma, beta, T, bt):
    nv, C = gamma.shape
    g = jnp.tile(gamma, (bt, T))                                  # (bt*N, T*C)
    b = jnp.tile(beta, (bt, T))
    pavg = jnp.kron(jnp.eye(T, dtype=jnp.float32),
                    jnp.ones((C, C), jnp.float32)) / C            # channel-mean broadcaster
    return g, b, pavg


def fold_all(params, n_his, bt):
    flat = []
    T = n_his
    for blk in params['st_blocks']:
        Wp, bp, Wq, bq, T = fold_temporal_glu(blk['tc1'], T)
        flat += [Wp, bp, Wq, bq]
        ci_gc = blk['tc1']['conv_w'].shape[0] // 2                # tc1 c_out == graph-conv c_in
        Ag, agb, Wk, cb = fold_graph_conv(blk['gc'], ci_gc, T)
        flat += [Ag, agb, Wk, cb]
        Wp, bp, Wq, bq, T = fold_temporal_glu(blk['tc2'], T)
        flat += [Wp, bp, Wq, bq]
        g, b, pavg = fold_layernorm(blk['ln_g'], blk['ln_b'], T, bt)
        flat += [g, b, pavg]
    out = params['out']
    Wp, bp, Wq, bq, T = fold_temporal_glu(out['tc1'], T)
    flat += [Wp, bp, Wq, bq]
    g, b, pavg = fold_layernorm(out['ln_g'], out['ln_b'], T, bt)
    flat += [g, b, pavg]
    flat += [jnp.transpose(out['fc1_w']), out['fc1_b'].reshape(1, -1),
             jnp.transpose(out['fc2_w']), out['fc2_b'].reshape(1, -1)]
    end_c = out['fc2_w'].shape[0]
    return flat, T * end_c


# ==========================================================================
# Pallas wrapper: one pallas_call for the whole forward pass
# ==========================================================================

def _const_spec(a):
    nd = a.ndim
    return pl.BlockSpec(a.shape, lambda b, _nd=nd: (0,) * _nd)


def stgcn_forward_pallas(x_nchw, params, gso, batch_tile=None):
    B, c_in, T, N = x_nchw.shape
    n_st = len(params['st_blocks'])

    # Batch tile: stack bt batches on the sublane axis so bt*N <= 128 (full MXU
    # row height / better vreg sublane utilization).  Falls back to 1 if B has
    # no suitable divisor.
    if batch_tile is None:
        cap = max(1, 128 // N)
        batch_tile = max(d for d in range(1, min(B, cap) + 1) if B % d == 0)
    bt = batch_tile
    assert B % bt == 0, (B, bt)
    G = B // bt
    R = bt * N

    # Single boundary layout conversion: NCHW -> per-tile (bt*N, T*C) slab
    # (rows ordered batch-major, vertex-minor; columns time-major, channel-minor).
    x = jnp.transpose(x_nchw, (0, 3, 2, 1)).reshape(B, N, T * c_in).reshape(G, R, T * c_in)

    # Block-diagonal GSO and per-batch vertex-mean broadcaster (trace-time, tiny).
    eye_bt = jnp.eye(bt, dtype=jnp.float32)
    gso_bd = jnp.kron(eye_bt, gso.astype(jnp.float32))                     # (R, R)
    rows = jnp.kron(eye_bt, jnp.ones((N, N), jnp.float32)) / float(N)      # (R, R)

    flat, out_w = fold_all(params, T, bt)

    in_arrays = [x, gso_bd, rows] + flat
    in_specs = [pl.BlockSpec((1, R, T * c_in), lambda b: (b, 0, 0)),
                _const_spec(gso_bd), _const_spec(rows)]
    in_specs += [_const_spec(w) for w in flat]

    out = pl.pallas_call(
        functools.partial(_stgcn_kernel, n_st=n_st, eps=_EPS),
        grid=(G,),
        in_specs=in_specs,
        out_specs=pl.BlockSpec((1, R, out_w), lambda b: (b, 0, 0)),
        out_shape=jax.ShapeDtypeStruct((G, R, out_w), jnp.float32),
        compiler_params=pltpu.CompilerParams(dimension_semantics=("parallel",)),
    )(*in_arrays)

    end_c = params['out']['fc2_w'].shape[0]
    t_f = out_w // end_c
    return jnp.transpose(out.reshape(B, N, t_f, end_c), (0, 3, 2, 1))  # (B, end_c, T_f, N)


# ==========================================================================
# Pure-JAX reference, written directly from the PyTorch module semantics
# (NCHW, raw Conv2d/Linear parameterization) — independent of the folding.
# ==========================================================================

def ref_align(x, c_out, aw=None, ab=None):
    B, C, T, N = x.shape
    if C > c_out:
        return (jnp.einsum('oc,bctn->botn', aw[:, :, 0, 0], x, precision=_HI)
                + ab.reshape(1, -1, 1, 1))
    if C < c_out:
        pad = jnp.zeros((B, c_out - C, T, N), x.dtype)
        return jnp.concatenate([x, pad], axis=1)
    return x


def ref_temporal_glu(x, p):
    co = p['conv_w'].shape[0] // 2
    K = p['conv_w'].shape[2]
    x_in = ref_align(x, co, p.get('align_w'), p.get('align_b'))[:, :, K - 1:, :]
    w = p['conv_w'][:, :, :, 0]
    B, C, T, N = x.shape
    t_out = T - K + 1
    acc = jnp.zeros((B, 2 * co, t_out, N), jnp.float32)
    for k in range(K):
        acc = acc + jnp.einsum('oc,bctn->botn', w[:, :, k], x[:, :, k:k + t_out, :],
                               precision=_HI)
    acc = acc + p['conv_b'].reshape(1, -1, 1, 1)
    return (acc[:, :co] + x_in) * jax.nn.sigmoid(acc[:, co:])


def ref_cheb_graph_conv(x, p, gso):
    cg = p['cheb_w'].shape[-1]
    Ks = p['cheb_w'].shape[0]
    x_in = ref_align(x, cg, p.get('align_w'), p.get('align_b'))
    xp = jnp.transpose(x_in, (0, 2, 3, 1))                        # (B, T, N, C)
    xs = [xp]
    if Ks >= 2:
        xs.append(jnp.einsum('hi,btic->bthc', gso, xp, precision=_HI))
        for k in range(2, Ks):
            xs.append(2.0 * jnp.einsum('hi,btic->bthc', gso, xs[k - 1], precision=_HI)
                      - xs[k - 2])
    stack = jnp.stack(xs, axis=2)                                 # (B, T, Ks, N, C)
    gc = jnp.einsum('btkhi,kij->bthj', stack, p['cheb_w'], precision=_HI)
    gc = gc + p['cheb_b'].reshape(1, 1, 1, -1)
    return jnp.transpose(gc, (0, 3, 1, 2)) + x_in


def ref_layernorm_nchw(x, gamma, beta, eps):
    xp = jnp.transpose(x, (0, 2, 3, 1))                           # (B, T, N, C)
    mean = jnp.mean(xp, axis=(-2, -1), keepdims=True)
    var = jnp.mean(jnp.square(xp - mean), axis=(-2, -1), keepdims=True)
    y = (xp - mean) * jax.lax.rsqrt(var + eps) * gamma + beta
    return jnp.transpose(y, (0, 3, 1, 2))


def stgcn_forward_ref(x, params, gso, eps=_EPS):
    for blk in params['st_blocks']:
        x = ref_temporal_glu(x, blk['tc1'])
        x = jnp.maximum(ref_cheb_graph_conv(x, blk['gc'], gso), 0.0)
        x = ref_temporal_glu(x, blk['tc2'])
        x = ref_layernorm_nchw(x, blk['ln_g'], blk['ln_b'], eps)
    out = params['out']
    x = ref_temporal_glu(x, out['tc1'])
    xp = jnp.transpose(x, (0, 2, 3, 1))
    mean = jnp.mean(xp, axis=(-2, -1), keepdims=True)
    var = jnp.mean(jnp.square(xp - mean), axis=(-2, -1), keepdims=True)
    xp = (xp - mean) * jax.lax.rsqrt(var + eps) * out['ln_g'] + out['ln_b']
    h = jnp.maximum(jnp.einsum('btnc,oc->btno', xp, out['fc1_w'], precision=_HI)
                    + out['fc1_b'], 0.0)
    y = jnp.einsum('btnc,oc->btno', h, out['fc2_w'], precision=_HI) + out['fc2_b']
    return jnp.transpose(y, (0, 3, 1, 2))


# ==========================================================================
# Deterministic synthetic parameters (PyTorch-style layouts, not a checkpoint)
# ==========================================================================

def _key_iter(key):
    while True:
        key, sub = jax.random.split(key)
        yield sub


def build_params(key, blocks, Kt, Ks, n_vertex, n_his, scale=0.1):
    ks = _key_iter(key)

    def init(shape):
        return scale * jax.random.normal(next(ks), shape, jnp.float32)

    def temporal(c_in, c_out, K):
        p = {'conv_w': init((2 * c_out, c_in, K, 1)), 'conv_b': init((2 * c_out,))}
        if c_in > c_out:
            p['align_w'] = init((c_out, c_in, 1, 1))
            p['align_b'] = init((c_out,))
        return p

    params = {'st_blocks': []}
    n_st = len(blocks) - 3
    for l in range(n_st):
        c_last = blocks[l][-1]
        ch = blocks[l + 1]
        gc = {'cheb_w': init((Ks, ch[1], ch[1])), 'cheb_b': init((ch[1],))}
        if ch[0] > ch[1]:
            gc['align_w'] = init((ch[1], ch[0], 1, 1))
            gc['align_b'] = init((ch[1],))
        params['st_blocks'].append({
            'tc1': temporal(c_last, ch[0], Kt),
            'gc': gc,
            'tc2': temporal(ch[1], ch[2], Kt),
            'ln_g': 1.0 + init((n_vertex, ch[2])),
            'ln_b': init((n_vertex, ch[2])),
        })

    Ko = n_his - n_st * 2 * (Kt - 1)
    assert Ko > 1, "this script implements the Ko > 1 (OutputBlock) path"
    params['Ko'] = Ko
    params['out'] = {
        'tc1': temporal(blocks[-3][-1], blocks[-2][0], Ko),
        'ln_g': 1.0 + init((n_vertex, blocks[-2][0])),
        'ln_b': init((n_vertex, blocks[-2][0])),
        'fc1_w': init((blocks[-2][1], blocks[-2][0])),   # PyTorch Linear (out, in)
        'fc1_b': init((blocks[-2][1],)),
        'fc2_w': init((blocks[-1][0], blocks[-2][1])),
        'fc2_b': init((blocks[-1][0],)),
    }
    return params


# ==========================================================================

if __name__ == "__main__":
    B, n_vertex, n_his = 2, 16, 12
    Kt, Ks = 3, 3
    blocks = [[1], [8, 4, 8], [8, 4, 8], [16, 16], [1]]

    key = jax.random.PRNGKey(0)
    k_gso, k_x, k_params = jax.random.split(key, 3)

    # Synthetic symmetric graph shift operator with small magnitude.
    A = jax.random.normal(k_gso, (n_vertex, n_vertex), jnp.float32)
    gso = 0.5 * (A + A.T) / n_vertex

    params = build_params(k_params, blocks, Kt, Ks, n_vertex, n_his)
    x = jax.random.normal(k_x, (B, blocks[0][-1], n_his, n_vertex), jnp.float32)

    fwd = jax.jit(lambda inp: stgcn_forward_pallas(inp, params, gso))
    out = jax.block_until_ready(fwd(x))

    ref = jax.block_until_ready(jax.jit(lambda inp: stgcn_forward_ref(inp, params, gso))(x))

    assert out.shape == (B, blocks[-1][0], 1, n_vertex), out.shape
    if not bool(jnp.allclose(out, ref, atol=3e-3, rtol=3e-3)):
        raise RuntimeError(
            f"Pallas/ref mismatch: max abs diff = {float(jnp.max(jnp.abs(out - ref)))}")
    print("KERNEL_OK")
</pallas_src>

<mosaic_0001>
module attributes {stable_mosaic.version = 11 : i64} {
  func.func @_stgcn_kernel(%arg0: i32, %arg1: memref<1x32x12xf32, #tpu.memory_space<vmem>>, %arg2: memref<32x32xf32, #tpu.memory_space<vmem>>, %arg3: memref<32x32xf32, #tpu.memory_space<vmem>>, %arg4: memref<12x80xf32, #tpu.memory_space<vmem>>, %arg5: memref<1x80xf32, #tpu.memory_space<vmem>>, %arg6: memref<12x80xf32, #tpu.memory_space<vmem>>, %arg7: memref<1x80xf32, #tpu.memory_space<vmem>>, %arg8: memref<80x40xf32, #tpu.memory_space<vmem>>, %arg9: memref<1x40xf32, #tpu.memory_space<vmem>>, %arg10: memref<3x40x40xf32, #tpu.memory_space<vmem>>, %arg11: memref<1x40xf32, #tpu.memory_space<vmem>>, %arg12: memref<40x64xf32, #tpu.memory_space<vmem>>, %arg13: memref<1x64xf32, #tpu.memory_space<vmem>>, %arg14: memref<40x64xf32, #tpu.memory_space<vmem>>, %arg15: memref<1x64xf32, #tpu.memory_space<vmem>>, %arg16: memref<32x64xf32, #tpu.memory_space<vmem>>, %arg17: memref<32x64xf32, #tpu.memory_space<vmem>>, %arg18: memref<64x64xf32, #tpu.memory_space<vmem>>, %arg19: memref<64x48xf32, #tpu.memory_space<vmem>>, %arg20: memref<1x48xf32, #tpu.memory_space<vmem>>, %arg21: memref<64x48xf32, #tpu.memory_space<vmem>>, %arg22: memref<1x48xf32, #tpu.memory_space<vmem>>, %arg23: memref<48x24xf32, #tpu.memory_space<vmem>>, %arg24: memref<1x24xf32, #tpu.memory_space<vmem>>, %arg25: memref<3x24x24xf32, #tpu.memory_space<vmem>>, %arg26: memref<1x24xf32, #tpu.memory_space<vmem>>, %arg27: memref<24x32xf32, #tpu.memory_space<vmem>>, %arg28: memref<1x32xf32, #tpu.memory_space<vmem>>, %arg29: memref<24x32xf32, #tpu.memory_space<vmem>>, %arg30: memref<1x32xf32, #tpu.memory_space<vmem>>, %arg31: memref<32x32xf32, #tpu.memory_space<vmem>>, %arg32: memref<32x32xf32, #tpu.memory_space<vmem>>, %arg33: memref<32x32xf32, #tpu.memory_space<vmem>>, %arg34: memref<32x16xf32, #tpu.memory_space<vmem>>, %arg35: memref<1x16xf32, #tpu.memory_space<vmem>>, %arg36: memref<32x16xf32, #tpu.memory_space<vmem>>, %arg37: memref<1x16xf32, #tpu.memory_space<vmem>>, %arg38: memref<32x16xf32, #tpu.memory_space<vmem>>, %arg39: memref<32x16xf32, #tpu.memory_space<vmem>>, %arg40: memref<16x16xf32, #tpu.memory_space<vmem>>, %arg41: memref<16x16xf32, #tpu.memory_space<vmem>>, %arg42: memref<1x16xf32, #tpu.memory_space<vmem>>, %arg43: memref<16x1xf32, #tpu.memory_space<vmem>>, %arg44: memref<1x1xf32, #tpu.memory_space<vmem>>, %arg45: memref<1x32x1xf32, #tpu.memory_space<vmem>>) attributes {dimension_semantics = [#tpu.dimension_semantics<parallel>], iteration_bounds = array<i64: 1>, scalar_prefetch = 0 : i64, scratch_operands = 0 : i64, tpu.core_type = #tpu.core_type<tc>, window_params = [{transform_indices = @transform_0, window_bounds = array<i64: 1, 32, 12>}, {pipeline_mode = #tpu.pipeline_mode<synchronous>, transform_indices = @transform_1, window_bounds = array<i64: 32, 32>}, {pipeline_mode = #tpu.pipeline_mode<synchronous>, transform_indices = @transform_2, window_bounds = array<i64: 32, 32>}, {pipeline_mode = #tpu.pipeline_mode<synchronous>, transform_indices = @transform_3, window_bounds = array<i64: 12, 80>}, {pipeline_mode = #tpu.pipeline_mode<synchronous>, transform_indices = @transform_4, window_bounds = array<i64: 1, 80>}, {pipeline_mode = #tpu.pipeline_mode<synchronous>, transform_indices = @transform_5, window_bounds = array<i64: 12, 80>}, {pipeline_mode = #tpu.pipeline_mode<synchronous>, transform_indices = @transform_6, window_bounds = array<i64: 1, 80>}, {pipeline_mode = #tpu.pipeline_mode<synchronous>, transform_indices = @transform_7, window_bounds = array<i64: 80, 40>}, {pipeline_mode = #tpu.pipeline_mode<synchronous>, transform_indices = @transform_8, window_bounds = array<i64: 1, 40>}, {pipeline_mode = #tpu.pipeline_mode<synchronous>, transform_indices = @transform_9, window_bounds = array<i64: 3, 40, 40>}, {pipeline_mode = #tpu.pipeline_mode<synchronous>, transform_indices = @transform_10, window_bounds = array<i64: 1, 40>}, {pipeline_mode = #tpu.pipeline_mode<synchronous>, transform_indices = @transform_11, window_bounds = array<i64: 40, 64>}, {pipeline_mode = #tpu.pipeline_mode<synchronous>, transform_indices = @transform_12, window_bounds = array<i64: 1, 64>}, {pipeline_mode = #tpu.pipeline_mode<synchronous>, transform_indices = @transform_13, window_bounds = array<i64: 40, 64>}, {pipeline_mode = #tpu.pipeline_mode<synchronous>, transform_indices = @transform_14, window_bounds = array<i64: 1, 64>}, {pipeline_mode = #tpu.pipeline_mode<synchronous>, transform_indices = @transform_15, window_bounds = array<i64: 32, 64>}, {pipeline_mode = #tpu.pipeline_mode<synchronous>, transform_indices = @transform_16, window_bounds = array<i64: 32, 64>}, {pipeline_mode = #tpu.pipeline_mode<synchronous>, transform_indices = @transform_17, window_bounds = array<i64: 64, 64>}, {pipeline_mode = #tpu.pipeline_mode<synchronous>, transform_indices = @transform_18, window_bounds = array<i64: 64, 48>}, {pipeline_mode = #tpu.pipeline_mode<synchronous>, transform_indices = @transform_19, window_bounds = array<i64: 1, 48>}, {pipeline_mode = #tpu.pipeline_mode<synchronous>, transform_indices = @transform_20, window_bounds = array<i64: 64, 48>}, {pipeline_mode = #tpu.pipeline_mode<synchronous>, transform_indices = @transform_21, window_bounds = array<i64: 1, 48>}, {pipeline_mode = #tpu.pipeline_mode<synchronous>, transform_indices = @transform_22, window_bounds = array<i64: 48, 24>}, {pipeline_mode = #tpu.pipeline_mode<synchronous>, transform_indices = @transform_23, window_bounds = array<i64: 1, 24>}, {pipeline_mode = #tpu.pipeline_mode<synchronous>, transform_indices = @transform_24, window_bounds = array<i64: 3, 24, 24>}, {pipeline_mode = #tpu.pipeline_mode<synchronous>, transform_indices = @transform_25, window_bounds = array<i64: 1, 24>}, {pipeline_mode = #tpu.pipeline_mode<synchronous>, transform_indices = @transform_26, window_bounds = array<i64: 24, 32>}, {pipeline_mode = #tpu.pipeline_mode<synchronous>, transform_indices = @transform_27, window_bounds = array<i64: 1, 32>}, {pipeline_mode = #tpu.pipeline_mode<synchronous>, transform_indices = @transform_28, window_bounds = array<i64: 24, 32>}, {pipeline_mode = #tpu.pipeline_mode<synchronous>, transform_indices = @transform_29, window_bounds = array<i64: 1, 32>}, {pipeline_mode = #tpu.pipeline_mode<synchronous>, transform_indices = @transform_30, window_bounds = array<i64: 32, 32>}, {pipeline_mode = #tpu.pipeline_mode<synchronous>, transform_indices = @transform_31, window_bounds = array<i64: 32, 32>}, {pipeline_mode = #tpu.pipeline_mode<synchronous>, transform_indices = @transform_32, window_bounds = array<i64: 32, 32>}, {pipeline_mode = #tpu.pipeline_mode<synchronous>, transform_indices = @transform_33, window_bounds = array<i64: 32, 16>}, {pipeline_mode = #tpu.pipeline_mode<synchronous>, transform_indices = @transform_34, window_bounds = array<i64: 1, 16>}, {pipeline_mode = #tpu.pipeline_mode<synchronous>, transform_indices = @transform_35, window_bounds = array<i64: 32, 16>}, {pipeline_mode = #tpu.pipeline_mode<synchronous>, transform_indices = @transform_36, window_bounds = array<i64: 1, 16>}, {pipeline_mode = #tpu.pipeline_mode<synchronous>, transform_indices = @transform_37, window_bounds = array<i64: 32, 16>}, {pipeline_mode = #tpu.pipeline_mode<synchronous>, transform_indices = @transform_38, window_bounds = array<i64: 32, 16>}, {pipeline_mode = #tpu.pipeline_mode<synchronous>, transform_indices = @transform_39, window_bounds = array<i64: 16, 16>}, {pipeline_mode = #tpu.pipeline_mode<synchronous>, transform_indices = @transform_40, window_bounds = array<i64: 16, 16>}, {pipeline_mode = #tpu.pipeline_mode<synchronous>, transform_indices = @transform_41, window_bounds = array<i64: 1, 16>}, {pipeline_mode = #tpu.pipeline_mode<synchronous>, transform_indices = @transform_42, window_bounds = array<i64: 16, 1>}, {pipeline_mode = #tpu.pipeline_mode<synchronous>, transform_indices = @transform_43, window_bounds = array<i64: 1, 1>}, {transform_indices = @transform_44, window_bounds = array<i64: 1, 32, 1>}]} {
    %c0 = arith.constant 0 : index
    %c0_0 = arith.constant 0 : index
    %c0_1 = arith.constant 0 : index
    %0 = vector.load %arg1[%c0, %c0_0, %c0_1] : memref<1x32x12xf32, #tpu.memory_space<vmem>>, vector<1x32x12xf32>
    %1 = vector.shape_cast %0 : vector<1x32x12xf32> to vector<32x12xf32>
    %c0_2 = arith.constant 0 : index
    %c0_3 = arith.constant 0 : index
    %2 = vector.load %arg2[%c0_2, %c0_3] : memref<32x32xf32, #tpu.memory_space<vmem>>, vector<32x32xf32>
    %c0_4 = arith.constant 0 : index
    %c0_5 = arith.constant 0 : index
    %3 = vector.load %arg3[%c0_4, %c0_5] : memref<32x32xf32, #tpu.memory_space<vmem>>, vector<32x32xf32>
    %c0_6 = arith.constant 0 : index
    %c0_7 = arith.constant 0 : index
    %4 = vector.load %arg4[%c0_6, %c0_7] : memref<12x80xf32, #tpu.memory_space<vmem>>, vector<12x80xf32>
    %c0_8 = arith.constant 0 : index
    %c0_9 = arith.constant 0 : index
    %5 = vector.load %arg5[%c0_8, %c0_9] : memref<1x80xf32, #tpu.memory_space<vmem>>, vector<1x80xf32>
    %c0_10 = arith.constant 0 : index
    %c0_11 = arith.constant 0 : index
    %6 = vector.load %arg6[%c0_10, %c0_11] : memref<12x80xf32, #tpu.memory_space<vmem>>, vector<12x80xf32>
    %c0_12 = arith.constant 0 : index
    %c0_13 = arith.constant 0 : index
    %7 = vector.load %arg7[%c0_12, %c0_13] : memref<1x80xf32, #tpu.memory_space<vmem>>, vector<1x80xf32>
    %cst = arith.constant dense<0.000000e+00> : vector<32x80xf32>
    %8 = tpu.matmul %1, %4, %cst {dimension_numbers = #tpu.dot_dimension_numbers<[1], [0], [0], [1], [0, 0, 1, 1], [], []>} : vector<32x12xf32>, vector<12x80xf32>, vector<32x80xf32> -> vector<32x80xf32>
    %9 = vector.broadcast %5 : vector<1x80xf32> to vector<32x80xf32>
    %10 = arith.addf %8, %9 : vector<32x80xf32>
    %cst_14 = arith.constant dense<0.000000e+00> : vector<32x80xf32>
    %11 = tpu.matmul %1, %6, %cst_14 {dimension_numbers = #tpu.dot_dimension_numbers<[1], [0], [0], [1], [0, 0, 1, 1], [], []>} : vector<32x12xf32>, vector<12x80xf32>, vector<32x80xf32> -> vector<32x80xf32>
    %12 = vector.broadcast %7 : vector<1x80xf32> to vector<32x80xf32>
    %13 = arith.addf %11, %12 : vector<32x80xf32>
    %14 = arith.negf %13 : vector<32x80xf32>
    %15 = math.exp %14 : vector<32x80xf32>
    %cst_15 = arith.constant 1.000000e+00 : f32
    %16 = vector.broadcast %cst_15 : f32 to vector<32x80xf32>
    %17 = arith.addf %16, %15 : vector<32x80xf32>
    %18 = arith.divf %16, %17 : vector<32x80xf32>
    %19 = arith.mulf %10, %18 : vector<32x80xf32>
    %c0_16 = arith.constant 0 : index
    %c0_17 = arith.constant 0 : index
    %20 = vector.load %arg8[%c0_16, %c0_17] : memref<80x40xf32, #tpu.memory_space<vmem>>, vector<80x40xf32>
    %c0_18 = arith.constant 0 : index
    %c0_19 = arith.constant 0 : index
    %21 = vector.load %arg9[%c0_18, %c0_19] : memref<1x40xf32, #tpu.memory_space<vmem>>, vector<1x40xf32>
    %c0_20 = arith.constant 0 : index
    %c0_21 = arith.constant 0 : index
    %22 = vector.load %arg11[%c0_20, %c0_21] : memref<1x40xf32, #tpu.memory_space<vmem>>, vector<1x40xf32>
    %cst_22 = arith.constant dense<0.000000e+00> : vector<32x40xf32>
    %23 = tpu.matmul %19, %20, %cst_22 {dimension_numbers = #tpu.dot_dimension_numbers<[1], [0], [0], [1], [0, 0, 1, 1], [], []>} : vector<32x80xf32>, vector<80x40xf32>, vector<32x40xf32> -> vector<32x40xf32>
    %24 = vector.broadcast %21 : vector<1x40xf32> to vector<32x40xf32>
    %25 = arith.addf %23, %24 : vector<32x40xf32>
    %c0_23 = arith.constant 0 : index
    %c0_24 = arith.constant 0 : index
    %c0_25 = arith.constant 0 : index
    %26 = vector.load %arg10[%c0_23, %c0_24, %c0_25] : memref<3x40x40xf32, #tpu.memory_space<vmem>>, vector<1x40x40xf32>
    %27 = vector.shape_cast %26 : vector<1x40x40xf32> to vector<40x40xf32>
    %cst_26 = arith.constant dense<0.000000e+00> : vector<32x40xf32>
    %28 = tpu.matmul %25, %27, %cst_26 {dimension_numbers = #tpu.dot_dimension_numbers<[1], [0], [0], [1], [0, 0, 1, 1], [], []>} : vector<32x40xf32>, vector<40x40xf32>, vector<32x40xf32> -> vector<32x40xf32>
    %cst_27 = arith.constant dense<0.000000e+00> : vector<32x40xf32>
    %29 = tpu.matmul %2, %25, %cst_27 {dimension_numbers = #tpu.dot_dimension_numbers<[1], [0], [0], [1], [0, 0, 1, 1], [], []>} : vector<32x32xf32>, vector<32x40xf32>, vector<32x40xf32> -> vector<32x40xf32>
    %c1 = arith.constant 1 : index
    %c0_28 = arith.constant 0 : index
    %c0_29 = arith.constant 0 : index
    %30 = vector.load %arg10[%c1, %c0_28, %c0_29] : memref<3x40x40xf32, #tpu.memory_space<vmem>>, vector<1x40x40xf32>
    %31 = vector.shape_cast %30 : vector<1x40x40xf32> to vector<40x40xf32>
    %cst_30 = arith.constant dense<0.000000e+00> : vector<32x40xf32>
    %32 = tpu.matmul %29, %31, %cst_30 {dimension_numbers = #tpu.dot_dimension_numbers<[1], [0], [0], [1], [0, 0, 1, 1], [], []>} : vector<32x40xf32>, vector<40x40xf32>, vector<32x40xf32> -> vector<32x40xf32>
    %33 = arith.addf %28, %32 : vector<32x40xf32>
    %cst_31 = arith.constant dense<0.000000e+00> : vector<32x40xf32>
    %34 = tpu.matmul %2, %29, %cst_31 {dimension_numbers = #tpu.dot_dimension_numbers<[1], [0], [0], [1], [0, 0, 1, 1], [], []>} : vector<32x32xf32>, vector<32x40xf32>, vector<32x40xf32> -> vector<32x40xf32>
    %cst_32 = arith.constant 2.000000e+00 : f32
    %35 = vector.broadcast %cst_32 : f32 to vector<32x40xf32>
    %36 = arith.mulf %35, %34 : vector<32x40xf32>
    %37 = arith.subf %36, %25 : vector<32x40xf32>
    %c2 = arith.constant 2 : index
    %c0_33 = arith.constant 0 : index
    %c0_34 = arith.constant 0 : index
    %38 = vector.load %arg10[%c2, %c0_33, %c0_34] : memref<3x40x40xf32, #tpu.memory_space<vmem>>, vector<1x40x40xf32>
    %39 = vector.shape_cast %38 : vector<1x40x40xf32> to vector<40x40xf32>
    %cst_35 = arith.constant dense<0.000000e+00> : vector<32x40xf32>
    %40 = tpu.matmul %37, %39, %cst_35 {dimension_numbers = #tpu.dot_dimension_numbers<[1], [0], [0], [1], [0, 0, 1, 1], [], []>} : vector<32x40xf32>, vector<40x40xf32>, vector<32x40xf32> -> vector<32x40xf32>
    %41 = arith.addf %33, %40 : vector<32x40xf32>
    %42 = vector.broadcast %22 : vector<1x40xf32> to vector<32x40xf32>
    %43 = arith.addf %41, %42 : vector<32x40xf32>
    %44 = arith.addf %43, %25 : vector<32x40xf32>
    %cst_36 = arith.constant 0.000000e+00 : f32
    %45 = vector.broadcast %cst_36 : f32 to vector<32x40xf32>
    %46 = arith.maximumf %44, %45 : vector<32x40xf32>
    %c0_37 = arith.constant 0 : index
    %c0_38 = arith.constant 0 : index
    %47 = vector.load %arg12[%c0_37, %c0_38] : memref<40x64xf32, #tpu.memory_space<vmem>>, vector<40x64xf32>
    %c0_39 = arith.constant 0 : index
    %c0_40 = arith.constant 0 : index
    %48 = vector.load %arg13[%c0_39, %c0_40] : memref<1x64xf32, #tpu.memory_space<vmem>>, vector<1x64xf32>
    %c0_41 = arith.constant 0 : index
    %c0_42 = arith.constant 0 : index
    %49 = vector.load %arg14[%c0_41, %c0_42] : memref<40x64xf32, #tpu.memory_space<vmem>>, vector<40x64xf32>
    %c0_43 = arith.constant 0 : index
    %c0_44 = arith.constant 0 : index
    %50 = vector.load %arg15[%c0_43, %c0_44] : memref<1x64xf32, #tpu.memory_space<vmem>>, vector<1x64xf32>
    %cst_45 = arith.constant dense<0.000000e+00> : vector<32x64xf32>
    %51 = tpu.matmul %46, %47, %cst_45 {dimension_numbers = #tpu.dot_dimension_numbers<[1], [0], [0], [1], [0, 0, 1, 1], [], []>} : vector<32x40xf32>, vector<40x64xf32>, vector<32x64xf32> -> vector<32x64xf32>
    %52 = vector.broadcast %48 : vector<1x64xf32> to vector<32x64xf32>
    %53 = arith.addf %51, %52 : vector<32x64xf32>
    %cst_46 = arith.constant dense<0.000000e+00> : vector<32x64xf32>
    %54 = tpu.matmul %46, %49, %cst_46 {dimension_numbers = #tpu.dot_dimension_numbers<[1], [0], [0], [1], [0, 0, 1, 1], [], []>} : vector<32x40xf32>, vector<40x64xf32>, vector<32x64xf32> -> vector<32x64xf32>
    %55 = vector.broadcast %50 : vector<1x64xf32> to vector<32x64xf32>
    %56 = arith.addf %54, %55 : vector<32x64xf32>
    %57 = arith.negf %56 : vector<32x64xf32>
    %58 = math.exp %57 : vector<32x64xf32>
    %cst_47 = arith.constant 1.000000e+00 : f32
    %59 = vector.broadcast %cst_47 : f32 to vector<32x64xf32>
    %60 = arith.addf %59, %58 : vector<32x64xf32>
    %61 = arith.divf %59, %60 : vector<32x64xf32>
    %62 = arith.mulf %53, %61 : vector<32x64xf32>
    %c0_48 = arith.constant 0 : index
    %c0_49 = arith.constant 0 : index
    %63 = vector.load %arg16[%c0_48, %c0_49] : memref<32x64xf32, #tpu.memory_space<vmem>>, vector<32x64xf32>
    %c0_50 = arith.constant 0 : index
    %c0_51 = arith.constant 0 : index
    %64 = vector.load %arg17[%c0_50, %c0_51] : memref<32x64xf32, #tpu.memory_space<vmem>>, vector<32x64xf32>
    %c0_52 = arith.constant 0 : index
    %c0_53 = arith.constant 0 : index
    %65 = vector.load %arg18[%c0_52, %c0_53] : memref<64x64xf32, #tpu.memory_space<vmem>>, vector<64x64xf32>
    %cst_54 = arith.constant dense<0.000000e+00> : vector<32x64xf32>
    %66 = tpu.matmul %3, %62, %cst_54 {dimension_numbers = #tpu.dot_dimension_numbers<[1], [0], [0], [1], [0, 0, 1, 1], [], []>} : vector<32x32xf32>, vector<32x64xf32>, vector<32x64xf32> -> vector<32x64xf32>
    %cst_55 = arith.constant dense<0.000000e+00> : vector<32x64xf32>
    %67 = tpu.matmul %66, %65, %cst_55 {dimension_numbers = #tpu.dot_dimension_numbers<[1], [0], [0], [1], [0, 0, 1, 1], [], []>} : vector<32x64xf32>, vector<64x64xf32>, vector<32x64xf32> -> vector<32x64xf32>
    %68 = arith.subf %62, %67 : vector<32x64xf32>
    %69 = arith.mulf %68, %68 : vector<32x64xf32>
    %cst_56 = arith.constant dense<0.000000e+00> : vector<32x64xf32>
    %70 = tpu.matmul %3, %69, %cst_56 {dimension_numbers = #tpu.dot_dimension_numbers<[1], [0], [0], [1], [0, 0, 1, 1], [], []>} : vector<32x32xf32>, vector<32x64xf32>, vector<32x64xf32> -> vector<32x64xf32>
    %cst_57 = arith.constant dense<0.000000e+00> : vector<32x64xf32>
    %71 = tpu.matmul %70, %65, %cst_57 {dimension_numbers = #tpu.dot_dimension_numbers<[1], [0], [0], [1], [0, 0, 1, 1], [], []>} : vector<32x64xf32>, vector<64x64xf32>, vector<32x64xf32> -> vector<32x64xf32>
    %cst_58 = arith.constant 9.99999996E-13 : f32
    %72 = vector.broadcast %cst_58 : f32 to vector<32x64xf32>
    %73 = arith.addf %71, %72 : vector<32x64xf32>
    %74 = math.rsqrt %73 : vector<32x64xf32>
    %75 = arith.mulf %68, %74 : vector<32x64xf32>
    %76 = arith.mulf %75, %63 : vector<32x64xf32>
    %77 = arith.addf %76, %64 : vector<32x64xf32>
    %c0_59 = arith.constant 0 : index
    %c0_60 = arith.constant 0 : index
    %78 = vector.load %arg19[%c0_59, %c0_60] : memref<64x48xf32, #tpu.memory_space<vmem>>, vector<64x48xf32>
    %c0_61 = arith.constant 0 : index
    %c0_62 = arith.constant 0 : index
    %79 = vector.load %arg20[%c0_61, %c0_62] : memref<1x48xf32, #tpu.memory_space<vmem>>, vector<1x48xf32>
    %c0_63 = arith.constant 0 : index
    %c0_64 = arith.constant 0 : index
    %80 = vector.load %arg21[%c0_63, %c0_64] : memref<64x48xf32, #tpu.memory_space<vmem>>, vector<64x48xf32>
    %c0_65 = arith.constant 0 : index
    %c0_66 = arith.constant 0 : index
    %81 = vector.load %arg22[%c0_65, %c0_66] : memref<1x48xf32, #tpu.memory_space<vmem>>, vector<1x48xf32>
    %cst_67 = arith.constant dense<0.000000e+00> : vector<32x48xf32>
    %82 = tpu.matmul %77, %78, %cst_67 {dimension_numbers = #tpu.dot_dimension_numbers<[1], [0], [0], [1], [0, 0, 1, 1], [], []>} : vector<32x64xf32>, vector<64x48xf32>, vector<32x48xf32> -> vector<32x48xf32>
    %83 = vector.broadcast %79 : vector<1x48xf32> to vector<32x48xf32>
    %84 = arith.addf %82, %83 : vector<32x48xf32>
    %cst_68 = arith.constant dense<0.000000e+00> : vector<32x48xf32>
    %85 = tpu.matmul %77, %80, %cst_68 {dimension_numbers = #tpu.dot_dimension_numbers<[1], [0], [0], [1], [0, 0, 1, 1], [], []>} : vector<32x64xf32>, vector<64x48xf32>, vector<32x48xf32> -> vector<32x48xf32>
    %86 = vector.broadcast %81 : vector<1x48xf32> to vector<32x48xf32>
    %87 = arith.addf %85, %86 : vector<32x48xf32>
    %88 = arith.negf %87 : vector<32x48xf32>
    %89 = math.exp %88 : vector<32x48xf32>
    %cst_69 = arith.constant 1.000000e+00 : f32
    %90 = vector.broadcast %cst_69 : f32 to vector<32x48xf32>
    %91 = arith.addf %90, %89 : vector<32x48xf32>
    %92 = arith.divf %90, %91 : vector<32x48xf32>
    %93 = arith.mulf %84, %92 : vector<32x48xf32>
    %c0_70 = arith.constant 0 : index
    %c0_71 = arith.constant 0 : index
    %94 = vector.load %arg23[%c0_70, %c0_71] : memref<48x24xf32, #tpu.memory_space<vmem>>, vector<48x24xf32>
    %c0_72 = arith.constant 0 : index
    %c0_73 = arith.constant 0 : index
    %95 = vector.load %arg24[%c0_72, %c0_73] : memref<1x24xf32, #tpu.memory_space<vmem>>, vector<1x24xf32>
    %c0_74 = arith.constant 0 : index
    %c0_75 = arith.constant 0 : index
    %96 = vector.load %arg26[%c0_74, %c0_75] : memref<1x24xf32, #tpu.memory_space<vmem>>, vector<1x24xf32>
    %cst_76 = arith.constant dense<0.000000e+00> : vector<32x24xf32>
    %97 = tpu.matmul %93, %94, %cst_76 {dimension_numbers = #tpu.dot_dimension_numbers<[1], [0], [0], [1], [0, 0, 1, 1], [], []>} : vector<32x48xf32>, vector<48x24xf32>, vector<32x24xf32> -> vector<32x24xf32>
    %98 = vector.broadcast %95 : vector<1x24xf32> to vector<32x24xf32>
    %99 = arith.addf %97, %98 : vector<32x24xf32>
    %c0_77 = arith.constant 0 : index
    %c0_78 = arith.constant 0 : index
    %c0_79 = arith.constant 0 : index
    %100 = vector.load %arg25[%c0_77, %c0_78, %c0_79] : memref<3x24x24xf32, #tpu.memory_space<vmem>>, vector<1x24x24xf32>
    %101 = vector.shape_cast %100 : vector<1x24x24xf32> to vector<24x24xf32>
    %cst_80 = arith.constant dense<0.000000e+00> : vector<32x24xf32>
    %102 = tpu.matmul %99, %101, %cst_80 {dimension_numbers = #tpu.dot_dimension_numbers<[1], [0], [0], [1], [0, 0, 1, 1], [], []>} : vector<32x24xf32>, vector<24x24xf32>, vector<32x24xf32> -> vector<32x24xf32>
    %cst_81 = arith.constant dense<0.000000e+00> : vector<32x24xf32>
    %103 = tpu.matmul %2, %99, %cst_81 {dimension_numbers = #tpu.dot_dimension_numbers<[1], [0], [0], [1], [0, 0, 1, 1], [], []>} : vector<32x32xf32>, vector<32x24xf32>, vector<32x24xf32> -> vector<32x24xf32>
    %c1_82 = arith.constant 1 : index
    %c0_83 = arith.constant 0 : index
    %c0_84 = arith.constant 0 : index
    %104 = vector.load %arg25[%c1_82, %c0_83, %c0_84] : memref<3x24x24xf32, #tpu.memory_space<vmem>>, vector<1x24x24xf32>
    %105 = vector.shape_cast %104 : vector<1x24x24xf32> to vector<24x24xf32>
    %cst_85 = arith.constant dense<0.000000e+00> : vector<32x24xf32>
    %106 = tpu.matmul %103, %105, %cst_85 {dimension_numbers = #tpu.dot_dimension_numbers<[1], [0], [0], [1], [0, 0, 1, 1], [], []>} : vector<32x24xf32>, vector<24x24xf32>, vector<32x24xf32> -> vector<32x24xf32>
    %107 = arith.addf %102, %106 : vector<32x24xf32>
    %cst_86 = arith.constant dense<0.000000e+00> : vector<32x24xf32>
    %108 = tpu.matmul %2, %103, %cst_86 {dimension_numbers = #tpu.dot_dimension_numbers<[1], [0], [0], [1], [0, 0, 1, 1], [], []>} : vector<32x32xf32>, vector<32x24xf32>, vector<32x24xf32> -> vector<32x24xf32>
    %cst_87 = arith.constant 2.000000e+00 : f32
    %109 = vector.broadcast %cst_87 : f32 to vector<32x24xf32>
    %110 = arith.mulf %109, %108 : vector<32x24xf32>
    %111 = arith.subf %110, %99 : vector<32x24xf32>
    %c2_88 = arith.constant 2 : index
    %c0_89 = arith.constant 0 : index
    %c0_90 = arith.constant 0 : index
    %112 = vector.load %arg25[%c2_88, %c0_89, %c0_90] : memref<3x24x24xf32, #tpu.memory_space<vmem>>, vector<1x24x24xf32>
    %113 = vector.shape_cast %112 : vector<1x24x24xf32> to vector<24x24xf32>
    %cst_91 = arith.constant dense<0.000000e+00> : vector<32x24xf32>
    %114 = tpu.matmul %111, %113, %cst_91 {dimension_numbers = #tpu.dot_dimension_numbers<[1], [0], [0], [1], [0, 0, 1, 1], [], []>} : vector<32x24xf32>, vector<24x24xf32>, vector<32x24xf32> -> vector<32x24xf32>
    %115 = arith.addf %107, %114 : vector<32x24xf32>
    %116 = vector.broadcast %96 : vector<1x24xf32> to vector<32x24xf32>
    %117 = arith.addf %115, %116 : vector<32x24xf32>
    %118 = arith.addf %117, %99 : vector<32x24xf32>
    %cst_92 = arith.constant 0.000000e+00 : f32
    %119 = vector.broadcast %cst_92 : f32 to vector<32x24xf32>
    %120 = arith.maximumf %118, %119 : vector<32x24xf32>
    %c0_93 = arith.constant 0 : index
    %c0_94 = arith.constant 0 : index
    %121 = vector.load %arg27[%c0_93, %c0_94] : memref<24x32xf32, #tpu.memory_space<vmem>>, vector<24x32xf32>
    %c0_95 = arith.constant 0 : index
    %c0_96 = arith.constant 0 : index
    %122 = vector.load %arg28[%c0_95, %c0_96] : memref<1x32xf32, #tpu.memory_space<vmem>>, vector<1x32xf32>
    %c0_97 = arith.constant 0 : index
    %c0_98 = arith.constant 0 : index
    %123 = vector.load %arg29[%c0_97, %c0_98] : memref<24x32xf32, #tpu.memory_space<vmem>>, vector<24x32xf32>
    %c0_99 = arith.constant 0 : index
    %c0_100 = arith.constant 0 : index
    %124 = vector.load %arg30[%c0_99, %c0_100] : memref<1x32xf32, #tpu.memory_space<vmem>>, vector<1x32xf32>
    %cst_101 = arith.constant dense<0.000000e+00> : vector<32x32xf32>
    %125 = tpu.matmul %120, %121, %cst_101 {dimension_numbers = #tpu.dot_dimension_numbers<[1], [0], [0], [1], [0, 0, 1, 1], [], []>} : vector<32x24xf32>, vector<24x32xf32>, vector<32x32xf32> -> vector<32x32xf32>
    %126 = vector.broadcast %122 : vector<1x32xf32> to vector<32x32xf32>
    %127 = arith.addf %125, %126 : vector<32x32xf32>
    %cst_102 = arith.constant dense<0.000000e+00> : vector<32x32xf32>
    %128 = tpu.matmul %120, %123, %cst_102 {dimension_numbers = #tpu.dot_dimension_numbers<[1], [0], [0], [1], [0, 0, 1, 1], [], []>} : vector<32x24xf32>, vector<24x32xf32>, vector<32x32xf32> -> vector<32x32xf32>
    %129 = vector.broadcast %124 : vector<1x32xf32> to vector<32x32xf32>
    %130 = arith.addf %128, %129 : vector<32x32xf32>
    %131 = arith.negf %130 : vector<32x32xf32>
    %132 = math.exp %131 : vector<32x32xf32>
    %cst_103 = arith.constant 1.000000e+00 : f32
    %133 = vector.broadcast %cst_103 : f32 to vector<32x32xf32>
    %134 = arith.addf %133, %132 : vector<32x32xf32>
    %135 = arith.divf %133, %134 : vector<32x32xf32>
    %136 = arith.mulf %127, %135 : vector<32x32xf32>
    %c0_104 = arith.constant 0 : index
    %c0_105 = arith.constant 0 : index
    %137 = vector.load %arg31[%c0_104, %c0_105] : memref<32x32xf32, #tpu.memory_space<vmem>>, vector<32x32xf32>
    %c0_106 = arith.constant 0 : index
    %c0_107 = arith.constant 0 : index
    %138 = vector.load %arg32[%c0_106, %c0_107] : memref<32x32xf32, #tpu.memory_space<vmem>>, vector<32x32xf32>
    %c0_108 = arith.constant 0 : index
    %c0_109 = arith.constant 0 : index
    %139 = vector.load %arg33[%c0_108, %c0_109] : memref<32x32xf32, #tpu.memory_space<vmem>>, vector<32x32xf32>
    %cst_110 = arith.constant dense<0.000000e+00> : vector<32x32xf32>
    %140 = tpu.matmul %3, %136, %cst_110 {dimension_numbers = #tpu.dot_dimension_numbers<[1], [0], [0], [1], [0, 0, 1, 1], [], []>} : vector<32x32xf32>, vector<32x32xf32>, vector<32x32xf32> -> vector<32x32xf32>
    %cst_111 = arith.constant dense<0.000000e+00> : vector<32x32xf32>
    %141 = tpu.matmul %140, %139, %cst_111 {dimension_numbers = #tpu.dot_dimension_numbers<[1], [0], [0], [1], [0, 0, 1, 1], [], []>} : vector<32x32xf32>, vector<32x32xf32>, vector<32x32xf32> -> vector<32x32xf32>
    %142 = arith.subf %136, %141 : vector<32x32xf32>
    %143 = arith.mulf %142, %142 : vector<32x32xf32>
    %cst_112 = arith.constant dense<0.000000e+00> : vector<32x32xf32>
    %144 = tpu.matmul %3, %143, %cst_112 {dimension_numbers = #tpu.dot_dimension_numbers<[1], [0], [0], [1], [0, 0, 1, 1], [], []>} : vector<32x32xf32>, vector<32x32xf32>, vector<32x32xf32> -> vector<32x32xf32>
    %cst_113 = arith.constant dense<0.000000e+00> : vector<32x32xf32>
    %145 = tpu.matmul %144, %139, %cst_113 {dimension_numbers = #tpu.dot_dimension_numbers<[1], [0], [0], [1], [0, 0, 1, 1], [], []>} : vector<32x32xf32>, vector<32x32xf32>, vector<32x32xf32> -> vector<32x32xf32>
    %cst_114 = arith.constant 9.99999996E-13 : f32
    %146 = vector.broadcast %cst_114 : f32 to vector<32x32xf32>
    %147 = arith.addf %145, %146 : vector<32x32xf32>
    %148 = math.rsqrt %147 : vector<32x32xf32>
    %149 = arith.mulf %142, %148 : vector<32x32xf32>
    %150 = arith.mulf %149, %137 : vector<32x32xf32>
    %151 = arith.addf %150, %138 : vector<32x32xf32>
    %c0_115 = arith.constant 0 : index
    %c0_116 = arith.constant 0 : index
    %152 = vector.load %arg34[%c0_115, %c0_116] : memref<32x16xf32, #tpu.memory_space<vmem>>, vector<32x16xf32>
    %c0_117 = arith.constant 0 : index
    %c0_118 = arith.constant 0 : index
    %153 = vector.load %arg35[%c0_117, %c0_118] : memref<1x16xf32, #tpu.memory_space<vmem>>, vector<1x16xf32>
    %c0_119 = arith.constant 0 : index
    %c0_120 = arith.constant 0 : index
    %154 = vector.load %arg36[%c0_119, %c0_120] : memref<32x16xf32, #tpu.memory_space<vmem>>, vector<32x16xf32>
    %c0_121 = arith.constant 0 : index
    %c0_122 = arith.constant 0 : index
    %155 = vector.load %arg37[%c0_121, %c0_122] : memref<1x16xf32, #tpu.memory_space<vmem>>, vector<1x16xf32>
    %cst_123 = arith.constant dense<0.000000e+00> : vector<32x16xf32>
    %156 = tpu.matmul %151, %152, %cst_123 {dimension_numbers = #tpu.dot_dimension_numbers<[1], [0], [0], [1], [0, 0, 1, 1], [], []>} : vector<32x32xf32>, vector<32x16xf32>, vector<32x16xf32> -> vector<32x16xf32>
    %157 = vector.broadcast %153 : vector<1x16xf32> to vector<32x16xf32>
    %158 = arith.addf %156, %157 : vector<32x16xf32>
    %cst_124 = arith.constant dense<0.000000e+00> : vector<32x16xf32>
    %159 = tpu.matmul %151, %154, %cst_124 {dimension_numbers = #tpu.dot_dimension_numbers<[1], [0], [0], [1], [0, 0, 1, 1], [], []>} : vector<32x32xf32>, vector<32x16xf32>, vector<32x16xf32> -> vector<32x16xf32>
    %160 = vector.broadcast %155 : vector<1x16xf32> to vector<32x16xf32>
    %161 = arith.addf %159, %160 : vector<32x16xf32>
    %162 = arith.negf %161 : vector<32x16xf32>
    %163 = math.exp %162 : vector<32x16xf32>
    %cst_125 = arith.constant 1.000000e+00 : f32
    %164 = vector.broadcast %cst_125 : f32 to vector<32x16xf32>
    %165 = arith.addf %164, %163 : vector<32x16xf32>
    %166 = arith.divf %164, %165 : vector<32x16xf32>
    %167 = arith.mulf %158, %166 : vector<32x16xf32>
    %c0_126 = arith.constant 0 : index
    %c0_127 = arith.constant 0 : index
    %168 = vector.load %arg38[%c0_126, %c0_127] : memref<32x16xf32, #tpu.memory_space<vmem>>, vector<32x16xf32>
    %c0_128 = arith.constant 0 : index
    %c0_129 = arith.constant 0 : index
    %169 = vector.load %arg39[%c0_128, %c0_129] : memref<32x16xf32, #tpu.memory_space<vmem>>, vector<32x16xf32>
    %c0_130 = arith.constant 0 : index
    %c0_131 = arith.constant 0 : index
    %170 = vector.load %arg40[%c0_130, %c0_131] : memref<16x16xf32, #tpu.memory_space<vmem>>, vector<16x16xf32>
    %cst_132 = arith.constant dense<0.000000e+00> : vector<32x16xf32>
    %171 = tpu.matmul %3, %167, %cst_132 {dimension_numbers = #tpu.dot_dimension_numbers<[1], [0], [0], [1], [0, 0, 1, 1], [], []>} : vector<32x32xf32>, vector<32x16xf32>, vector<32x16xf32> -> vector<32x16xf32>
    %cst_133 = arith.constant dense<0.000000e+00> : vector<32x16xf32>
    %172 = tpu.matmul %171, %170, %cst_133 {dimension_numbers = #tpu.dot_dimension_numbers<[1], [0], [0], [1], [0, 0, 1, 1], [], []>} : vector<32x16xf32>, vector<16x16xf32>, vector<32x16xf32> -> vector<32x16xf32>
    %173 = arith.subf %167, %172 : vector<32x16xf32>
    %174 = arith.mulf %173, %173 : vector<32x16xf32>
    %cst_134 = arith.constant dense<0.000000e+00> : vector<32x16xf32>
    %175 = tpu.matmul %3, %174, %cst_134 {dimension_numbers = #tpu.dot_dimension_numbers<[1], [0], [0], [1], [0, 0, 1, 1], [], []>} : vector<32x32xf32>, vector<32x16xf32>, vector<32x16xf32> -> vector<32x16xf32>
    %cst_135 = arith.constant dense<0.000000e+00> : vector<32x16xf32>
    %176 = tpu.matmul %175, %170, %cst_135 {dimension_numbers = #tpu.dot_dimension_numbers<[1], [0], [0], [1], [0, 0, 1, 1], [], []>} : vector<32x16xf32>, vector<16x16xf32>, vector<32x16xf32> -> vector<32x16xf32>
    %cst_136 = arith.constant 9.99999996E-13 : f32
    %177 = vector.broadcast %cst_136 : f32 to vector<32x16xf32>
    %178 = arith.addf %176, %177 : vector<32x16xf32>
    %179 = math.rsqrt %178 : vector<32x16xf32>
    %180 = arith.mulf %173, %179 : vector<32x16xf32>
    %181 = arith.mulf %180, %168 : vector<32x16xf32>
    %182 = arith.addf %181, %169 : vector<32x16xf32>
    %c0_137 = arith.constant 0 : index
    %c0_138 = arith.constant 0 : index
    %183 = vector.load %arg41[%c0_137, %c0_138] : memref<16x16xf32, #tpu.memory_space<vmem>>, vector<16x16xf32>
    %cst_139 = arith.constant dense<0.000000e+00> : vector<32x16xf32>
    %184 = tpu.matmul %182, %183, %cst_139 {dimension_numbers = #tpu.dot_dimension_numbers<[1], [0], [0], [1], [0, 0, 1, 1], [], []>} : vector<32x16xf32>, vector<16x16xf32>, vector<32x16xf32> -> vector<32x16xf32>
    %c0_140 = arith.constant 0 : index
    %c0_141 = arith.constant 0 : index
    %185 = vector.load %arg42[%c0_140, %c0_141] : memref<1x16xf32, #tpu.memory_space<vmem>>, vector<1x16xf32>
    %186 = vector.broadcast %185 : vector<1x16xf32> to vector<32x16xf32>
    %187 = arith.addf %184, %186 : vector<32x16xf32>
    %cst_142 = arith.constant 0.000000e+00 : f32
    %188 = vector.broadcast %cst_142 : f32 to vector<32x16xf32>
    %189 = arith.maximumf %187, %188 : vector<32x16xf32>
    %c0_143 = arith.constant 0 : index
    %c0_144 = arith.constant 0 : index
    %190 = vector.load %arg43[%c0_143, %c0_144] : memref<16x1xf32, #tpu.memory_space<vmem>>, vector<16x1xf32>
    %cst_145 = arith.constant dense<0.000000e+00> : vector<32x1xf32>
    %191 = tpu.matmul %189, %190, %cst_145 {dimension_numbers = #tpu.dot_dimension_numbers<[1], [0], [0], [1], [0, 0, 1, 1], [], []>} : vector<32x16xf32>, vector<16x1xf32>, vector<32x1xf32> -> vector<32x1xf32>
    %c0_146 = arith.constant 0 : index
    %c0_147 = arith.constant 0 : index
    %192 = vector.load %arg44[%c0_146, %c0_147] : memref<1x1xf32, #tpu.memory_space<vmem>>, vector<1x1xf32>
    %193 = vector.broadcast %192 : vector<1x1xf32> to vector<32x1xf32>
    %194 = arith.addf %191, %193 : vector<32x1xf32>
    %c0_148 = arith.constant 0 : index
    %c0_149 = arith.constant 0 : index
    %c0_150 = arith.constant 0 : index
    %195 = vector.load %arg45[%c0_148, %c0_149, %c0_150] : memref<1x32x1xf32, #tpu.memory_space<vmem>>, vector<1x32x1xf32>
    %196 = vector.shape_cast %195 : vector<1x32x1xf32> to vector<32x1xf32>
    %197 = vector.shape_cast %194 : vector<32x1xf32> to vector<1x32x1xf32>
    tpu.vector_store %arg45[%c0_148, %c0_149, %c0_150], %197 {strides = array<i32>} : memref<1x32x1xf32, #tpu.memory_space<vmem>>, vector<1x32x1xf32>,
    return
  }
  func.func @transform_0(%arg0: i32) -> (i32, i32, i32) {
    %c0_i32 = arith.constant 0 : i32
    %c0_i32_0 = arith.constant 0 : i32
    %c0_i32_1 = arith.constant 0 : i32
    return %arg0, %c0_i32, %c0_i32_0 : i32, i32, i32
  }
  func.func @transform_1(%arg0: i32) -> (i32, i32) {
    %c0_i32 = arith.constant 0 : i32
    %c0_i32_0 = arith.constant 0 : i32
    %c0_i32_1 = arith.constant 0 : i32
    return %c0_i32, %c0_i32_0 : i32, i32
  }
  func.func @transform_2(%arg0: i32) -> (i32, i32) {
    %c0_i32 = arith.constant 0 : i32
    %c0_i32_0 = arith.constant 0 : i32
    %c0_i32_1 = arith.constant 0 : i32
    return %c0_i32, %c0_i32_0 : i32, i32
  }
  func.func @transform_3(%arg0: i32) -> (i32, i32) {
    %c0_i32 = arith.constant 0 : i32
    %c0_i32_0 = arith.constant 0 : i32
    %c0_i32_1 = arith.constant 0 : i32
    return %c0_i32, %c0_i32_0 : i32, i32
  }
  func.func @transform_4(%arg0: i32) -> (i32, i32) {
    %c0_i32 = arith.constant 0 : i32
    %c0_i32_0 = arith.constant 0 : i32
    %c0_i32_1 = arith.constant 0 : i32
    return %c0_i32, %c0_i32_0 : i32, i32
  }
  func.func @transform_5(%arg0: i32) -> (i32, i32) {
    %c0_i32 = arith.constant 0 : i32
    %c0_i32_0 = arith.constant 0 : i32
    %c0_i32_1 = arith.constant 0 : i32
    return %c0_i32, %c0_i32_0 : i32, i32
  }
  func.func @transform_6(%arg0: i32) -> (i32, i32) {
    %c0_i32 = arith.constant 0 : i32
    %c0_i32_0 = arith.constant 0 : i32
    %c0_i32_1 = arith.constant 0 : i32
    return %c0_i32, %c0_i32_0 : i32, i32
  }
  func.func @transform_7(%arg0: i32) -> (i32, i32) {
    %c0_i32 = arith.constant 0 : i32
    %c0_i32_0 = arith.constant 0 : i32
    %c0_i32_1 = arith.constant 0 : i32
    return %c0_i32, %c0_i32_0 : i32, i32
  }
  func.func @transform_8(%arg0: i32) -> (i32, i32) {
    %c0_i32 = arith.constant 0 : i32
    %c0_i32_0 = arith.constant 0 : i32
    %c0_i32_1 = arith.constant 0 : i32
    return %c0_i32, %c0_i32_0 : i32, i32
  }
  func.func @transform_9(%arg0: i32) -> (i32, i32, i32) {
    %c0_i32 = arith.constant 0 : i32
    %c0_i32_0 = arith.constant 0 : i32
    %c0_i32_1 = arith.constant 0 : i32
    %c0_i32_2 = arith.constant 0 : i32
    return %c0_i32, %c0_i32_0, %c0_i32_1 : i32, i32, i32
  }
  func.func @transform_10(%arg0: i32) -> (i32, i32) {
    %c0_i32 = arith.constant 0 : i32
    %c0_i32_0 = arith.constant 0 : i32
    %c0_i32_1 = arith.constant 0 : i32
    return %c0_i32, %c0_i32_0 : i32, i32
  }
  func.func @transform_11(%arg0: i32) -> (i32, i32) {
    %c0_i32 = arith.constant 0 : i32
    %c0_i32_0 = arith.constant 0 : i32
    %c0_i32_1 = arith.constant 0 : i32
    return %c0_i32, %c0_i32_0 : i32, i32
  }
  func.func @transform_12(%arg0: i32) -> (i32, i32) {
    %c0_i32 = arith.constant 0 : i32
    %c0_i32_0 = arith.constant 0 : i32
    %c0_i32_1 = arith.constant 0 : i32
    return %c0_i32, %c0_i32_0 : i32, i32
  }
  func.func @transform_13(%arg0: i32) -> (i32, i32) {
    %c0_i32 = arith.constant 0 : i32
    %c0_i32_0 = arith.constant 0 : i32
    %c0_i32_1 = arith.constant 0 : i32
    return %c0_i32, %c0_i32_0 : i32, i32
  }
  func.func @transform_14(%arg0: i32) -> (i32, i32) {
    %c0_i32 = arith.constant 0 : i32
    %c0_i32_0 = arith.constant 0 : i32
    %c0_i32_1 = arith.constant 0 : i32
    return %c0_i32, %c0_i32_0 : i32, i32
  }
  func.func @transform_15(%arg0: i32) -> (i32, i32) {
    %c0_i32 = arith.constant 0 : i32
    %c0_i32_0 = arith.constant 0 : i32
    %c0_i32_1 = arith.constant 0 : i32
    return %c0_i32, %c0_i32_0 : i32, i32
  }
  func.func @transform_16(%arg0: i32) -> (i32, i32) {
    %c0_i32 = arith.constant 0 : i32
    %c0_i32_0 = arith.constant 0 : i32
    %c0_i32_1 = arith.constant 0 : i32
    return %c0_i32, %c0_i32_0 : i32, i32
  }
  func.func @transform_17(%arg0: i32) -> (i32, i32) {
    %c0_i32 = arith.constant 0 : i32
    %c0_i32_0 = arith.constant 0 : i32
    %c0_i32_1 = arith.constant 0 : i32
    return %c0_i32, %c0_i32_0 : i32, i32
  }
  func.func @transform_18(%arg0: i32) -> (i32, i32) {
    %c0_i32 = arith.constant 0 : i32
    %c0_i32_0 = arith.constant 0 : i32
    %c0_i32_1 = arith.constant 0 : i32
    return %c0_i32, %c0_i32_0 : i32, i32
  }
  func.func @transform_19(%arg0: i32) -> (i32, i32) {
    %c0_i32 = arith.constant 0 : i32
    %c0_i32_0 = arith.constant 0 : i32
    %c0_i32_1 = arith.constant 0 : i32
    return %c0_i32, %c0_i32_0 : i32, i32
  }
  func.func @transform_20(%arg0: i32) -> (i32, i32) {
    %c0_i32 = arith.constant 0 : i32
    %c0_i32_0 = arith.constant 0 : i32
    %c0_i32_1 = arith.constant 0 : i32
    return %c0_i32, %c0_i32_0 : i32, i32
  }
  func.func @transform_21(%arg0: i32) -> (i32, i32) {
    %c0_i32 = arith.constant 0 : i32
    %c0_i32_0 = arith.constant 0 : i32
    %c0_i32_1 = arith.constant 0 : i32
    return %c0_i32, %c0_i32_0 : i32, i32
  }
  func.func @transform_22(%arg0: i32) -> (i32, i32) {
    %c0_i32 = arith.constant 0 : i32
    %c0_i32_0 = arith.constant 0 : i32
    %c0_i32_1 = arith.constant 0 : i32
    return %c0_i32, %c0_i32_0 : i32, i32
  }
  func.func @transform_23(%arg0: i32) -> (i32, i32) {
    %c0_i32 = arith.constant 0 : i32
    %c0_i32_0 = arith.constant 0 : i32
    %c0_i32_1 = arith.constant 0 : i32
    return %c0_i32, %c0_i32_0 : i32, i32
  }
  func.func @transform_24(%arg0: i32) -> (i32, i32, i32) {
    %c0_i32 = arith.constant 0 : i32
    %c0_i32_0 = arith.constant 0 : i32
    %c0_i32_1 = arith.constant 0 : i32
    %c0_i32_2 = arith.constant 0 : i32
    return %c0_i32, %c0_i32_0, %c0_i32_1 : i32, i32, i32
  }
  func.func @transform_25(%arg0: i32) -> (i32, i32) {
    %c0_i32 = arith.constant 0 : i32
    %c0_i32_0 = arith.constant 0 : i32
    %c0_i32_1 = arith.constant 0 : i32
    return %c0_i32, %c0_i32_0 : i32, i32
  }
  func.func @transform_26(%arg0: i32) -> (i32, i32) {
    %c0_i32 = arith.constant 0 : i32
    %c0_i32_0 = arith.constant 0 : i32
    %c0_i32_1 = arith.constant 0 : i32
    return %c0_i32, %c0_i32_0 : i32, i32
  }
  func.func @transform_27(%arg0: i32) -> (i32, i32) {
    %c0_i32 = arith.constant 0 : i32
    %c0_i32_0 = arith.constant 0 : i32
    %c0_i32_1 = arith.constant 0 : i32
    return %c0_i32, %c0_i32_0 : i32, i32
  }
  func.func @transform_28(%arg0: i32) -> (i32, i32) {
    %c0_i32 = arith.constant 0 : i32
    %c0_i32_0 = arith.constant 0 : i32
    %c0_i32_1 = arith.constant 0 : i32
    return %c0_i32, %c0_i32_0 : i32, i32
  }
  func.func @transform_29(%arg0: i32) -> (i32, i32) {
    %c0_i32 = arith.constant 0 : i32
    %c0_i32_0 = arith.constant 0 : i32
    %c0_i32_1 = arith.constant 0 : i32
    return %c0_i32, %c0_i32_0 : i32, i32
  }
  func.func @transform_30(%arg0: i32) -> (i32, i32) {
    %c0_i32 = arith.constant 0 : i32
    %c0_i32_0 = arith.constant 0 : i32
    %c0_i32_1 = arith.constant 0 : i32
    return %c0_i32, %c0_i32_0 : i32, i32
  }
  func.func @transform_31(%arg0: i32) -> (i32, i32) {
    %c0_i32 = arith.constant 0 : i32
    %c0_i32_0 = arith.constant 0 : i32
    %c0_i32_1 = arith.constant 0 : i32
    return %c0_i32, %c0_i32_0 : i32, i32
  }
  func.func @transform_32(%arg0: i32) -> (i32, i32) {
    %c0_i32 = arith.constant 0 : i32
    %c0_i32_0 = arith.constant 0 : i32
    %c0_i32_1 = arith.constant 0 : i32
    return %c0_i32, %c0_i32_0 : i32, i32
  }
  func.func @transform_33(%arg0: i32) -> (i32, i32) {
    %c0_i32 = arith.constant 0 : i32
    %c0_i32_0 = arith.constant 0 : i32
    %c0_i32_1 = arith.constant 0 : i32
    return %c0_i32, %c0_i32_0 : i32, i32
  }
  func.func @transform_34(%arg0: i32) -> (i32, i32) {
    %c0_i32 = arith.constant 0 : i32
    %c0_i32_0 = arith.constant 0 : i32
    %c0_i32_1 = arith.constant 0 : i32
    return %c0_i32, %c0_i32_0 : i32, i32
  }
  func.func @transform_35(%arg0: i32) -> (i32, i32) {
    %c0_i32 = arith.constant 0 : i32
    %c0_i32_0 = arith.constant 0 : i32
    %c0_i32_1 = arith.constant 0 : i32
    return %c0_i32, %c0_i32_0 : i32, i32
  }
  func.func @transform_36(%arg0: i32) -> (i32, i32) {
    %c0_i32 = arith.constant 0 : i32
    %c0_i32_0 = arith.constant 0 : i32
    %c0_i32_1 = arith.constant 0 : i32
    return %c0_i32, %c0_i32_0 : i32, i32
  }
  func.func @transform_37(%arg0: i32) -> (i32, i32) {
    %c0_i32 = arith.constant 0 : i32
    %c0_i32_0 = arith.constant 0 : i32
    %c0_i32_1 = arith.constant 0 : i32
    return %c0_i32, %c0_i32_0 : i32, i32
  }
  func.func @transform_38(%arg0: i32) -> (i32, i32) {
    %c0_i32 = arith.constant 0 : i32
    %c0_i32_0 = arith.constant 0 : i32
    %c0_i32_1 = arith.constant 0 : i32
    return %c0_i32, %c0_i32_0 : i32, i32
  }
  func.func @transform_39(%arg0: i32) -> (i32, i32) {
    %c0_i32 = arith.constant 0 : i32
    %c0_i32_0 = arith.constant 0 : i32
    %c0_i32_1 = arith.constant 0 : i32
    return %c0_i32, %c0_i32_0 : i32, i32
  }
  func.func @transform_40(%arg0: i32) -> (i32, i32) {
    %c0_i32 = arith.constant 0 : i32
    %c0_i32_0 = arith.constant 0 : i32
    %c0_i32_1 = arith.constant 0 : i32
    return %c0_i32, %c0_i32_0 : i32, i32
  }
  func.func @transform_41(%arg0: i32) -> (i32, i32) {
    %c0_i32 = arith.constant 0 : i32
    %c0_i32_0 = arith.constant 0 : i32
    %c0_i32_1 = arith.constant 0 : i32
    return %c0_i32, %c0_i32_0 : i32, i32
  }
  func.func @transform_42(%arg0: i32) -> (i32, i32) {
    %c0_i32 = arith.constant 0 : i32
    %c0_i32_0 = arith.constant 0 : i32
    %c0_i32_1 = arith.constant 0 : i32
    return %c0_i32, %c0_i32_0 : i32, i32
  }
  func.func @transform_43(%arg0: i32) -> (i32, i32) {
    %c0_i32 = arith.constant 0 : i32
    %c0_i32_0 = arith.constant 0 : i32
    %c0_i32_1 = arith.constant 0 : i32
    return %c0_i32, %c0_i32_0 : i32, i32
  }
  func.func @transform_44(%arg0: i32) -> (i32, i32, i32) {
    %c0_i32 = arith.constant 0 : i32
    %c0_i32_0 = arith.constant 0 : i32
    %c0_i32_1 = arith.constant 0 : i32
    return %arg0, %c0_i32, %c0_i32_0 : i32, i32, i32
  }
}

</mosaic_0001>

<bundles_post_ra>
// kernel: tile.98
= control target key start
LH: loop header
LB: loop body
LE: loop exit
PB: predicated region body
PF: predicated region fallthrough
CT: control target
= control target key end

     0   :  { %s442_s0 = inlined_call_operand.vmem [shape: f32[16,8], index: 0, kind: input, shape index: {}]   ;;  %s443_s1 = inlined_call_operand.vmem [shape: f32[2,16,8,8], index: 1, kind: output, shape index: {}]  }
   0x1   :  { %v4_v0 = vld [vmem:[%s442_s0] ss:$0 sm:$0xff]  ;;  %v153_v1 = vld [vmem:[%s442_s0 + $0x1] ss:$0 sm:$0xff]  ;;  %v162_v2 = vld [vmem:[%s442_s0 + $0x2] ss:$0 sm:$0xff] }
   0x2   :  { %5 = vst [vmem:[%s443_s1] sm:$0x3] %v4_v0  ;;  %146 = vst [vmem:[%s443_s1 + $0x10] sm:$0x3] %v4_v0  ;;  %v171_v3 = vld [vmem:[%s442_s0 + $0x3] ss:$0 sm:$0xff] }
   0x3   :  { %147 = vst [vmem:[%s443_s1 + $0x20] sm:$0x3] %v4_v0  ;;  %148 = vst [vmem:[%s443_s1 + $0x30] sm:$0x3] %v4_v0  ;;  %v180_v4 = vld [vmem:[%s442_s0 + $0x4] ss:$0 sm:$0xff] }
   0x4   :  { %149 = vst [vmem:[%s443_s1 + $0x40] sm:$0x3] %v4_v0  ;;  %150 = vst [vmem:[%s443_s1 + $0x50] sm:$0x3] %v4_v0  ;;  %v189_v5 = vld [vmem:[%s442_s0 + $0x5] ss:$0 sm:$0xff] }
   0x5   :  { %151 = vst [vmem:[%s443_s1 + $0x60] sm:$0x3] %v4_v0  ;;  %152 = vst [vmem:[%s443_s1 + $0x70] sm:$0x3] %v4_v0  ;;  %v198_v6 = vld [vmem:[%s442_s0 + $0x6] ss:$0 sm:$0xff] }
   0x6   :  { %154 = vst [vmem:[%s443_s1 + $0x2] sm:$0x3] %v153_v1  ;;  %155 = vst [vmem:[%s443_s1 + $0x12] sm:$0x3] %v153_v1  ;;  %v207_v7 = vld [vmem:[%s442_s0 + $0x7] ss:$0 sm:$0xff] }
   0x7   :  { %156 = vst [vmem:[%s443_s1 + $0x22] sm:$0x3] %v153_v1  ;;  %157 = vst [vmem:[%s443_s1 + $0x32] sm:$0x3] %v153_v1 }
   0x8   :  { %158 = vst [vmem:[%s443_s1 + $0x42] sm:$0x3] %v153_v1  ;;  %159 = vst [vmem:[%s443_s1 + $0x52] sm:$0x3] %v153_v1 }
   0x9   :  { %160 = vst [vmem:[%s443_s1 + $0x62] sm:$0x3] %v153_v1  ;;  %161 = vst [vmem:[%s443_s1 + $0x72] sm:$0x3] %v153_v1 }
   0xa   :  { %163 = vst [vmem:[%s443_s1 + $0x4] sm:$0x3] %v162_v2  ;;  %164 = vst [vmem:[%s443_s1 + $0x14] sm:$0x3] %v162_v2 }
   0xb   :  { %165 = vst [vmem:[%s443_s1 + $0x24] sm:$0x3] %v162_v2  ;;  %166 = vst [vmem:[%s443_s1 + $0x34] sm:$0x3] %v162_v2 }
   0xc   :  { %167 = vst [vmem:[%s443_s1 + $0x44] sm:$0x3] %v162_v2  ;;  %168 = vst [vmem:[%s443_s1 + $0x54] sm:$0x3] %v162_v2 }
   0xd   :  { %169 = vst [vmem:[%s443_s1 + $0x64] sm:$0x3] %v162_v2  ;;  %170 = vst [vmem:[%s443_s1 + $0x74] sm:$0x3] %v162_v2 }
   0xe   :  { %172 = vst [vmem:[%s443_s1 + $0x6] sm:$0x3] %v171_v3  ;;  %173 = vst [vmem:[%s443_s1 + $0x16] sm:$0x3] %v171_v3 }
   0xf   :  { %174 = vst [vmem:[%s443_s1 + $0x26] sm:$0x3] %v171_v3  ;;  %175 = vst [vmem:[%s443_s1 + $0x36] sm:$0x3] %v171_v3 }
  0x10   :  { %176 = vst [vmem:[%s443_s1 + $0x46] sm:$0x3] %v171_v3  ;;  %177 = vst [vmem:[%s443_s1 + $0x56] sm:$0x3] %v171_v3 }
  0x11   :  { %178 = vst [vmem:[%s443_s1 + $0x66] sm:$0x3] %v171_v3  ;;  %179 = vst [vmem:[%s443_s1 + $0x76] sm:$0x3] %v171_v3 }
  0x12   :  { %181 = vst [vmem:[%s443_s1 + $0x8] sm:$0x3] %v180_v4  ;;  %182 = vst [vmem:[%s443_s1 + $0x18] sm:$0x3] %v180_v4 }
  0x13   :  { %183 = vst [vmem:[%s443_s1 + $0x28] sm:$0x3] %v180_v4  ;;  %184 = vst [vmem:[%s443_s1 + $0x38] sm:$0x3] %v180_v4 }
  0x14   :  { %185 = vst [vmem:[%s443_s1 + $0x48] sm:$0x3] %v180_v4  ;;  %186 = vst [vmem:[%s443_s1 + $0x58] sm:$0x3] %v180_v4 }
  0x15   :  { %187 = vst [vmem:[%s443_s1 + $0x68] sm:$0x3] %v180_v4  ;;  %188 = vst [vmem:[%s443_s1 + $0x78] sm:$0x3] %v180_v4 }
  0x16   :  { %190 = vst [vmem:[%s443_s1 + $0xa] sm:$0x3] %v189_v5  ;;  %191 = vst [vmem:[%s443_s1 + $0x1a] sm:$0x3] %v189_v5 }
  0x17   :  { %192 = vst [vmem:[%s443_s1 + $0x2a] sm:$0x3] %v189_v5  ;;  %193 = vst [vmem:[%s443_s1 + $0x3a] sm:$0x3] %v189_v5 }
  0x18   :  { %194 = vst [vmem:[%s443_s1 + $0x4a] sm:$0x3] %v189_v5  ;;  %195 = vst [vmem:[%s443_s1 + $0x5a] sm:$0x3] %v189_v5 }
  0x19   :  { %196 = vst [vmem:[%s443_s1 + $0x6a] sm:$0x3] %v189_v5  ;;  %197 = vst [vmem:[%s443_s1 + $0x7a] sm:$0x3] %v189_v5 }
  0x1a   :  { %199 = vst [vmem:[%s443_s1 + $0xc] sm:$0x3] %v198_v6  ;;  %200 = vst [vmem:[%s443_s1 + $0x1c] sm:$0x3] %v198_v6 }
  0x1b   :  { %201 = vst [vmem:[%s443_s1 + $0x2c] sm:$0x3] %v198_v6  ;;  %202 = vst [vmem:[%s443_s1 + $0x3c] sm:$0x3] %v198_v6 }
  0x1c   :  { %203 = vst [vmem:[%s443_s1 + $0x4c] sm:$0x3] %v198_v6  ;;  %204 = vst [vmem:[%s443_s1 + $0x5c] sm:$0x3] %v198_v6 }
  0x1d   :  { %205 = vst [vmem:[%s443_s1 + $0x6c] sm:$0x3] %v198_v6  ;;  %206 = vst [vmem:[%s443_s1 + $0x7c] sm:$0x3] %v198_v6 }
  0x1e   :  { %208 = vst [vmem:[%s443_s1 + $0xe] sm:$0x3] %v207_v7  ;;  %209 = vst [vmem:[%s443_s1 + $0x1e] sm:$0x3] %v207_v7 }
  0x1f   :  { %210 = vst [vmem:[%s443_s1 + $0x2e] sm:$0x3] %v207_v7  ;;  %211 = vst [vmem:[%s443_s1 + $0x3e] sm:$0x3] %v207_v7 }
  0x20   :  { %212 = vst [vmem:[%s443_s1 + $0x4e] sm:$0x3] %v207_v7  ;;  %213 = vst [vmem:[%s443_s1 + $0x5e] sm:$0x3] %v207_v7 }
  0x21   :  { %214 = vst [vmem:[%s443_s1 + $0x6e] sm:$0x3] %v207_v7  ;;  %215 = vst [vmem:[%s443_s1 + $0x7e] sm:$0x3] %v207_v7 }

// kernel: tile.99
= control target key start
LH: loop header
LB: loop body
LE: loop exit
PB: predicated region body
PF: predicated region fallthrough
CT: control target
= control target key end

     0   :  { %vm322_vm0 = vcmask 1047556   ;;  %s616_s10 = smov 16   ;;  %vm324_vm1 = vcmask 130048   ;;  %vm397_vm2 = vcmask 261248   ;;  %s907_s0 = inlined_call_operand.vmem [shape: f32[2,16,8,8], index: 0, kind: input, shape index: {}]   ;;  %s908_s1 = inlined_call_operand.vmem [shape: f32[32,64], index: 1, kind: output, shape index: {}]  }
   0x1   :  { %v594_v0 = vld [vmem:[%s907_s0 + $0xe] sm:$0x3]  ;;  %v595_v1 = vld [vmem:[%s907_s0 + $0xc] sm:$0x3]  ;;  %v596_v2 = vld [vmem:[%s907_s0 + $0xa] sm:$0x3] }
   0x2   :  { %288 = vst [vmem:[#allocation0 + $0x38] sm:$0x3] %v594_v0  ;;  %293 = vst [vmem:[#allocation0 + $0x30] sm:$0x3] %v595_v1  ;;  %v597_v3 = vld [vmem:[%s907_s0 + $0x8] sm:$0x3] }
   0x3   :  { %298 = vst [vmem:[#allocation0 + $0x28] sm:$0x3] %v596_v2  ;;  %v598_v4 = vld [vmem:[%s907_s0 + $0x6] sm:$0x3]  ;;  %v599_v5 = vld [vmem:[%s907_s0 + $0x4] sm:$0x3] }
   0x4   :  { %303 = vst [vmem:[#allocation0 + $0x20] sm:$0x3] %v597_v3  ;;  %308 = vst [vmem:[#allocation0 + $0x18] sm:$0x3] %v598_v4  ;;  %v600_v6 = vld [vmem:[%s907_s0 + $0x2] sm:$0x3] }
   0x5   :  { %313 = vst [vmem:[#allocation0 + $0x10] sm:$0x3] %v599_v5  ;;  %v318_v7 = vld [vmem:[%s907_s0] sm:$0x3]  ;;  %317 = vst [vmem:[#allocation0 + $0x8] sm:$0x3] %v600_v6 }
   0x6   :  { %319 = vst [vmem:[#allocation0] sm:$0x3] %v318_v7  ;;  %v586_v8 = vld [vmem:[%s907_s0 + $0x1e] sm:$0x3]  ;;  %v587_v9 = vld [vmem:[%s907_s0 + $0x1c] sm:$0x3] }
   0x7   :  { %v588_v10 = vld [vmem:[%s907_s0 + $0x1a] sm:$0x3]  ;;  %248 = vst [vmem:[#allocation0 + $0x78] sm:$0x3] %v586_v8  ;;  %253 = vst [vmem:[#allocation0 + $0x70] sm:$0x3] %v587_v9 }
   0x8   :  { %258 = vst [vmem:[#allocation0 + $0x68] sm:$0x3] %v588_v10  ;;  %v589_v11 = vld [vmem:[%s907_s0 + $0x18] sm:$0x3]  ;;  %v590_v12 = vld [vmem:[%s907_s0 + $0x16] sm:$0x3] }
   0x9   :  { %v591_v13 = vld [vmem:[%s907_s0 + $0x14] sm:$0x3]  ;;  %263 = vst [vmem:[#allocation0 + $0x60] sm:$0x3] %v589_v11  ;;  %268 = vst [vmem:[#allocation0 + $0x58] sm:$0x3] %v590_v12 }
   0xa   :  { %273 = vst [vmem:[#allocation0 + $0x50] sm:$0x3] %v591_v13  ;;  %v592_v14 = vld [vmem:[%s907_s0 + $0x12] sm:$0x3]  ;;  %v593_v15 = vld [vmem:[%s907_s0 + $0x10] sm:$0x3] }
   0xb   :  { %v562_v16 = vld [vmem:[%s907_s0 + $0x4e] sm:$0x3]  ;;  %278 = vst [vmem:[#allocation0 + $0x48] sm:$0x3] %v592_v14  ;;  %283 = vst [vmem:[#allocation0 + $0x40] sm:$0x3] %v593_v15 }
   0xc   :  { %128 = vst [vmem:[#allocation0 + $0x138] sm:$0x3] %v562_v16  ;;  %v563_v17 = vld [vmem:[%s907_s0 + $0x4c] sm:$0x3]  ;;  %v564_v18 = vld [vmem:[%s907_s0 + $0x4a] sm:$0x3] }
   0xd   :  { %v565_v19 = vld [vmem:[%s907_s0 + $0x48] sm:$0x3]  ;;  %133 = vst [vmem:[#allocation0 + $0x130] sm:$0x3] %v563_v17  ;;  %138 = vst [vmem:[#allocation0 + $0x128] sm:$0x3] %v564_v18 }
   0xe   :  { %143 = vst [vmem:[#allocation0 + $0x120] sm:$0x3] %v565_v19  ;;  %v566_v20 = vld [vmem:[%s907_s0 + $0x46] sm:$0x3]  ;;  %v567_v21 = vld [vmem:[%s907_s0 + $0x44] sm:$0x3] }
   0xf   :  { %v568_v22 = vld [vmem:[%s907_s0 + $0x42] sm:$0x3]  ;;  %148 = vst [vmem:[#allocation0 + $0x118] sm:$0x3] %v566_v20  ;;  %153 = vst [vmem:[#allocation0 + $0x110] sm:$0x3] %v567_v21 }
  0x10   :  { %158 = vst [vmem:[#allocation0 + $0x108] sm:$0x3] %v568_v22  ;;  %v569_v23 = vld [vmem:[%s907_s0 + $0x40] sm:$0x3]  ;;  %v554_v24 = vld [vmem:[%s907_s0 + $0x5e] sm:$0x3] }
  0x11   :  { %v555_v25 = vld [vmem:[%s907_s0 + $0x5c] sm:$0x3]  ;;  %v392_v26 = vld [vmem:[#allocation0 + $0x1] ss:$8 sm:$0xf0]  }
  0x12   :  { %163 = vst [vmem:[#allocation0 + $0x100] sm:$0x3] %v569_v23  ;;  %88 = vst [vmem:[#allocation0 + $0x178] sm:$0x3] %v554_v24  ;;  %v556_v27 = vld [vmem:[%s907_s0 + $0x5a] sm:$0x3] }
  0x13   :  { %93 = vst [vmem:[#allocation0 + $0x170] sm:$0x3] %v555_v25  ;;  %v390_v28 = vld [vmem:[#allocation0 + $0x1] ss:$8 sm:$0xf]  }
  0x14   :  { %98 = vst [vmem:[#allocation0 + $0x168] sm:$0x3] %v556_v27  ;;  %v557_v29 = vld [vmem:[%s907_s0 + $0x58] sm:$0x3]  ;;  %v394_v30 = vsel %vm322_vm0, %v392_v26, %v390_v28  ;;  %v558_v31 = vld [vmem:[%s907_s0 + $0x56] sm:$0x3] }
  0x15   :  { %103 = vst [vmem:[#allocation0 + $0x160] sm:$0x3] %v557_v29  ;;  %v559_v32 = vld [vmem:[%s907_s0 + $0x54] sm:$0x3]  ;;  %v560_v33 = vld [vmem:[%s907_s0 + $0x52] sm:$0x3]  ;;  %395 = vrot.lane.b32.xlu0 %v394_v30, %s616_s10 }
  0x16   :  { %v413_v34 = vld [vmem:[#allocation0 + $0x41] ss:$8 sm:$0xf0]   ;;  %108 = vst [vmem:[#allocation0 + $0x158] sm:$0x3] %v558_v31 }
  0x17   :  { %113 = vst [vmem:[#allocation0 + $0x150] sm:$0x3] %v559_v32  ;;  %118 = vst [vmem:[#allocation0 + $0x148] sm:$0x3] %v560_v33  ;;  %v561_v35 = vld [vmem:[%s907_s0 + $0x50] sm:$0x3] }
  0x18   :  { %v411_v36 = vld [vmem:[#allocation0 + $0x41] ss:$8 sm:$0xf]   ;;  %123 = vst [vmem:[#allocation0 + $0x140] sm:$0x3] %v561_v35 }
  0x19   :  { %v578_v37 = vld [vmem:[%s907_s0 + $0x2e] sm:$0x3]  ;;  %v415_v38 = vsel %vm322_vm0, %v413_v34, %v411_v36  ;;  %v402_v39 = vld [vmem:[#allocation0 + $0x101] ss:$8 sm:$0xf0]  }
  0x1a   :  { %208 = vst [vmem:[#allocation0 + $0xb8] sm:$0x3] %v578_v37  ;;  %v579_v40 = vld [vmem:[%s907_s0 + $0x2c] sm:$0x3]  ;;  %416 = vrot.lane.b32.xlu1 %v415_v38, %s616_s10  ;;  %v580_v41 = vld [vmem:[%s907_s0 + $0x2a] sm:$0x3] }
  0x1b   :  { %213 = vst [vmem:[#allocation0 + $0xb0] sm:$0x3] %v579_v40  ;;  %v581_v42 = vld [vmem:[%s907_s0 + $0x28] sm:$0x3]  ;;  %v582_v43 = vld [vmem:[%s907_s0 + $0x26] sm:$0x3] }
  0x1c   :  { %v400_v44 = vld [vmem:[#allocation0 + $0x101] ss:$8 sm:$0xf]   ;;  %218 = vst [vmem:[#allocation0 + $0xa8] sm:$0x3] %v580_v41 }
  0x1d   :  { %223 = vst [vmem:[#allocation0 + $0xa0] sm:$0x3] %v581_v42  ;;  %228 = vst [vmem:[#allocation0 + $0x98] sm:$0x3] %v582_v43  ;;  %v583_v45 = vld [vmem:[%s907_s0 + $0x24] sm:$0x3]  ;;  %v404_v46 = vsel %vm322_vm0, %v402_v39, %v400_v44 }
  0x1e   :  { %233 = vst [vmem:[#allocation0 + $0x90] sm:$0x3] %v583_v45  ;;  %v584_v47 = vld [vmem:[%s907_s0 + $0x22] sm:$0x3]  ;;  %v585_v48 = vld [vmem:[%s907_s0 + $0x20] sm:$0x3]  ;;  %405 = vrot.lane.b32.xlu0 %v404_v46, %s616_s10 }
  0x1f   :  { %v546_v49 = vld [vmem:[%s907_s0 + $0x6e] sm:$0x3]  ;;  %v424_v50 = vld [vmem:[#allocation0 + $0x141] ss:$8 sm:$0xf0]  }
  0x20   :  { %238 = vst [vmem:[#allocation0 + $0x88] sm:$0x3] %v584_v47  ;;  %243 = vst [vmem:[#allocation0 + $0x80] sm:$0x3] %v585_v48  ;;  %v547_v51 = vld [vmem:[%s907_s0 + $0x6c] sm:$0x3] }
  0x21   :  { %48 = vst [vmem:[#allocation0 + $0x1b8] sm:$0x3] %v546_v49  ;;  %53 = vst [vmem:[#allocation0 + $0x1b0] sm:$0x3] %v547_v51  ;;  %v548_v52 = vld [vmem:[%s907_s0 + $0x6a] sm:$0x3] }
  0x22   :  { %v549_v53 = vld [vmem:[%s907_s0 + $0x68] sm:$0x3]  ;;  %v550_v54 = vld [vmem:[%s907_s0 + $0x66] sm:$0x3]  ;;  %58 = vst [vmem:[#allocation0 + $0x1a8] sm:$0x3] %v548_v52 }
  0x23   :  { %v422_v55 = vld [vmem:[#allocation0 + $0x141] ss:$8 sm:$0xf]   ;;  %63 = vst [vmem:[#allocation0 + $0x1a0] sm:$0x3] %v549_v53 }
  0x24   :  { %68 = vst [vmem:[#allocation0 + $0x198] sm:$0x3] %v550_v54  ;;  %v551_v56 = vld [vmem:[%s907_s0 + $0x64] sm:$0x3]  ;;  %v426_v57 = vsel %vm322_vm0, %v424_v50, %v422_v55  ;;  %v552_v58 = vld [vmem:[%s907_s0 + $0x62] sm:$0x3] }
  0x25   :  { %73 = vst [vmem:[#allocation0 + $0x190] sm:$0x3] %v551_v56  ;;  %v553_v59 = vld [vmem:[%s907_s0 + $0x60] sm:$0x3]  ;;  %v570_v60 = vld [vmem:[%s907_s0 + $0x3e] sm:$0x3]  ;;  %427 = vrot.lane.b32.xlu1 %v426_v57, %s616_s10 }
  0x26   :  { %78 = vst [vmem:[#allocation0 + $0x188] sm:$0x3] %v552_v58  ;;  %83 = vst [vmem:[#allocation0 + $0x180] sm:$0x3] %v553_v59  ;;  %v571_v61 = vld [vmem:[%s907_s0 + $0x3c] sm:$0x3] }
  0x27   :  { %168 = vst [vmem:[#allocation0 + $0xf8] sm:$0x3] %v570_v60  ;;  %v572_v62 = vld [vmem:[%s907_s0 + $0x3a] sm:$0x3]  ;;  %v573_v63 = vld [vmem:[%s907_s0 + $0x38] sm:$0x3] }
  0x28   :  { %v435_v0 = vld [vmem:[#allocation0 + $0x81] ss:$8 sm:$0xf0]   ;;  %173 = vst [vmem:[#allocation0 + $0xf0] sm:$0x3] %v571_v61 }
  0x29   :  { %178 = vst [vmem:[#allocation0 + $0xe8] sm:$0x3] %v572_v62  ;;  %183 = vst [vmem:[#allocation0 + $0xe0] sm:$0x3] %v573_v63  ;;  %v574_v1 = vld [vmem:[%s907_s0 + $0x36] sm:$0x3] }
  0x2a   :  { %188 = vst [vmem:[#allocation0 + $0xd8] sm:$0x3] %v574_v1  ;;  %v575_v2 = vld [vmem:[%s907_s0 + $0x34] sm:$0x3]  ;;  %v576_v3 = vld [vmem:[%s907_s0 + $0x32] sm:$0x3] }
  0x2b   :  { %v577_v4 = vld [vmem:[%s907_s0 + $0x30] sm:$0x3]  ;;  %193 = vst [vmem:[#allocation0 + $0xd0] sm:$0x3] %v575_v2  ;;  %198 = vst [vmem:[#allocation0 + $0xc8] sm:$0x3] %v576_v3 }
  0x2c   :  { %v433_v5 = vld [vmem:[#allocation0 + $0x81] ss:$8 sm:$0xf]   ;;  %203 = vst [vmem:[#allocation0 + $0xc0] sm:$0x3] %v577_v4 }
  0x2d   :  { %v538_v6 = vld [vmem:[%s907_s0 + $0x7e] sm:$0x3]  ;;  %v437_v7 = vsel %vm322_vm0, %v435_v0, %v433_v5  ;;  %v539_v8 = vld [vmem:[%s907_s0 + $0x7c] sm:$0x3]  ;;  %v540_v9 = vld [vmem:[%s907_s0 + $0x7a] sm:$0x3] }
  0x2e   :  { %8 = vst [vmem:[#allocation0 + $0x1f8] sm:$0x3] %v538_v6  ;;  %v541_v10 = vld [vmem:[%s907_s0 + $0x78] sm:$0x3]  ;;  %438 = vrot.lane.b32.xlu0 %v437_v7, %s616_s10  ;;  %13 = vst [vmem:[#allocation0 + $0x1f0] sm:$0x3] %v539_v8 }
  0x2f   :  { %v446_v11 = vld [vmem:[#allocation0 + $0x181] ss:$8 sm:$0xf0]   ;;  %18 = vst [vmem:[#allocation0 + $0x1e8] sm:$0x3] %v540_v9 }
  0x30   :  { %23 = vst [vmem:[#allocation0 + $0x1e0] sm:$0x3] %v541_v10  ;;  %v542_v12 = vld [vmem:[%s907_s0 + $0x76] sm:$0x3]  ;;  %v543_v13 = vld [vmem:[%s907_s0 + $0x74] sm:$0x3] }
  0x31   :  { %28 = vst [vmem:[#allocation0 + $0x1d8] sm:$0x3] %v542_v12  ;;  %v544_v14 = vld [vmem:[%s907_s0 + $0x72] sm:$0x3]  ;;  %v545_v15 = vld [vmem:[%s907_s0 + $0x70] sm:$0x3] }
  0x32   :  { %v444_v16 = vld [vmem:[#allocation0 + $0x181] ss:$8 sm:$0xf]   ;;  %33 = vst [vmem:[#allocation0 + $0x1d0] sm:$0x3] %v543_v13 }
  0x33   :  { %38 = vst [vmem:[#allocation0 + $0x1c8] sm:$0x3] %v544_v14  ;;  %43 = vst [vmem:[#allocation0 + $0x1c0] sm:$0x3] %v545_v15  ;;  %v448_v18 = vsel %vm322_vm0, %v446_v11, %v444_v16 }
  0x34   :  { %v320_v17 = vld [vmem:[#allocation0] ss:$8 sm:$0xf]   ;;  %v457_v19 = vld [vmem:[#allocation0 + $0xc1] ss:$8 sm:$0xf0]   ;;  %449 = vrot.lane.b32.xlu1 %v448_v18, %s616_s10 }
  0x35   :  { %v321_v20 = vld [vmem:[#allocation0] ss:$8 sm:$0xf0]   ;;  %v455_v24 = vld [vmem:[#allocation0 + $0xc1] ss:$8 sm:$0xf]  }
  0x36   :  { %v323_v21 = vsel %vm322_vm0, %v321_v20, %v320_v17  ;;  %v327_v22 = vld [vmem:[#allocation0 + $0x40] ss:$8 sm:$0xf]   ;;  %v459_v27 = vsel %vm322_vm0, %v457_v19, %v455_v24 }
  0x37   :  { %v329_v23 = vld [vmem:[#allocation0 + $0x40] ss:$8 sm:$0xf0]   ;;  %325 = vst.msk [vmem:[%s908_s1] sm:$0xff] %vm324_vm1, %v323_v21   ;;  %460 = vrot.lane.b32.xlu0 %v459_v27, %s616_s10 }
  0x38   :  { %v331_v25 = vsel %vm322_vm0, %v329_v23, %v327_v22  ;;  %v354_v26 = vld [vmem:[#allocation0 + $0x100] ss:$8 sm:$0xf]   ;;  %v468_v30 = vld [vmem:[#allocation0 + $0x1c1] ss:$8 sm:$0xf0]  }
  0x39   :  { %601 = vst.msk [vmem:[%s908_s1 + $0x8] sm:$0xff] %vm324_vm1, %v331_v25   ;;  %v356_v28 = vld [vmem:[#allocation0 + $0x100] ss:$8 sm:$0xf0]  }
  0x3a   :  { %v363_v29 = vld [vmem:[#allocation0 + $0x140] ss:$8 sm:$0xf]   ;;  %v358_v31 = vsel %vm322_vm0, %v356_v28, %v354_v26  ;;  %v466_v36 = vld [vmem:[#allocation0 + $0x1c1] ss:$8 sm:$0xf]  }
  0x3b   :  { %v365_v32 = vld [vmem:[#allocation0 + $0x140] ss:$8 sm:$0xf0]   ;;  %604 = vst.msk [vmem:[%s908_s1 + $0x20] sm:$0xff] %vm324_vm1, %v358_v31   ;;  %v470_v39 = vsel %vm322_vm0, %v468_v30, %v466_v36 }
  0x3c   :  { %v367_v33 = vsel %vm322_vm0, %v365_v32, %v363_v29  ;;  %v336_v34 = vld [vmem:[#allocation0 + $0x80] ss:$8 sm:$0xf]   ;;  %471 = vrot.lane.b32.xlu1 %v470_v39, %s616_s10 }
  0x3d   :  { %v338_v35 = vld [vmem:[#allocation0 + $0x80] ss:$8 sm:$0xf0]   ;;  %605 = vst.msk [vmem:[%s908_s1 + $0x28] sm:$0xff] %vm324_vm1, %v367_v33  }
  0x3e   :  { %v340_v37 = vsel %vm322_vm0, %v338_v35, %v336_v34  ;;  %v372_v38 = vld [vmem:[#allocation0 + $0x180] ss:$8 sm:$0xf]  }
  0x3f   :  { %602 = vst.msk [vmem:[%s908_s1 + $0x10] sm:$0xff] %vm324_vm1, %v340_v37   ;;  %v374_v40 = vld [vmem:[#allocation0 + $0x180] ss:$8 sm:$0xf0]  }
  0x40   :  { %v345_v41 = vld [vmem:[#allocation0 + $0xc0] ss:$8 sm:$0xf]   ;;  %v376_v42 = vsel %vm322_vm0, %v374_v40, %v372_v38 }
  0x41   :  { %v347_v43 = vld [vmem:[#allocation0 + $0xc0] ss:$8 sm:$0xf0]   ;;  %606 = vst.msk [vmem:[%s908_s1 + $0x30] sm:$0xff] %vm324_vm1, %v376_v42  }
  0x42   :  { %v381_v44 = vld [vmem:[#allocation0 + $0x1c0] ss:$8 sm:$0xf]   ;;  %v349_v45 = vsel %vm322_vm0, %v347_v43, %v345_v41 }
  0x43   :  { %v383_v46 = vld [vmem:[#allocation0 + $0x1c0] ss:$8 sm:$0xf0]   ;;  %603 = vst.msk [vmem:[%s908_s1 + $0x18] sm:$0xff] %vm324_vm1, %v349_v45  }
  0x44   :  { %v385_v47 = vsel %vm322_vm0, %v383_v46, %v381_v44 }
  0x45   :  { %607 = vst.msk [vmem:[%s908_s1 + $0x38] sm:$0xff] %vm324_vm1, %v385_v47  }
  0x87   :  { %v396_v48 = vpop.permute.xlu0 %395  }
  0x88   :  { %398 = vst.msk [vmem:[%s908_s1] sm:$0xff] %vm397_vm2, %v396_v48  }
  0x8c   :  { %v417_v49 = vpop.permute.xlu1 %416  }
  0x8d   :  { %609 = vst.msk [vmem:[%s908_s1 + $0x8] sm:$0xff] %vm397_vm2, %v417_v49  }
  0x90   :  { %v406_v50 = vpop.permute.xlu0 %405  }
  0x91   :  { %608 = vst.msk [vmem:[%s908_s1 + $0x20] sm:$0xff] %vm397_vm2, %v406_v50  }
  0x97   :  { %v428_v51 = vpop.permute.xlu1 %427  }
  0x98   :  { %610 = vst.msk [vmem:[%s908_s1 + $0x28] sm:$0xff] %vm397_vm2, %v428_v51  }
  0xa0   :  { %v439_v52 = vpop.permute.xlu0 %438  }
  0xa1   :  { %611 = vst.msk [vmem:[%s908_s1 + $0x10] sm:$0xff] %vm397_vm2, %v439_v52  }
  0xa6   :  { %v450_v53 = vpop.permute.xlu1 %449  }
  0xa7   :  { %612 = vst.msk [vmem:[%s908_s1 + $0x30] sm:$0xff] %vm397_vm2, %v450_v53  }
  0xa9   :  { %v461_v54 = vpop.permute.xlu0 %460  }
  0xaa   :  { %613 = vst.msk [vmem:[%s908_s1 + $0x18] sm:$0xff] %vm397_vm2, %v461_v54  }
  0xae   :  { %v472_v55 = vpop.permute.xlu1 %471  }
  0xaf   :  { %614 = vst.msk [vmem:[%s908_s1 + $0x38] sm:$0xff] %vm397_vm2, %v472_v55  }

// kernel: tile.134
= control target key start
LH: loop header
LB: loop body
LE: loop exit
PB: predicated region body
PF: predicated region fallthrough
CT: control target
= control target key end

     0   :  { %s250_s0 = inlined_call_operand.vmem [shape: f32[16,8], index: 0, kind: input, shape index: {}]   ;;  %s251_s1 = inlined_call_operand.vmem [shape: f32[2,16,4,8], index: 1, kind: output, shape index: {}]  }
   0x1   :  { %v4_v0 = vld [vmem:[%s250_s0] ss:$0 sm:$0xff]  ;;  %v85_v1 = vld [vmem:[%s250_s0 + $0x1] ss:$0 sm:$0xff]  ;;  %v90_v2 = vld [vmem:[%s250_s0 + $0x2] ss:$0 sm:$0xff] }
   0x2   :  { %5 = vst [vmem:[%s251_s1] sm:$0x3] %v4_v0  ;;  %82 = vst [vmem:[%s251_s1 + $0x10] sm:$0x3] %v4_v0  ;;  %v95_v3 = vld [vmem:[%s250_s0 + $0x3] ss:$0 sm:$0xff] }
   0x3   :  { %83 = vst [vmem:[%s251_s1 + $0x20] sm:$0x3] %v4_v0  ;;  %84 = vst [vmem:[%s251_s1 + $0x30] sm:$0x3] %v4_v0  ;;  %v100_v4 = vld [vmem:[%s250_s0 + $0x4] ss:$0 sm:$0xff] }
   0x4   :  { %86 = vst [vmem:[%s251_s1 + $0x2] sm:$0x3] %v85_v1  ;;  %87 = vst [vmem:[%s251_s1 + $0x12] sm:$0x3] %v85_v1  ;;  %v105_v5 = vld [vmem:[%s250_s0 + $0x5] ss:$0 sm:$0xff] }
   0x5   :  { %88 = vst [vmem:[%s251_s1 + $0x22] sm:$0x3] %v85_v1  ;;  %89 = vst [vmem:[%s251_s1 + $0x32] sm:$0x3] %v85_v1  ;;  %v110_v6 = vld [vmem:[%s250_s0 + $0x6] ss:$0 sm:$0xff] }
   0x6   :  { %91 = vst [vmem:[%s251_s1 + $0x4] sm:$0x3] %v90_v2  ;;  %92 = vst [vmem:[%s251_s1 + $0x14] sm:$0x3] %v90_v2  ;;  %v115_v7 = vld [vmem:[%s250_s0 + $0x7] ss:$0 sm:$0xff] }
   0x7   :  { %93 = vst [vmem:[%s251_s1 + $0x24] sm:$0x3] %v90_v2  ;;  %94 = vst [vmem:[%s251_s1 + $0x34] sm:$0x3] %v90_v2 }
   0x8   :  { %96 = vst [vmem:[%s251_s1 + $0x6] sm:$0x3] %v95_v3  ;;  %97 = vst [vmem:[%s251_s1 + $0x16] sm:$0x3] %v95_v3 }
   0x9   :  { %98 = vst [vmem:[%s251_s1 + $0x26] sm:$0x3] %v95_v3  ;;  %99 = vst [vmem:[%s251_s1 + $0x36] sm:$0x3] %v95_v3 }
   0xa   :  { %101 = vst [vmem:[%s251_s1 + $0x8] sm:$0x3] %v100_v4  ;;  %102 = vst [vmem:[%s251_s1 + $0x18] sm:$0x3] %v100_v4 }
   0xb   :  { %103 = vst [vmem:[%s251_s1 + $0x28] sm:$0x3] %v100_v4  ;;  %104 = vst [vmem:[%s251_s1 + $0x38] sm:$0x3] %v100_v4 }
   0xc   :  { %106 = vst [vmem:[%s251_s1 + $0xa] sm:$0x3] %v105_v5  ;;  %107 = vst [vmem:[%s251_s1 + $0x1a] sm:$0x3] %v105_v5 }
   0xd   :  { %108 = vst [vmem:[%s251_s1 + $0x2a] sm:$0x3] %v105_v5  ;;  %109 = vst [vmem:[%s251_s1 + $0x3a] sm:$0x3] %v105_v5 }
   0xe   :  { %111 = vst [vmem:[%s251_s1 + $0xc] sm:$0x3] %v110_v6  ;;  %112 = vst [vmem:[%s251_s1 + $0x1c] sm:$0x3] %v110_v6 }
   0xf   :  { %113 = vst [vmem:[%s251_s1 + $0x2c] sm:$0x3] %v110_v6  ;;  %114 = vst [vmem:[%s251_s1 + $0x3c] sm:$0x3] %v110_v6 }
  0x10   :  { %116 = vst [vmem:[%s251_s1 + $0xe] sm:$0x3] %v115_v7  ;;  %117 = vst [vmem:[%s251_s1 + $0x1e] sm:$0x3] %v115_v7 }
  0x11   :  { %118 = vst [vmem:[%s251_s1 + $0x2e] sm:$0x3] %v115_v7  ;;  %119 = vst [vmem:[%s251_s1 + $0x3e] sm:$0x3] %v115_v7 }

// kernel: tile.135
= control target key start
LH: loop header
LB: loop body
LE: loop exit
PB: predicated region body
PF: predicated region fallthrough
CT: control target
= control target key end

     0   :  { %vm162_vm0 = vcmask 1047556   ;;  %s304_s10 = smov 16   ;;  %vm164_vm1 = vcmask 130048   ;;  %vm201_vm2 = vcmask 261248   ;;  %s451_s0 = inlined_call_operand.vmem [shape: f32[2,16,4,8], index: 0, kind: input, shape index: {}]   ;;  %s452_s1 = inlined_call_operand.vmem [shape: f32[32,32], index: 1, kind: output, shape index: {}]  }
   0x1   :  { %v290_v0 = vld [vmem:[%s451_s0 + $0xe] sm:$0x3]  ;;  %v291_v1 = vld [vmem:[%s451_s0 + $0xc] sm:$0x3]  ;;  %v292_v2 = vld [vmem:[%s451_s0 + $0xa] sm:$0x3] }
   0x2   :  { %128 = vst [vmem:[#allocation0 + $0x38] sm:$0x3] %v290_v0  ;;  %133 = vst [vmem:[#allocation0 + $0x30] sm:$0x3] %v291_v1  ;;  %v293_v3 = vld [vmem:[%s451_s0 + $0x8] sm:$0x3] }
   0x3   :  { %138 = vst [vmem:[#allocation0 + $0x28] sm:$0x3] %v292_v2  ;;  %v294_v4 = vld [vmem:[%s451_s0 + $0x6] sm:$0x3]  ;;  %v295_v5 = vld [vmem:[%s451_s0 + $0x4] sm:$0x3] }
   0x4   :  { %143 = vst [vmem:[#allocation0 + $0x20] sm:$0x3] %v293_v3  ;;  %148 = vst [vmem:[#allocation0 + $0x18] sm:$0x3] %v294_v4  ;;  %v296_v6 = vld [vmem:[%s451_s0 + $0x2] sm:$0x3] }
   0x5   :  { %153 = vst [vmem:[#allocation0 + $0x10] sm:$0x3] %v295_v5  ;;  %v158_v7 = vld [vmem:[%s451_s0] sm:$0x3]  ;;  %157 = vst [vmem:[#allocation0 + $0x8] sm:$0x3] %v296_v6 }
   0x6   :  { %159 = vst [vmem:[#allocation0] sm:$0x3] %v158_v7  ;;  %v274_v8 = vld [vmem:[%s451_s0 + $0x2e] sm:$0x3]  ;;  %v275_v9 = vld [vmem:[%s451_s0 + $0x2c] sm:$0x3] }
   0x7   :  { %v276_v10 = vld [vmem:[%s451_s0 + $0x2a] sm:$0x3]  ;;  %48 = vst [vmem:[#allocation0 + $0xb8] sm:$0x3] %v274_v8  ;;  %53 = vst [vmem:[#allocation0 + $0xb0] sm:$0x3] %v275_v9 }
   0x8   :  { %58 = vst [vmem:[#allocation0 + $0xa8] sm:$0x3] %v276_v10  ;;  %v277_v11 = vld [vmem:[%s451_s0 + $0x28] sm:$0x3]  ;;  %v278_v12 = vld [vmem:[%s451_s0 + $0x26] sm:$0x3] }
   0x9   :  { %v279_v13 = vld [vmem:[%s451_s0 + $0x24] sm:$0x3]  ;;  %63 = vst [vmem:[#allocation0 + $0xa0] sm:$0x3] %v277_v11  ;;  %68 = vst [vmem:[#allocation0 + $0x98] sm:$0x3] %v278_v12 }
   0xa   :  { %73 = vst [vmem:[#allocation0 + $0x90] sm:$0x3] %v279_v13  ;;  %v280_v14 = vld [vmem:[%s451_s0 + $0x22] sm:$0x3]  ;;  %v281_v15 = vld [vmem:[%s451_s0 + $0x20] sm:$0x3] }
   0xb   :  { %v282_v16 = vld [vmem:[%s451_s0 + $0x1e] sm:$0x3]  ;;  %78 = vst [vmem:[#allocation0 + $0x88] sm:$0x3] %v280_v14  ;;  %83 = vst [vmem:[#allocation0 + $0x80] sm:$0x3] %v281_v15 }
   0xc   :  { %88 = vst [vmem:[#allocation0 + $0x78] sm:$0x3] %v282_v16  ;;  %v283_v17 = vld [vmem:[%s451_s0 + $0x1c] sm:$0x3]  ;;  %v284_v18 = vld [vmem:[%s451_s0 + $0x1a] sm:$0x3] }
   0xd   :  { %v285_v19 = vld [vmem:[%s451_s0 + $0x18] sm:$0x3]  ;;  %93 = vst [vmem:[#allocation0 + $0x70] sm:$0x3] %v283_v17  ;;  %98 = vst [vmem:[#allocation0 + $0x68] sm:$0x3] %v284_v18 }
   0xe   :  { %103 = vst [vmem:[#allocation0 + $0x60] sm:$0x3] %v285_v19  ;;  %v286_v20 = vld [vmem:[%s451_s0 + $0x16] sm:$0x3]  ;;  %v287_v21 = vld [vmem:[%s451_s0 + $0x14] sm:$0x3] }
   0xf   :  { %v288_v22 = vld [vmem:[%s451_s0 + $0x12] sm:$0x3]  ;;  %108 = vst [vmem:[#allocation0 + $0x58] sm:$0x3] %v286_v20  ;;  %113 = vst [vmem:[#allocation0 + $0x50] sm:$0x3] %v287_v21 }
  0x10   :  { %118 = vst [vmem:[#allocation0 + $0x48] sm:$0x3] %v288_v22  ;;  %v289_v23 = vld [vmem:[%s451_s0 + $0x10] sm:$0x3]  ;;  %v266_v24 = vld [vmem:[%s451_s0 + $0x3e] sm:$0x3] }
  0x11   :  { %v267_v25 = vld [vmem:[%s451_s0 + $0x3c] sm:$0x3]  ;;  %v196_v26 = vld [vmem:[#allocation0 + $0x1] ss:$8 sm:$0xf0]  }
  0x12   :  { %123 = vst [vmem:[#allocation0 + $0x40] sm:$0x3] %v289_v23  ;;  %8 = vst [vmem:[#allocation0 + $0xf8] sm:$0x3] %v266_v24  ;;  %v268_v27 = vld [vmem:[%s451_s0 + $0x3a] sm:$0x3] }
  0x13   :  { %13 = vst [vmem:[#allocation0 + $0xf0] sm:$0x3] %v267_v25  ;;  %v194_v28 = vld [vmem:[#allocation0 + $0x1] ss:$8 sm:$0xf]  }
  0x14   :  { %18 = vst [vmem:[#allocation0 + $0xe8] sm:$0x3] %v268_v27  ;;  %v269_v29 = vld [vmem:[%s451_s0 + $0x38] sm:$0x3]  ;;  %v198_v30 = vsel %vm162_vm0, %v196_v26, %v194_v28  ;;  %v270_v31 = vld [vmem:[%s451_s0 + $0x36] sm:$0x3] }
  0x15   :  { %23 = vst [vmem:[#allocation0 + $0xe0] sm:$0x3] %v269_v29  ;;  %v271_v32 = vld [vmem:[%s451_s0 + $0x34] sm:$0x3]  ;;  %v272_v33 = vld [vmem:[%s451_s0 + $0x32] sm:$0x3]  ;;  %199 = vrot.lane.b32.xlu0 %v198_v30, %s304_s10 }
  0x16   :  { %v217_v34 = vld [vmem:[#allocation0 + $0x81] ss:$8 sm:$0xf0]   ;;  %28 = vst [vmem:[#allocation0 + $0xd8] sm:$0x3] %v270_v31 }
  0x17   :  { %33 = vst [vmem:[#allocation0 + $0xd0] sm:$0x3] %v271_v32  ;;  %38 = vst [vmem:[#allocation0 + $0xc8] sm:$0x3] %v272_v33  ;;  %v273_v35 = vld [vmem:[%s451_s0 + $0x30] sm:$0x3] }
  0x18   :  { %v215_v36 = vld [vmem:[#allocation0 + $0x81] ss:$8 sm:$0xf]   ;;  %43 = vst [vmem:[#allocation0 + $0xc0] sm:$0x3] %v273_v35 }
  0x19   :  { %v160_v37 = vld [vmem:[#allocation0] ss:$8 sm:$0xf]   ;;  %v219_v38 = vsel %vm162_vm0, %v217_v34, %v215_v36  ;;  %v206_v39 = vld [vmem:[#allocation0 + $0x41] ss:$8 sm:$0xf0]  }
  0x1a   :  { %v161_v40 = vld [vmem:[#allocation0] ss:$8 sm:$0xf0]   ;;  %220 = vrot.lane.b32.xlu1 %v219_v38, %s304_s10  ;;  %v204_v44 = vld [vmem:[#allocation0 + $0x41] ss:$8 sm:$0xf]  }
  0x1b   :  { %v163_v41 = vsel %vm162_vm0, %v161_v40, %v160_v37  ;;  %v176_v42 = vld [vmem:[#allocation0 + $0x80] ss:$8 sm:$0xf]   ;;  %v208_v47 = vsel %vm162_vm0, %v206_v39, %v204_v44 }
  0x1c   :  { %v178_v43 = vld [vmem:[#allocation0 + $0x80] ss:$8 sm:$0xf0]   ;;  %165 = vst.msk [vmem:[%s452_s1] sm:$0xff] %vm164_vm1, %v163_v41   ;;  %209 = vrot.lane.b32.xlu0 %v208_v47, %s304_s10 }
  0x1d   :  { %v180_v45 = vsel %vm162_vm0, %v178_v43, %v176_v42  ;;  %v167_v46 = vld [vmem:[#allocation0 + $0x40] ss:$8 sm:$0xf]   ;;  %v228_v49 = vld [vmem:[#allocation0 + $0xc1] ss:$8 sm:$0xf0]  }
  0x1e   :  { %298 = vst.msk [vmem:[%s452_s1 + $0x10] sm:$0xff] %vm164_vm1, %v180_v45   ;;  %v169_v48 = vld [vmem:[#allocation0 + $0x40] ss:$8 sm:$0xf0]  }
  0x1f   :  { %v171_v50 = vsel %vm162_vm0, %v169_v48, %v167_v46  ;;  %v187_v51 = vld [vmem:[#allocation0 + $0xc0] ss:$8 sm:$0xf0]   ;;  %v226_v52 = vld [vmem:[#allocation0 + $0xc1] ss:$8 sm:$0xf]  }
  0x20   :  { %297 = vst.msk [vmem:[%s452_s1 + $0x8] sm:$0xff] %vm164_vm1, %v171_v50   ;;  %v185_v53 = vld [vmem:[#allocation0 + $0xc0] ss:$8 sm:$0xf]   ;;  %v230_v54 = vsel %vm162_vm0, %v228_v49, %v226_v52 }
  0x21   :  { %v189_v55 = vsel %vm162_vm0, %v187_v51, %v185_v53  ;;  %231 = vrot.lane.b32.xlu1 %v230_v54, %s304_s10 }
  0x22   :  { %299 = vst.msk [vmem:[%s452_s1 + $0x18] sm:$0xff] %vm164_vm1, %v189_v55  }
  0x87   :  { %v200_v56 = vpop.permute.xlu0 %199  }
  0x88   :  { %202 = vst.msk [vmem:[%s452_s1] sm:$0xff] %vm201_vm2, %v200_v56  }
  0x8c   :  { %v221_v57 = vpop.permute.xlu1 %220  }
  0x8d   :  { %301 = vst.msk [vmem:[%s452_s1 + $0x10] sm:$0xff] %vm201_vm2, %v221_v57  }
  0x8e   :  { %v210_v58 = vpop.permute.xlu0 %209  }
  0x8f   :  { %300 = vst.msk [vmem:[%s452_s1 + $0x8] sm:$0xff] %vm201_vm2, %v210_v58  }
  0x93   :  { %v232_v59 = vpop.permute.xlu1 %231  }
  0x94   :  { %302 = vst.msk [vmem:[%s452_s1 + $0x18] sm:$0xff] %vm201_vm2, %v232_v59  }

// kernel: tile.74
= control target key start
LH: loop header
LB: loop body
LE: loop exit
PB: predicated region body
PF: predicated region fallthrough
CT: control target
= control target key end

     0   :  { %s28_s0 = inlined_call_operand.vmem [shape: f32[8], index: 0, kind: input, shape index: {}]   ;;  %s29_s1 = inlined_call_operand.vmem [shape: f32[10,8], index: 1, kind: output, shape index: {}]  }
   0x1   :  { %v4_v0 = vld [vmem:[%s28_s0] ss:$0 sm:$0xff] }
   0x2   :  { %5 = vst [vmem:[%s29_s1] sm:$0xff] %v4_v0  ;;  %8 = vst [vmem:[%s29_s1 + $0x8] sm:$0xff] %v4_v0 }

// kernel: tile.75
= control target key start
LH: loop header
LB: loop body
LE: loop exit
PB: predicated region body
PF: predicated region fallthrough
CT: control target
= control target key end

     0   :  { %s83_s10 = smov 72   ;;  %s84_s11 = smov 56   ;;  %vm3_vm0 = vcmask 64512   ;;  %vm9_vm1 = vcmask 654912   ;;  %vm15_vm2 = vcmask 589312   ;;  %vm21_vm3 = vcmask 523712   ;;  %s135_s0 = inlined_call_operand.vmem [shape: f32[10,8], index: 0, kind: input, shape index: {}]   ;;  %s136_s1 = inlined_call_operand.vmem [shape: f32[1,80], index: 1, kind: output, shape index: {}]  }
   0x1   :  { %v65_v0 = vld [vmem:[%s135_s0 + $0x9] sm:$0x1]   ;;  %v67_v1 = vld [vmem:[%s135_s0 + $0x7] sm:$0x1]   ;;  %v66_v2 = vld [vmem:[%s135_s0 + $0x8] sm:$0x1]  }
   0x2   :  { %7 = vrot.lane.b32.xlu0 %v65_v0, %s83_s10  ;;  %19 = vrot.lane.b32.xlu1 %v67_v1, %s84_s11  ;;  %v68_v3 = vld [vmem:[%s135_s0 + $0x6] sm:$0x1]   ;;  %v2_v4 = vld [vmem:[%s135_s0] sm:$0x1]   ;;  %s85_s18 = smov 64   ;;  %s86_s19 = smov 48  }
   0x3   :  { %v69_v5 = vld [vmem:[%s135_s0 + $0x5] sm:$0x1]   ;;  %v70_v6 = vld [vmem:[%s135_s0 + $0x4] sm:$0x1]   ;;  %4 = vst.msk [vmem:[#allocation0] sm:$0x1] %vm3_vm0, %v2_v4  }
   0x4   :  { %s87_s24 = smov 40   ;;  %s88_s25 = smov 32   ;;  %v71_v7 = vld [vmem:[%s135_s0 + $0x3] sm:$0x1]   ;;  %v72_v8 = vld [vmem:[%s135_s0 + $0x2] sm:$0x1]  }
   0x5   :  { %s89_s30 = smov 24   ;;  %s90_s2 = smov 16   ;;  %v73_v9 = vld [vmem:[%s135_s0 + $0x1] sm:$0x1]   ;;  %vm27_vm4 = vcmask 458112   ;;  %vm33_vm5 = vcmask 392512  }
   0x6   :  { %13 = vrot.lane.b32.xlu0 %v66_v2, %s85_s18  ;;  %25 = vrot.lane.b32.xlu1 %v68_v3, %s86_s19  ;;  %s91_s0 = smov 8   ;;  %vm39_vm6 = vcmask 326912   ;;  %vm45_vm7 = vcmask 261312   ;;  %vm51_vm8 = vcmask 195712   ;;  %vm57_vm9 = vcmask 130112  }
   0xa   :  { %31 = vrot.lane.b32.xlu0 %v69_v5, %s87_s24  ;;  %37 = vrot.lane.b32.xlu1 %v70_v6, %s88_s25 }
   0xe   :  { %43 = vrot.lane.b32.xlu0 %v71_v7, %s89_s30  ;;  %49 = vrot.lane.b32.xlu1 %v72_v8, %s90_s2 }
  0x12   :  { %55 = vrot.lane.b32.xlu0 %v73_v9, %s91_s0 }
  0x74   :  { %v8_v10 = vpop.permute.xlu0 %7   ;;  %v20_v11 = vpop.permute.xlu1 %19  }
  0x75   :  { %10 = vst.msk [vmem:[#allocation0] sm:$0x1] %vm9_vm1, %v8_v10  }
  0x78   :  { %v14_v12 = vpop.permute.xlu0 %13   ;;  %v26_v13 = vpop.permute.xlu1 %25  }
  0x79   :  { %16 = vst.msk [vmem:[#allocation0] sm:$0x1] %vm15_vm2, %v14_v12  }
  0x7a   :  { %22 = vst.msk [vmem:[#allocation0] sm:$0x1] %vm21_vm3, %v20_v11  }
  0x7b   :  { %28 = vst.msk [vmem:[#allocation0] sm:$0x1] %vm27_vm4, %v26_v13  }
  0x7c   :  { %v32_v14 = vpop.permute.xlu0 %31   ;;  %v38_v15 = vpop.permute.xlu1 %37  }
  0x7d   :  { %34 = vst.msk [vmem:[#allocation0] sm:$0x1] %vm33_vm5, %v32_v14  }
  0x7e   :  { %40 = vst.msk [vmem:[#allocation0] sm:$0x1] %vm39_vm6, %v38_v15  }
  0x80   :  { %v44_v16 = vpop.permute.xlu0 %43   ;;  %v50_v17 = vpop.permute.xlu1 %49  }
  0x81   :  { %46 = vst.msk [vmem:[#allocation0] sm:$0x1] %vm45_vm7, %v44_v16  }
  0x82   :  { %52 = vst.msk [vmem:[#allocation0] sm:$0x1] %vm51_vm8, %v50_v17  }
  0x84   :  { %v56_v18 = vpop.permute.xlu0 %55  }
  0x85   :  { %58 = vst.msk [vmem:[#allocation0] sm:$0x1] %vm57_vm9, %v56_v18  }
  0x8c   :  { %v62_v19 = vld [vmem:[#allocation0] sm:$0x1] }
  0x8d   :  { %64 = vst [vmem:[%s136_s1] sm:$0x1] %v62_v19 }

// kernel: tile.82
= control target key start
LH: loop header
LB: loop body
LE: loop exit
PB: predicated region body
PF: predicated region fallthrough
CT: control target
= control target key end

     0   :  { %s28_s0 = inlined_call_operand.vmem [shape: f32[4], index: 0, kind: input, shape index: {}]   ;;  %s29_s1 = inlined_call_operand.vmem [shape: f32[10,4], index: 1, kind: output, shape index: {}]  }
   0x1   :  { %v4_v0 = vld [vmem:[%s28_s0] ss:$0 sm:$0xff] }
   0x2   :  { %5 = vst [vmem:[%s29_s1] sm:$0xff] %v4_v0  ;;  %8 = vst [vmem:[%s29_s1 + $0x8] sm:$0xff] %v4_v0 }

// kernel: tile.83
= control target key start
LH: loop header
LB: loop body
LE: loop exit
PB: predicated region body
PF: predicated region fallthrough
CT: control target
= control target key end

     0   :  { %s83_s10 = smov 36   ;;  %s84_s11 = smov 28   ;;  %vm3_vm0 = vcmask 31744   ;;  %vm9_vm1 = vcmask 326944   ;;  %vm15_vm2 = vcmask 294144   ;;  %vm21_vm3 = vcmask 261344   ;;  %s135_s0 = inlined_call_operand.vmem [shape: f32[10,4], index: 0, kind: input, shape index: {}]   ;;  %s136_s1 = inlined_call_operand.vmem [shape: f32[1,40], index: 1, kind: output, shape index: {}]  }
   0x1   :  { %v65_v0 = vld [vmem:[%s135_s0 + $0x9] sm:$0x1]   ;;  %v67_v1 = vld [vmem:[%s135_s0 + $0x7] sm:$0x1]   ;;  %v66_v2 = vld [vmem:[%s135_s0 + $0x8] sm:$0x1]  }
   0x2   :  { %7 = vrot.lane.b32.xlu0 %v65_v0, %s83_s10  ;;  %19 = vrot.lane.b32.xlu1 %v67_v1, %s84_s11  ;;  %v68_v3 = vld [vmem:[%s135_s0 + $0x6] sm:$0x1]   ;;  %v2_v4 = vld [vmem:[%s135_s0] sm:$0x1]   ;;  %s85_s18 = smov 32   ;;  %s86_s19 = smov 24  }
   0x3   :  { %v69_v5 = vld [vmem:[%s135_s0 + $0x5] sm:$0x1]   ;;  %v70_v6 = vld [vmem:[%s135_s0 + $0x4] sm:$0x1]   ;;  %4 = vst.msk [vmem:[#allocation0] sm:$0x1] %vm3_vm0, %v2_v4  }
   0x4   :  { %s87_s24 = smov 20   ;;  %s88_s25 = smov 16   ;;  %v71_v7 = vld [vmem:[%s135_s0 + $0x3] sm:$0x1]   ;;  %v72_v8 = vld [vmem:[%s135_s0 + $0x2] sm:$0x1]  }
   0x5   :  { %s89_s30 = smov 12   ;;  %s90_s2 = smov 8   ;;  %v73_v9 = vld [vmem:[%s135_s0 + $0x1] sm:$0x1]   ;;  %vm27_vm4 = vcmask 228544   ;;  %vm33_vm5 = vcmask 195744  }
   0x6   :  { %13 = vrot.lane.b32.xlu0 %v66_v2, %s85_s18  ;;  %25 = vrot.lane.b32.xlu1 %v68_v3, %s86_s19  ;;  %s91_s0 = smov 4   ;;  %vm39_vm6 = vcmask 162944   ;;  %vm45_vm7 = vcmask 130144   ;;  %vm51_vm8 = vcmask 97344   ;;  %vm57_vm9 = vcmask 64544  }
   0xa   :  { %31 = vrot.lane.b32.xlu0 %v69_v5, %s87_s24  ;;  %37 = vrot.lane.b32.xlu1 %v70_v6, %s88_s25 }
   0xe   :  { %43 = vrot.lane.b32.xlu0 %v71_v7, %s89_s30  ;;  %49 = vrot.lane.b32.xlu1 %v72_v8, %s90_s2 }
  0x12   :  { %55 = vrot.lane.b32.xlu0 %v73_v9, %s91_s0 }
  0x74   :  { %v8_v10 = vpop.permute.xlu0 %7   ;;  %v20_v11 = vpop.permute.xlu1 %19  }
  0x75   :  { %10 = vst.msk [vmem:[#allocation0] sm:$0x1] %vm9_vm1, %v8_v10  }
  0x78   :  { %v14_v12 = vpop.permute.xlu0 %13   ;;  %v26_v13 = vpop.permute.xlu1 %25  }
  0x79   :  { %16 = vst.msk [vmem:[#allocation0] sm:$0x1] %vm15_vm2, %v14_v12  }
  0x7a   :  { %22 = vst.msk [vmem:[#allocation0] sm:$0x1] %vm21_vm3, %v20_v11  }
  0x7b   :  { %28 = vst.msk [vmem:[#allocation0] sm:$0x1] %vm27_vm4, %v26_v13  }
  0x7c   :  { %v32_v14 = vpop.permute.xlu0 %31   ;;  %v38_v15 = vpop.permute.xlu1 %37  }
  0x7d   :  { %34 = vst.msk [vmem:[#allocation0] sm:$0x1] %vm33_vm5, %v32_v14  }
  0x7e   :  { %40 = vst.msk [vmem:[#allocation0] sm:$0x1] %vm39_vm6, %v38_v15  }
  0x80   :  { %v44_v16 = vpop.permute.xlu0 %43   ;;  %v50_v17 = vpop.permute.xlu1 %49  }
  0x81   :  { %46 = vst.msk [vmem:[#allocation0] sm:$0x1] %vm45_vm7, %v44_v16  }
  0x82   :  { %52 = vst.msk [vmem:[#allocation0] sm:$0x1] %vm51_vm8, %v50_v17  }
  0x84   :  { %v56_v18 = vpop.permute.xlu0 %55  }
  0x85   :  { %58 = vst.msk [vmem:[#allocation0] sm:$0x1] %vm57_vm9, %v56_v18  }
  0x8c   :  { %v62_v19 = vld [vmem:[#allocation0] sm:$0x1] }
  0x8d   :  { %64 = vst [vmem:[%s136_s1] sm:$0x1] %v62_v19 }

// kernel: tile.106
= control target key start
LH: loop header
LB: loop body
LE: loop exit
PB: predicated region body
PF: predicated region fallthrough
CT: control target
= control target key end

     0   :  { %s22_s0 = inlined_call_operand.vmem [shape: f32[8], index: 0, kind: input, shape index: {}]   ;;  %s23_s1 = inlined_call_operand.vmem [shape: f32[6,8], index: 1, kind: output, shape index: {}]  }
   0x1   :  { %v4_v0 = vld [vmem:[%s22_s0] ss:$0 sm:$0xff] }
   0x2   :  { %5 = vst [vmem:[%s23_s1] sm:$0xff] %v4_v0 }

// kernel: tile.107
= control target key start
LH: loop header
LB: loop body
LE: loop exit
PB: predicated region body
PF: predicated region fallthrough
CT: control target
= control target key end

     0   :  { %s51_s10 = smov 40   ;;  %s52_s11 = smov 24   ;;  %vm3_vm0 = vcmask 64512   ;;  %vm9_vm1 = vcmask 392512   ;;  %vm15_vm2 = vcmask 326912   ;;  %vm21_vm3 = vcmask 261312   ;;  %s87_s0 = inlined_call_operand.vmem [shape: f32[6,8], index: 0, kind: input, shape index: {}]   ;;  %s88_s1 = inlined_call_operand.vmem [shape: f32[1,48], index: 1, kind: output, shape index: {}]  }
   0x1   :  { %v41_v0 = vld [vmem:[%s87_s0 + $0x5] sm:$0x1]   ;;  %v43_v1 = vld [vmem:[%s87_s0 + $0x3] sm:$0x1]   ;;  %v42_v2 = vld [vmem:[%s87_s0 + $0x4] sm:$0x1]  }
   0x2   :  { %7 = vrot.lane.b32.xlu0 %v41_v0, %s51_s10  ;;  %19 = vrot.lane.b32.xlu1 %v43_v1, %s52_s11  ;;  %v44_v3 = vld [vmem:[%s87_s0 + $0x2] sm:$0x1]   ;;  %v2_v4 = vld [vmem:[%s87_s0] sm:$0x1]   ;;  %s53_s18 = smov 32   ;;  %s54_s19 = smov 16  }
   0x3   :  { %4 = vst.msk [vmem:[#allocation0] sm:$0x1] %vm3_vm0, %v2_v4   ;;  %v45_v5 = vld [vmem:[%s87_s0 + $0x1] sm:$0x1]   ;;  %s55_s0 = smov 8   ;;  %vm27_vm4 = vcmask 195712  }
   0x4   :  { %vm33_vm5 = vcmask 130112  }
   0x6   :  { %13 = vrot.lane.b32.xlu0 %v42_v2, %s53_s18  ;;  %25 = vrot.lane.b32.xlu1 %v44_v3, %s54_s19 }
   0xa   :  { %31 = vrot.lane.b32.xlu0 %v45_v5, %s55_s0 }
  0x74   :  { %v8_v6 = vpop.permute.xlu0 %7   ;;  %v20_v7 = vpop.permute.xlu1 %19  }
  0x75   :  { %10 = vst.msk [vmem:[#allocation0] sm:$0x1] %vm9_vm1, %v8_v6  }
  0x78   :  { %v14_v8 = vpop.permute.xlu0 %13   ;;  %v26_v9 = vpop.permute.xlu1 %25  }
  0x79   :  { %16 = vst.msk [vmem:[#allocation0] sm:$0x1] %vm15_vm2, %v14_v8  }
  0x7a   :  { %22 = vst.msk [vmem:[#allocation0] sm:$0x1] %vm21_vm3, %v20_v7  }
  0x7b   :  { %28 = vst.msk [vmem:[#allocation0] sm:$0x1] %vm27_vm4, %v26_v9  }
  0x7c   :  { %v32_v10 = vpop.permute.xlu0 %31  }
  0x7d   :  { %34 = vst.msk [vmem:[#allocation0] sm:$0x1] %vm33_vm5, %v32_v10  }
  0x84   :  { %v38_v11 = vld [vmem:[#allocation0] sm:$0x1] }
  0x85   :  { %40 = vst [vmem:[%s88_s1] sm:$0x1] %v38_v11 }

// kernel: tile.114
= control target key start
LH: loop header
LB: loop body
LE: loop exit
PB: predicated region body
PF: predicated region fallthrough
CT: control target
= control target key end

     0   :  { %s22_s0 = inlined_call_operand.vmem [shape: f32[4], index: 0, kind: input, shape index: {}]   ;;  %s23_s1 = inlined_call_operand.vmem [shape: f32[6,4], index: 1, kind: output, shape index: {}]  }
   0x1   :  { %v4_v0 = vld [vmem:[%s22_s0] ss:$0 sm:$0xff] }
   0x2   :  { %5 = vst [vmem:[%s23_s1] sm:$0xff] %v4_v0 }

// kernel: tile.115
= control target key start
LH: loop header
LB: loop body
LE: loop exit
PB: predicated region body
PF: predicated region fallthrough
CT: control target
= control target key end

     0   :  { %s51_s10 = smov 20   ;;  %s52_s11 = smov 12   ;;  %vm3_vm0 = vcmask 31744   ;;  %vm9_vm1 = vcmask 195744   ;;  %vm15_vm2 = vcmask 162944   ;;  %vm21_vm3 = vcmask 130144   ;;  %s87_s0 = inlined_call_operand.vmem [shape: f32[6,4], index: 0, kind: input, shape index: {}]   ;;  %s88_s1 = inlined_call_operand.vmem [shape: f32[1,24], index: 1, kind: output, shape index: {}]  }
   0x1   :  { %v41_v0 = vld [vmem:[%s87_s0 + $0x5] sm:$0x1]   ;;  %v43_v1 = vld [vmem:[%s87_s0 + $0x3] sm:$0x1]   ;;  %v42_v2 = vld [vmem:[%s87_s0 + $0x4] sm:$0x1]  }
   0x2   :  { %7 = vrot.lane.b32.xlu0 %v41_v0, %s51_s10  ;;  %19 = vrot.lane.b32.xlu1 %v43_v1, %s52_s11  ;;  %v44_v3 = vld [vmem:[%s87_s0 + $0x2] sm:$0x1]   ;;  %v2_v4 = vld [vmem:[%s87_s0] sm:$0x1]   ;;  %s53_s18 = smov 16   ;;  %s54_s19 = smov 8  }
   0x3   :  { %4 = vst.msk [vmem:[#allocation0] sm:$0x1] %vm3_vm0, %v2_v4   ;;  %v45_v5 = vld [vmem:[%s87_s0 + $0x1] sm:$0x1]   ;;  %s55_s0 = smov 4   ;;  %vm27_vm4 = vcmask 97344  }
   0x4   :  { %vm33_vm5 = vcmask 64544  }
   0x6   :  { %13 = vrot.lane.b32.xlu0 %v42_v2, %s53_s18  ;;  %25 = vrot.lane.b32.xlu1 %v44_v3, %s54_s19 }
   0xa   :  { %31 = vrot.lane.b32.xlu0 %v45_v5, %s55_s0 }
  0x74   :  { %v8_v6 = vpop.permute.xlu0 %7   ;;  %v20_v7 = vpop.permute.xlu1 %19  }
  0x75   :  { %10 = vst.msk [vmem:[#allocation0] sm:$0x1] %vm9_vm1, %v8_v6  }
  0x78   :  { %v14_v8 = vpop.permute.xlu0 %13   ;;  %v26_v9 = vpop.permute.xlu1 %25  }
  0x79   :  { %16 = vst.msk [vmem:[#allocation0] sm:$0x1] %vm15_vm2, %v14_v8  }
  0x7a   :  { %22 = vst.msk [vmem:[#allocation0] sm:$0x1] %vm21_vm3, %v20_v7  }
  0x7b   :  { %28 = vst.msk [vmem:[#allocation0] sm:$0x1] %vm27_vm4, %v26_v9  }
  0x7c   :  { %v32_v10 = vpop.permute.xlu0 %31  }
  0x7d   :  { %34 = vst.msk [vmem:[#allocation0] sm:$0x1] %vm33_vm5, %v32_v10  }
  0x84   :  { %v38_v11 = vld [vmem:[#allocation0] sm:$0x1] }
  0x85   :  { %40 = vst [vmem:[%s88_s1] sm:$0x1] %v38_v11 }

// kernel: tile.90
= control target key start
LH: loop header
LB: loop body
LE: loop exit
PB: predicated region body
PF: predicated region fallthrough
CT: control target
= control target key end

     0   :  { %s22_s0 = inlined_call_operand.vmem [shape: f32[8], index: 0, kind: input, shape index: {}]   ;;  %s23_s1 = inlined_call_operand.vmem [shape: f32[8,8], index: 1, kind: output, shape index: {}]  }
   0x1   :  { %v4_v0 = vld [vmem:[%s22_s0] ss:$0 sm:$0xff] }
   0x2   :  { %5 = vst [vmem:[%s23_s1] sm:$0xff] %v4_v0 }

// kernel: tile.91
= control target key start
LH: loop header
LB: loop body
LE: loop exit
PB: predicated region body
PF: predicated region fallthrough
CT: control target
= control target key end

     0   :  { %s67_s10 = smov 56   ;;  %s68_s11 = smov 40   ;;  %vm3_vm0 = vcmask 64512   ;;  %vm9_vm1 = vcmask 523712   ;;  %vm15_vm2 = vcmask 458112   ;;  %vm21_vm3 = vcmask 392512   ;;  %s111_s0 = inlined_call_operand.vmem [shape: f32[8,8], index: 0, kind: input, shape index: {}]   ;;  %s112_s1 = inlined_call_operand.vmem [shape: f32[1,64], index: 1, kind: output, shape index: {}]  }
   0x1   :  { %v53_v0 = vld [vmem:[%s111_s0 + $0x7] sm:$0x1]   ;;  %v55_v1 = vld [vmem:[%s111_s0 + $0x5] sm:$0x1]   ;;  %v54_v2 = vld [vmem:[%s111_s0 + $0x6] sm:$0x1]  }
   0x2   :  { %7 = vrot.lane.b32.xlu0 %v53_v0, %s67_s10  ;;  %19 = vrot.lane.b32.xlu1 %v55_v1, %s68_s11  ;;  %v56_v3 = vld [vmem:[%s111_s0 + $0x4] sm:$0x1]   ;;  %v2_v4 = vld [vmem:[%s111_s0] sm:$0x1]   ;;  %s69_s18 = smov 48   ;;  %s70_s19 = smov 32  }
   0x3   :  { %4 = vst.msk [vmem:[#allocation0] sm:$0x1] %vm3_vm0, %v2_v4   ;;  %v57_v5 = vld [vmem:[%s111_s0 + $0x3] sm:$0x1]   ;;  %v58_v6 = vld [vmem:[%s111_s0 + $0x2] sm:$0x1]  }
   0x4   :  { %s71_s24 = smov 24   ;;  %s72_s25 = smov 16   ;;  %v59_v7 = vld [vmem:[%s111_s0 + $0x1] sm:$0x1]   ;;  %vm27_vm4 = vcmask 326912   ;;  %vm33_vm5 = vcmask 261312  }
   0x5   :  { %s73_s0 = smov 8   ;;  %vm39_vm6 = vcmask 195712   ;;  %vm45_vm7 = vcmask 130112  }
   0x6   :  { %13 = vrot.lane.b32.xlu0 %v54_v2, %s69_s18  ;;  %25 = vrot.lane.b32.xlu1 %v56_v3, %s70_s19 }
   0xa   :  { %31 = vrot.lane.b32.xlu0 %v57_v5, %s71_s24  ;;  %37 = vrot.lane.b32.xlu1 %v58_v6, %s72_s25 }
   0xe   :  { %43 = vrot.lane.b32.xlu0 %v59_v7, %s73_s0 }
  0x74   :  { %v8_v8 = vpop.permute.xlu0 %7   ;;  %v20_v9 = vpop.permute.xlu1 %19  }
  0x75   :  { %10 = vst.msk [vmem:[#allocation0] sm:$0x1] %vm9_vm1, %v8_v8  }
  0x78   :  { %v14_v10 = vpop.permute.xlu0 %13   ;;  %v26_v11 = vpop.permute.xlu1 %25  }
  0x79   :  { %16 = vst.msk [vmem:[#allocation0] sm:$0x1] %vm15_vm2, %v14_v10  }
  0x7a   :  { %22 = vst.msk [vmem:[#allocation0] sm:$0x1] %vm21_vm3, %v20_v9  }
  0x7b   :  { %28 = vst.msk [vmem:[#allocation0] sm:$0x1] %vm27_vm4, %v26_v11  }
  0x7c   :  { %v32_v12 = vpop.permute.xlu0 %31   ;;  %v38_v13 = vpop.permute.xlu1 %37  }
  0x7d   :  { %34 = vst.msk [vmem:[#allocation0] sm:$0x1] %vm33_vm5, %v32_v12  }
  0x7e   :  { %40 = vst.msk [vmem:[#allocation0] sm:$0x1] %vm39_vm6, %v38_v13  }
  0x80   :  { %v44_v14 = vpop.permute.xlu0 %43  }
  0x81   :  { %46 = vst.msk [vmem:[#allocation0] sm:$0x1] %vm45_vm7, %v44_v14  }
  0x88   :  { %v50_v15 = vld [vmem:[#allocation0] sm:$0x1] }
  0x89   :  { %52 = vst [vmem:[%s112_s1] sm:$0x1] %v50_v15 }

// kernel: tile.122
= control target key start
LH: loop header
LB: loop body
LE: loop exit
PB: predicated region body
PF: predicated region fallthrough
CT: control target
= control target key end

     0   :  { %s22_s0 = inlined_call_operand.vmem [shape: f32[8], index: 0, kind: input, shape index: {}]   ;;  %s23_s1 = inlined_call_operand.vmem [shape: f32[4,8], index: 1, kind: output, shape index: {}]  }
   0x1   :  { %v4_v0 = vld [vmem:[%s22_s0] ss:$0 sm:$0xff] }
   0x2   :  { %5 = vst [vmem:[%s23_s1] sm:$0xf] %v4_v0 }

// kernel: tile.123
= control target key start
LH: loop header
LB: loop body
LE: loop exit
PB: predicated region body
PF: predicated region fallthrough
CT: control target
= control target key end

     0   :  { %vm7_vm0 = vcmask 64512   ;;  %s37_s8 = smov 8   ;;  %s38_s9 = smov 16   ;;  %vm13_vm1 = vcmask 261312   ;;  %vm19_vm2 = vcmask 195712   ;;  %vm25_vm3 = vcmask 130112   ;;  %s55_s0 = inlined_call_operand.vmem [shape: f32[4,8], index: 0, kind: input, shape index: {}]   ;;  %s56_s1 = inlined_call_operand.vmem [shape: f32[1,32], index: 1, kind: output, shape index: {}]  }
   0x1   :  { %v4_v0 = vld [vmem:[%s55_s0] sm:$0xf]  ;;  %s36_s0 = smov 24  }
   0x2   :  { %5 = vst [vmem:[#allocation1] sm:$0xf] %v4_v0 }
   0x9   :  { %v10_v1 = vld [vmem:[#allocation1 + $0x3] sm:$0x1]   ;;  %v22_v2 = vld [vmem:[#allocation1 + $0x1] sm:$0x1]   ;;  %v6_v3 = vld [vmem:[#allocation1] sm:$0x1]  }
   0xa   :  { %11 = vrot.lane.b32.xlu0 %v10_v1, %s36_s0  ;;  %23 = vrot.lane.b32.xlu1 %v22_v2, %s37_s8  ;;  %v16_v4 = vld [vmem:[#allocation1 + $0x2] sm:$0x1]   ;;  %8 = vst.msk [vmem:[#allocation0] sm:$0x1] %vm7_vm0, %v6_v3  }
   0xe   :  { %17 = vrot.lane.b32.xlu0 %v16_v4, %s38_s9 }
  0x7c   :  { %v12_v5 = vpop.permute.xlu0 %11   ;;  %v24_v6 = vpop.permute.xlu1 %23  }
  0x7d   :  { %14 = vst.msk [vmem:[#allocation0] sm:$0x1] %vm13_vm1, %v12_v5  }
  0x80   :  { %v18_v7 = vpop.permute.xlu0 %17  }
  0x81   :  { %20 = vst.msk [vmem:[#allocation0] sm:$0x1] %vm19_vm2, %v18_v7  }
  0x82   :  { %26 = vst.msk [vmem:[#allocation0] sm:$0x1] %vm25_vm3, %v24_v6  }
  0x89   :  { %v30_v8 = vld [vmem:[#allocation0] sm:$0x1] }
  0x8a   :  { %32 = vst [vmem:[%s56_s1] sm:$0x1] %v30_v8 }

// kernel: _lambda_.1
= control target key start
LH: loop header
LB: loop body
LE: loop exit
PB: predicated region body
PF: predicated region fallthrough
CT: control target
= control target key end

     0   :  { %s5599_s3 = smov 5   ;;  %s5600_s10 = smov 3   ;;  %vm221_vm0 = vcmask 1043456   ;;  %vm208_vm1 = vcmask 97280   ;;  %vm5601_vm2 = vmmov 1   ;;  %vm450_vm4 = vcmask 654336   ;;  %s6161_s0 = inlined_call_operand.smem [shape: u32[45], index: -1, kind: input, shape index: {}] }
   0x1   :  { %s4066_s6 = sld [smem:[%s6161_s0 + %s5599_s3]]   ;;  %vm5133_vm3 = vmpackc.low %vm221_vm0, %vm5601_vm2  ;;  %s5602_s14 = smov 7   ;;  %vm553_vm5 = vcmask 261120   ;;  %vm657_vm6 = vcmask 326656   ;;  %vm1417_vm7 = vcmask 523264   ;;  %vm1975_vm8 = vcmask 392192  }
   0x2   :  { %s1_s9 = sld [smem:[%s6161_s0]]   ;;  %s5603_s18 = smov 6   ;;  %vm2165_vm9 = vcmask 195584   ;;  %vm3533_vm10 = vcmask 130048   ;;  %vm4053_vm11 = vcmask 7168  }
   0x3   :  { %s4064_s13 = sld [smem:[%s6161_s0 + %s5600_s10]]   ;;  %s5604_s22 = smov 4  }
   0x4   :  { %s4068_s17 = sld [smem:[%s6161_s0 + %s5602_s14]]   ;;  %s5605_s26 = smov 1  }
   0x5   :  { %s4067_s21 = sld [smem:[%s6161_s0 + %s5603_s18]]   ;;  %s5606_s30 = smov 8  }
   0x6   :  { %s4065_s25 = sld [smem:[%s6161_s0 + %s5604_s22]]   ;;  %s5607_s4 = smov 9  }
   0x7   :  { %v199_v0 = vld [vmem:[%s4066_s6] sm:$0xff]  ;;  %v200_v1 = vld [vmem:[%s4066_s6 + $0x8] sm:$0xf]  ;;  %s5678_s29 = sld [smem:[%s6161_s0 + %s5605_s26]]   ;;  %s5608_s8 = smov 11  }
   0x8   :  { %v184_v2 = vld [vmem:[%s1_s9] sm:$0xff]  ;;  %v5138_v3 = vpack.c.bf16 %v200_v1, %v199_v0  ;;  %v185_v7 = vld [vmem:[%s1_s9 + $0x8] sm:$0xff]  ;;  %v186_v8 = vld [vmem:[%s1_s9 + $0x10] sm:$0xff]  ;;  %s4069_s3 = sld [smem:[%s6161_s0 + %s5606_s30]]   ;;  %s5609_s12 = smov 13  }
   0x9   :  { %4618 = vmatprep.mubr.msk.f32.mxu1 %vm208_vm1, %v184_v2  ;;  %4608 = vmatprep.mubr.msk.f32.mxu0 %vm208_vm1, %v184_v2  ;;  %v196_v4 = vld [vmem:[%s4064_s13] sm:$0xff]  ;;  %v197_v5 = vld [vmem:[%s4064_s13 + $0x8] sm:$0xf]  ;;  %v187_v9 = vld [vmem:[%s1_s9 + $0x18] sm:$0xff]  ;;  %s5693_s7 = sld [smem:[%s6161_s0 + %s5607_s4]]   ;;  %s5610_s16 = smov 10  }
   0xa   :  { %5140 = vmatprep.subr.msk.bf16.mxu1 %vm5133_vm3, %v5138_v3  ;;  %v5132_v6 = vpack.c.bf16 %v197_v5, %v196_v4  ;;  %v432_v10 = vld [vmem:[%s4068_s17] sm:$0xff]  ;;  %v433_v11 = vld [vmem:[%s4068_s17 + $0x8] sm:$0xff]  ;;  %v434_v13 = vld [vmem:[%s4068_s17 + $0x10] sm:$0xff]  ;;  %s4072_s11 = sld [smem:[%s6161_s0 + %s5608_s8]]   ;;  %s5611_s20 = smov 2  }
   0xb   :  { %5143 = vmatpush3.bf16.msk.msra.mxu1 %vm5133_vm3, %v5138_v3  ;;  %v5144_v12 = vpack.c.bf16 %v433_v11, %v432_v10  ;;  %v435_v14 = vld [vmem:[%s4068_s17 + $0x18] sm:$0xff]  ;;  %v436_v16 = vld [vmem:[%s4068_s17 + $0x20] sm:$0xff]  ;;  %v437_v17 = vld [vmem:[%s4068_s17 + $0x28] sm:$0xff]  ;;  %s5769_s15 = sld [smem:[%s6161_s0 + %s5609_s12]]   ;;  %s5612_s24 = smov 14  }
   0xc   :  { %5134 = vmatprep.subr.msk.bf16.mxu0 %vm5133_vm3, %v5132_v6  ;;  %v5148_v15 = vpack.c.bf16 %v435_v14, %v434_v13  ;;  %v5152_v18 = vpack.c.bf16 %v437_v17, %v436_v16  ;;  %v438_v19 = vld [vmem:[%s4068_s17 + $0x30] sm:$0xff]  ;;  %v439_v20 = vld [vmem:[%s4068_s17 + $0x38] sm:$0xff]  ;;  %v440_v22 = vld [vmem:[%s4068_s17 + $0x40] sm:$0xff]  ;;  %s4071_s19 = sld [smem:[%s6161_s0 + %s5610_s16]]   ;;  %s5613_s28 = smov 12  }
   0xd   :  { %5137 = vmatpush3.bf16.msk.msra.mxu0 %vm5133_vm3, %v5132_v6  ;;  %v5156_v21 = vpack.c.bf16 %v439_v20, %v438_v19  ;;  %v441_v23 = vld [vmem:[%s4068_s17 + $0x48] sm:$0xff]  ;;  %v4112_v25 = vld [vmem:[%s4067_s21] ss:$0 sm:$0xff]  ;;  %v5715_v17 = vld [vmem:[%s5678_s29 + $0x10] sm:$0xff]  ;;  %s5794_s23 = sld [smem:[%s6161_s0 + %s5611_s20]]   ;;  %s5614_s2 = smov 17  }
   0xe   :  { %4619 = vmatmul.mubr.msk.f32.vlgmr.msra.gmra.mrb[0].mxu1 %vm208_vm1, %v185_v7  ;;  %5145 = vmatprep.subr.bf16.mxu0 %v5144_v12  ;;  %v5160_v24 = vpack.c.bf16 %v441_v23, %v440_v22  ;;  %v4106_v50 = vld [vmem:[%s4065_s25] ss:$0 sm:$0xff]  ;;  %v5712_v16 = vld [vmem:[%s5678_s29 + $0x8] sm:$0xff]  ;;  %v5722_v19 = vld [vmem:[%s5678_s29 + $0x18] sm:$0xff]  ;;  %s4075_s27 = sld [smem:[%s6161_s0 + %s5612_s24]]   ;;  %s5615_s6 = smov 18  }
   0xf   :  { %4621 = vmatprep.mubr.msk.f32.mxu1 %vm208_vm1, %v186_v8  ;;  %v5681_v63 = vld [vmem:[%s5678_s29] sm:$0xff]  ;;  %v4132_v10 = vld [vmem:[%s5693_s7 + $0x30] sm:$0xff]  ;;  %v4133_v14 = vld [vmem:[%s5693_s7 + $0x38] sm:$0xff]  ;;  %s4073_s1 = sld [smem:[%s6161_s0 + %s5613_s28]]   ;;  %s5616_s10 = smov 20  }
  0x10   :  { %4609 = vmatmul.mubr.msk.f32.vlgmr.msra.gmra.mrb[0].mxu0 %vm208_vm1, %v185_v7  ;;  %v4122_v0 = vld [vmem:[%s4069_s3] ss:$0 sm:$0xff]  ;;  %v4135_v20 = vld [vmem:[%s5693_s7 + $0x48] sm:$0xff]  ;;  %s5812_s5 = sld [smem:[%s6161_s0 + %s5614_s2]]   ;;  %s5617_s14 = smov 15  }
  0x11   :  { %4611 = vmatprep.mubr.msk.f32.mxu0 %vm208_vm1, %v186_v8  ;;  %5147 = vmatpush3.bf16.msra.mxu0 %v5144_v12  ;;  %v549_v22 = vld [vmem:[%s5693_s7 + $0x8] sm:$0xff]  ;;  %s5870_s9 = sld [smem:[%s6161_s0 + %s5615_s6]]   ;;  %s5618_s18 = smov 16  }
  0x12   :  { %4622 = vmatmul.mubr.msk.f32.gmra.mrb[2].mxu1 %vm208_vm1, %v187_v9  ;;  %5149 = vmatprep.subr.bf16.mxu0 %v5148_v15  ;;  %s5875_s13 = sld [smem:[%s6161_s0 + %s5616_s10]]   ;;  %s5619_s22 = smov 22  }
  0x13   :  { %4658 = vmatprep.mubr.msk.f32.mxu1 %vm553_vm5, %v5681_v63  ;;  %s4076_s17 = sld [smem:[%s6161_s0 + %s5617_s14]]   ;;  %s5638_s10 = smov 37  }
  0x14   :  { %4612 = vmatmul.mubr.msk.f32.gmra.mrb[2].mxu0 %vm208_vm1, %v187_v9  ;;  %v4131_v9 = vld [vmem:[%s5693_s7 + $0x28] sm:$0xff]  ;;  %s4077_s21 = sld [smem:[%s6161_s0 + %s5618_s18]]   ;;  %s5639_s14 = smov 38  }
  0x15   :  { %5151 = vmatpush3.bf16.msra.mxu0 %v5148_v15  ;;  %v5172_v13 = vpack.c.bf16 %v4132_v10, %v4131_v9  ;;  %v4134_v15 = vld [vmem:[%s5693_s7 + $0x40] sm:$0xff]  ;;  %s4083_s26 = sld [smem:[%s6161_s0 + %s5619_s22]]   ;;  %s5640_s18 = smov 42  }
  0x16   :  { %5153 = vmatprep.subr.bf16.mxu0 %v5152_v18  ;;  %s5641_s22 = smov 43  }
  0x19   :  { %5155 = vmatpush3.bf16.msra.mxu0 %v5152_v18  ;;  %v5176_v18 = vpack.c.bf16 %v4134_v15, %v4133_v14 }
  0x1a   :  { %5157 = vmatprep.subr.bf16.mxu0 %v5156_v21 }
  0x1d   :  { %5159 = vmatpush3.bf16.msra.mxu0 %v5156_v21  ;;  %v548_v21 = vld [vmem:[%s5693_s7] sm:$0xff] }
  0x1e   :  { %5161 = vmatprep.subr.bf16.mxu0 %v5160_v24  ;;  %v5180_v23 = vpack.c.bf16 %v549_v22, %v548_v21 }
  0x21   :  { %5163 = vmatpush3.bf16.msra.mxu0 %v5160_v24  ;;  %v550_v24 = vld [vmem:[%s5693_s7 + $0x10] sm:$0xff] }
  0xe1   :  { %v4620_v26 = vpop.f32.mrb[0].mxu1 }
  0xe2   :  { %v391_v27 = vadd.f32 %v4620_v26, %v4112_v25  ;;  %v385_v28 = vpop.f32.mrb[1].mxu1 }
  0xe3   :  { %v386_v29 = vadd.f32 %v4112_v25, %v385_v28  ;;  %v4610_v30 = vpop.f32.mrb[0].mxu0 }
  0xe4   :  { %v4119_v31 = vmul.f32 -1.442695, %v391_v27  ;;  %v291_v32 = vpop.f32.mrb[1].mxu0  ;;  %v297_v51 = vadd.f32 %v4610_v30, %v4106_v50 }
  0xe5   :  { %v4118_v33 = vmul.f32 -1.442695, %v386_v29  ;;  %v4623_v34 = vpop.f32.mrb[2].mxu1  ;;  %v292_v52 = vadd.f32 %v4106_v50, %v291_v32 }
  0xe6   :  { %5491 = vpow2.f32 %v4119_v31  ;;  %v401_v35 = vadd.f32 %v4623_v34, %v4112_v25  ;;  %v395_v36 = vpop.f32.mrb[3].mxu1  ;;  %v4148_v34 = vld [vmem:[%s5693_s7 + $0x50] sm:$0xff] }
  0xe7   :  { %5493 = vpow2.f32 %v4118_v33  ;;  %v396_v37 = vadd.f32 %v4112_v25, %v395_v36  ;;  %v4613_v38 = vpop.f32.mrb[2].mxu0  ;;  %v551_v25 = vld [vmem:[%s5693_s7 + $0x18] sm:$0xff]  ;;  %v552_v33 = vld [vmem:[%s5693_s7 + $0x20] sm:$0xff] }
  0xe8   :  { %v4121_v39 = vmul.f32 -1.442695, %v401_v35  ;;  %v301_v40 = vpop.f32.mrb[3].mxu0  ;;  %v307_v56 = vadd.f32 %v4613_v38, %v4106_v50  ;;  %v5184_v28 = vpack.c.bf16 %v551_v25, %v550_v24  ;;  %v4149_v35 = vld [vmem:[%s5693_s7 + $0x58] sm:$0xff]  ;;  %v4151_v38 = vld [vmem:[%s5693_s7 + $0x68] sm:$0xff]  ;;  %v1080_v25 = vld [vmem:[%s5769_s15 + $0x20] sm:$0xff] }
  0xe9   :  { %v4120_v41 = vmul.f32 -1.442695, %v396_v37  ;;  %v302_v58 = vadd.f32 %v4106_v50, %v301_v40  ;;  %v5196_v36 = vpack.c.bf16 %v4149_v35, %v4148_v34  ;;  %v4150_v37 = vld [vmem:[%s5693_s7 + $0x60] sm:$0xff]  ;;  %v4152_v40 = vld [vmem:[%s5693_s7 + $0x70] sm:$0xff] }
  0xea   :  { %5495 = vpow2.f32 %v4121_v39  ;;  %v5200_v39 = vpack.c.bf16 %v4151_v38, %v4150_v37 }
  0xeb   :  { %5497 = vpow2.f32 %v4120_v41  ;;  %v1070_v41 = vld [vmem:[%s4072_s11] sm:$0xff] }
  0xf0   :  { %v5492_v42 = vpop.eup %5491 }
  0xf1   :  { %v5494_v43 = vpop.eup %5493  ;;  %v417_v44 = vadd.f32 1.0, %v5492_v42  ;;  %v1071_v42 = vld [vmem:[%s4072_s11 + $0x8] sm:$0xff] }
  0xf2   :  { %v416_v45 = vadd.f32 1.0, %v5494_v43  ;;  %v5204_v43 = vpack.c.bf16 %v1071_v42, %v1070_v41 }
  0xf3   :  { %5499 = vrcp.f32 %v417_v44 }
  0xf4   :  { %v5496_v46 = vpop.eup %5495  ;;  %5501 = vrcp.f32 %v416_v45 }
  0xf5   :  { %v5498_v47 = vpop.eup %5497  ;;  %v419_v48 = vadd.f32 1.0, %v5496_v46 }
  0xf6   :  { %v418_v49 = vadd.f32 1.0, %v5498_v47 }
  0xf7   :  { %5503 = vrcp.f32 %v419_v48 }
  0xf8   :  { %5505 = vrcp.f32 %v418_v49 }
  0xfd   :  { %v5500_v53 = vpop.eup %5499 }
  0xfe   :  { %v5502_v54 = vpop.eup %5501  ;;  %v429_v55 = vmul.f32 %v5500_v53, %v297_v51 }
  0xff   :  { %v428_v57 = vmul.f32 %v5502_v54, %v292_v52 }
 0x101   :  { %v5504_v59 = vpop.eup %5503  ;;  %4644 = vmatprep.mubr.msk.f32.mxu0 %vm450_vm4, %v428_v57  ;;  %v1073_v57 = vld [vmem:[%s4072_s11 + $0x18] sm:$0xff] }
 0x102   :  { %v5506_v60 = vpop.eup %5505  ;;  %v431_v61 = vmul.f32 %v5504_v59, %v307_v56  ;;  %4645 = vmatmul.mubr.msk.f32.vlgmr.msra.gmra.mrb[4].mxu0 %vm450_vm4, %v429_v55  ;;  %v1072_v56 = vld [vmem:[%s4072_s11 + $0x10] sm:$0xff]  ;;  %v1074_v59 = vld [vmem:[%s4072_s11 + $0x20] sm:$0xff] }
 0x103   :  { %v430_v62 = vmul.f32 %v5506_v60, %v302_v58  ;;  %v5208_v58 = vpack.c.bf16 %v1073_v57, %v1072_v56  ;;  %v1076_v60 = vld [vmem:[%s5769_s15] sm:$0xff] }
 0x105   :  { %4647 = vmatprep.mubr.msk.f32.mxu0 %vm450_vm4, %v430_v62 }
 0x106   :  { %4648 = vmatmul.mubr.msk.f32.gmra.mrb[6].mxu0 %vm450_vm4, %v431_v61  ;;  %v1077_v61 = vld [vmem:[%s5769_s15 + $0x8] sm:$0xff] }
 0x107   :  { %4704 = vmatprep.mubr.msk.f32.mxu0 %vm553_vm5, %v5681_v63  ;;  %v5212_v62 = vpack.c.bf16 %v1077_v61, %v1076_v60 }
 0x1d5   :  { %v4646_v1 = vpop.f32.mrb[4].mxu0 }
 0x1d6   :  { %v5695_v2 = vadd.f32 %v4646_v1, %v4122_v0  ;;  %v529_v3 = vpop.f32.mrb[5].mxu0 }
 0x1d7   :  { %v5697_v4 = vadd.f32 %v4122_v0, %v529_v3 }
 0x1d9   :  { %v4649_v5 = vpop.f32.mrb[6].mxu0  ;;  %v5164_v6 = vpack.c.bf16 %v5695_v2, %v5697_v4 }
 0x1da   :  { %v5701_v7 = vadd.f32 %v4649_v5, %v4122_v0  ;;  %v539_v8 = vpop.f32.mrb[7].mxu0 }
 0x1db   :  { %v5705_v11 = vadd.f32 %v4122_v0, %v539_v8  ;;  %5165 = vmatprep.subr.bf16.mxu1 %v5164_v6  ;;  %v4157_v0 = vld [vmem:[%s4071_s19] ss:$0 sm:$0xff] }
 0x1dc   :  { %5167 = vmatpush3.bf16.msra.mxu1 %v5164_v6 }
 0x1dd   :  { %v5168_v12 = vpack.c.bf16 %v5701_v7, %v5705_v11 }
 0x1df   :  { %5169 = vmatprep.subr.bf16.mxu1 %v5168_v12 }
 0x1e0   :  { %5171 = vmatpush3.bf16.msra.mxu1 %v5168_v12  ;;  %v1078_v12 = vld [vmem:[%s5769_s15 + $0x10] sm:$0xff] }
 0x1e1   :  { %5173 = vmatprep.subr.bf16.mxu1 %v5172_v13 }
 0x1e3   :  { %4659 = vmatmul.mubr.msk.f32.vlgmr.msra.gmra.mrb[4].mxu1 %vm553_vm5, %v5712_v16 }
 0x1e4   :  { %4661 = vmatprep.mubr.msk.f32.mxu1 %vm553_vm5, %v5715_v17  ;;  %5175 = vmatpush3.bf16.msra.mxu1 %v5172_v13  ;;  %v1079_v13 = vld [vmem:[%s5769_s15 + $0x18] sm:$0xff] }
 0x1e5   :  { %5177 = vmatprep.subr.bf16.mxu1 %v5176_v18 }
 0x1e7   :  { %4662 = vmatmul.mubr.msk.f32.gmra.mrb[6].mxu1 %vm553_vm5, %v5722_v19 }
 0x1e8   :  { %5179 = vmatpush3.bf16.msra.mxu1 %v5176_v18 }
 0x1e9   :  { %4672 = vmatprep.subr.mxu1 %v4135_v20 }
 0x1ec   :  { %4673 = vmatpush3.msra.mxu1 %v4135_v20 }
 0x1ed   :  { %5181 = vmatprep.subr.bf16.mxu1 %v5180_v23 }
 0x2b6   :  { %v4660_v26 = vpop.f32.mrb[4].mxu1 }
 0x2b7   :  { %v632_v27 = vpop.f32.mrb[5].mxu1 }
 0x2b8   :  { %v5188_v29 = vpack.c.bf16 %v4660_v26, %v632_v27  ;;  %4674 = vmatprep.mubr.msk.f32.mxu1 %vm657_vm6, %v632_v27 }
 0x2b9   :  { %4675 = vmatmul.mubr.msk.f32.vlgmr.msra.gmra.mrb[8].mxu1 %vm657_vm6, %v4660_v26 }
 0x2ba   :  { %5183 = vmatpush3.bf16.msra.mxu1 %v5180_v23  ;;  %v4663_v30 = vpop.f32.mrb[6].mxu1  ;;  %5189 = vmatprep.subr.bf16.mxu0 %v5188_v29  ;;  %v5216_v23 = vpack.c.bf16 %v1079_v13, %v1078_v12  ;;  %v5822_v12 = vld [vmem:[%s5794_s23 + $0x10] sm:$0xff] }
 0x2bb   :  { %v642_v31 = vpop.f32.mrb[7].mxu1  ;;  %5191 = vmatpush3.bf16.msra.mxu0 %v5188_v29  ;;  %5185 = vmatprep.subr.bf16.mxu1 %v5184_v28  ;;  %v4163_v29 = vld [vmem:[%s4075_s27] ss:$0 sm:$0xff]  ;;  %s5620_s27 = smov 21  }
 0x2bc   :  { %v5192_v32 = vpack.c.bf16 %v4663_v30, %v642_v31  ;;  %4677 = vmatprep.mubr.msk.f32.mxu1 %vm657_vm6, %v642_v31  ;;  %s4082_s30 = sld [smem:[%s6161_s0 + %s5620_s27]]   ;;  %s5642_s27 = smov 41  }
 0x2bd   :  { %4678 = vmatmul.mubr.msk.f32.gmra.mrb[10].mxu1 %vm657_vm6, %v4663_v30 }
 0x2be   :  { %5187 = vmatpush3.bf16.msra.mxu1 %v5184_v28  ;;  %4690 = vmatprep.mubr.msk.f32.mxu1 %vm657_vm6, %v5697_v4 }
 0x2bf   :  { %5193 = vmatprep.subr.bf16.mxu0 %v5192_v32  ;;  %4688 = vmatprep.subr.mxu1 %v552_v33 }
 0x2c0   :  { %5195 = vmatpush3.bf16.msra.mxu0 %v5192_v32 }
 0x2c1   :  { %5205 = vmatprep.subr.bf16.mxu0 %v5204_v43 }
 0x2c2   :  { %4689 = vmatpush3.msra.mxu1 %v552_v33 }
 0x2c3   :  { %4691 = vmatmul.mubr.msk.f32.vlgmr.msra.gmra.mrb[8].mxu1 %vm657_vm6, %v5695_v2  ;;  %4705 = vmatmul.mubr.msk.f32.vlgmr.msra.gmra.mrb[8].mxu0 %vm553_vm5, %v5712_v16 }
 0x2c4   :  { %4693 = vmatprep.mubr.msk.f32.mxu1 %vm657_vm6, %v5705_v11  ;;  %4707 = vmatprep.mubr.msk.f32.mxu0 %vm553_vm5, %v5715_v17 }
 0x2c5   :  { %5197 = vmatprep.subr.bf16.mxu1 %v5196_v36  ;;  %5207 = vmatpush3.bf16.msra.mxu0 %v5204_v43 }
 0x2c6   :  { %5199 = vmatpush3.bf16.msra.mxu1 %v5196_v36  ;;  %5209 = vmatprep.subr.bf16.mxu0 %v5208_v58 }
 0x2c7   :  { %4694 = vmatmul.mubr.msk.f32.gmra.mrb[10].mxu1 %vm657_vm6, %v5701_v7  ;;  %4708 = vmatmul.mubr.msk.f32.gmra.mrb[10].mxu0 %vm553_vm5, %v5722_v19 }
 0x2c8   :  { %5201 = vmatprep.subr.bf16.mxu1 %v5200_v39 }
 0x2c9   :  { %5211 = vmatpush3.bf16.msra.mxu0 %v5208_v58 }
 0x2ca   :  { %5203 = vmatpush3.bf16.msra.mxu1 %v5200_v39  ;;  %4734 = vmatprep.subr.mxu0 %v1074_v59 }
 0x2cb   :  { %4718 = vmatprep.subr.mxu1 %v4152_v40 }
 0x2cd   :  { %4735 = vmatpush3.msra.mxu0 %v1074_v59 }
 0x2ce   :  { %4719 = vmatpush3.msra.mxu1 %v4152_v40  ;;  %5213 = vmatprep.subr.bf16.mxu0 %v5212_v62 }
 0x396   :  { %v4706_v44 = vpop.f32.mrb[8].mxu0 }
 0x397   :  { %v938_v45 = vmul.f32 2.0, %v4706_v44  ;;  %v918_v46 = vpop.f32.mrb[9].mxu0 }
 0x398   :  { %v937_v47 = vmul.f32 2.0, %v918_v46 }
 0x399   :  { %v942_v50 = vsub.f32 %v938_v45, %v5695_v2 }
 0x39a   :  { %v941_v48 = vsub.f32 %v937_v47, %v5697_v4  ;;  %v4709_v49 = vpop.f32.mrb[10].mxu0 }
 0x39b   :  { %v940_v51 = vmul.f32 2.0, %v4709_v49  ;;  %v928_v52 = vpop.f32.mrb[11].mxu0 }
 0x39c   :  { %v939_v53 = vmul.f32 2.0, %v928_v52  ;;  %4720 = vmatprep.mubr.msk.f32.mxu1 %vm657_vm6, %v941_v48 }
 0x39d   :  { %4721 = vmatmul.mubr.msk.f32.vlgmr.msra.gmra.mrb[8].mxu1 %vm657_vm6, %v942_v50  ;;  %v944_v55 = vsub.f32 %v940_v51, %v5701_v7  ;;  %v4158_v50 = vld [vmem:[%s4073_s1] ss:$0 sm:$0xff]  ;;  %s5621_s1 = smov 19  }
 0x39e   :  { %v943_v54 = vsub.f32 %v939_v53, %v5705_v11  ;;  %s4080_s4 = sld [smem:[%s6161_s0 + %s5621_s1]]   ;;  %s5643_s1 = smov 44  }
 0x3a0   :  { %4723 = vmatprep.mubr.msk.f32.mxu1 %vm657_vm6, %v943_v54 }
 0x3a1   :  { %4724 = vmatmul.mubr.msk.f32.gmra.mrb[10].mxu1 %vm657_vm6, %v944_v55 }
 0x470   :  { %v4722_v1 = vpop.f32.mrb[8].mxu1 }
 0x471   :  { %v1059_v3 = vadd.f32 %v4722_v1, %v4157_v0  ;;  %v1029_v5 = vpop.f32.mrb[9].mxu1  ;;  %v1313_v1 = vld [vmem:[%s5812_s5 + $0x8] sm:$0xff] }
 0x472   :  { %v1058_v6 = vadd.f32 %v4157_v0, %v1029_v5 }
 0x473   :  { %v1063_v8 = vadd.f32 %v1059_v3, %v5695_v2 }
 0x474   :  { %v1062_v9 = vadd.f32 %v1058_v6, %v5697_v4  ;;  %v4725_v10 = vpop.f32.mrb[10].mxu1 }
 0x475   :  { %v1061_v14 = vadd.f32 %v4725_v10, %v4157_v0  ;;  %v1039_v15 = vpop.f32.mrb[11].mxu1  ;;  %v1067_v21 = vmax.f32 %v1063_v8, 0.0  ;;  %v1314_v8 = vld [vmem:[%s5812_s5 + $0x10] sm:$0xff]  ;;  %v5819_v10 = vld [vmem:[%s5794_s23 + $0x8] sm:$0xff] }
 0x476   :  { %v1066_v18 = vmax.f32 %v1062_v9, 0.0  ;;  %v1060_v20 = vadd.f32 %v4157_v0, %v1039_v15  ;;  %v1312_v0 = vld [vmem:[%s5812_s5] sm:$0xff]  ;;  %v1315_v9 = vld [vmem:[%s5812_s5 + $0x18] sm:$0xff]  ;;  %v1317_v15 = vld [vmem:[%s5812_s5 + $0x28] sm:$0xff] }
 0x477   :  { %v1065_v22 = vadd.f32 %v1061_v14, %v5701_v7  ;;  %v5797_v7 = vld [vmem:[%s5794_s23] sm:$0xff]  ;;  %v5228_v6 = vpack.c.bf16 %v1313_v1, %v1312_v0  ;;  %v5232_v13 = vpack.c.bf16 %v1315_v9, %v1314_v8  ;;  %v1736_v0 = vld [vmem:[%s5875_s13 + $0x30] sm:$0xff] }
 0x478   :  { %v1064_v24 = vadd.f32 %v1060_v20, %v5705_v11  ;;  %4736 = vmatprep.mubr.msk.f32.mxu0 %vm657_vm6, %v1066_v18  ;;  %4766 = vmatprep.mubr.msk.f32.mxu1 %vm553_vm5, %v5797_v7  ;;  %v1316_v14 = vld [vmem:[%s5812_s5 + $0x20] sm:$0xff] }
 0x479   :  { %4737 = vmatmul.mubr.msk.f32.vlgmr.msra.gmra.mrb[12].mxu0 %vm657_vm6, %v1067_v21  ;;  %v1069_v4 = vmax.f32 %v1065_v22, 0.0  ;;  %v5236_v20 = vpack.c.bf16 %v1317_v15, %v1316_v14  ;;  %v1319_v22 = vld [vmem:[%s5812_s5 + $0x38] sm:$0xff] }
 0x47a   :  { %v1068_v2 = vmax.f32 %v1064_v24, 0.0  ;;  %5215 = vmatpush3.bf16.msra.mxu0 %v5212_v62 }
 0x47b   :  { %5217 = vmatprep.subr.bf16.mxu0 %v5216_v23 }
 0x47c   :  { %4739 = vmatprep.mubr.msk.f32.mxu0 %vm657_vm6, %v1068_v2 }
 0x47d   :  { %4740 = vmatmul.mubr.msk.f32.gmra.mrb[14].mxu0 %vm657_vm6, %v1069_v4 }
 0x47e   :  { %5219 = vmatpush3.bf16.msra.mxu0 %v5216_v23  ;;  %4752 = vmatprep.mubr.msk.f32.mxu0 %vm657_vm6, %v1066_v18  ;;  %v5831_v18 = vld [vmem:[%s5794_s23 + $0x18] sm:$0xff] }
 0x47f   :  { %4750 = vmatprep.subr.mxu0 %v1080_v25 }
 0x482   :  { %4751 = vmatpush3.msra.mxu0 %v1080_v25 }
 0x483   :  { %4753 = vmatmul.mubr.msk.f32.vlgmr.msra.gmra.mrb[16].mxu0 %vm657_vm6, %v1067_v21  ;;  %v1318_v21 = vld [vmem:[%s5812_s5 + $0x30] sm:$0xff]  ;;  %s5622_s5 = smov 24  }
 0x484   :  { %4755 = vmatprep.mubr.msk.f32.mxu0 %vm657_vm6, %v1068_v2  ;;  %v5240_v23 = vpack.c.bf16 %v1319_v22, %v1318_v21  ;;  %s5925_s8 = sld [smem:[%s6161_s0 + %s5622_s5]]  }
 0x487   :  { %4756 = vmatmul.mubr.msk.f32.gmra.mrb[18].mxu0 %vm657_vm6, %v1069_v4 }
 0x488   :  { %4802 = vmatprep.mubr.msk.f32.mxu0 %vm553_vm5, %v5797_v7 }
 0x54c   :  { %v4738_v11 = vpop.f32.mrb[12].mxu0 }
 0x54d   :  { %v1166_v26 = vpop.f32.mrb[13].mxu0  ;;  %v1172_v51 = vadd.f32 %v4738_v11, %v4158_v50 }
 0x54e   :  { %v1167_v53 = vadd.f32 %v4158_v50, %v1166_v26 }
 0x550   :  { %v4741_v27 = vpop.f32.mrb[14].mxu0 }
 0x551   :  { %v1176_v28 = vpop.f32.mrb[15].mxu0  ;;  %v1182_v57 = vadd.f32 %v4741_v27, %v4158_v50 }
 0x552   :  { %v1177_v59 = vadd.f32 %v4158_v50, %v1176_v28  ;;  %v1724_v50 = vld [vmem:[%s5870_s9 + $0x18] sm:$0xff] }
 0x556   :  { %v4754_v30 = vpop.f32.mrb[16].mxu0 }
 0x557   :  { %v1263_v31 = vadd.f32 %v4754_v30, %v4163_v29  ;;  %v1257_v32 = vpop.f32.mrb[17].mxu0 }
 0x558   :  { %v1258_v33 = vadd.f32 %v4163_v29, %v1257_v32 }
 0x559   :  { %v4169_v34 = vmul.f32 -1.442695, %v1263_v31 }
 0x55a   :  { %v4168_v35 = vmul.f32 -1.442695, %v1258_v33  ;;  %v4757_v36 = vpop.f32.mrb[18].mxu0 }
 0x55b   :  { %5507 = vpow2.f32 %v4169_v34  ;;  %v1273_v37 = vadd.f32 %v4757_v36, %v4163_v29  ;;  %v1267_v38 = vpop.f32.mrb[19].mxu0 }
 0x55c   :  { %5509 = vpow2.f32 %v4168_v35  ;;  %v1268_v39 = vadd.f32 %v4163_v29, %v1267_v38 }
 0x55d   :  { %v4171_v40 = vmul.f32 -1.442695, %v1273_v37 }
 0x55e   :  { %v4170_v41 = vmul.f32 -1.442695, %v1268_v39 }
 0x55f   :  { %5511 = vpow2.f32 %v4171_v40 }
 0x560   :  { %5513 = vpow2.f32 %v4170_v41 }
 0x565   :  { %v5508_v42 = vpop.eup %5507 }
 0x566   :  { %v5510_v43 = vpop.eup %5509  ;;  %v1289_v44 = vadd.f32 1.0, %v5508_v42 }
 0x567   :  { %v1288_v45 = vadd.f32 1.0, %v5510_v43  ;;  %v1721_v43 = vld [vmem:[%s5870_s9] sm:$0xff] }
 0x568   :  { %5515 = vrcp.f32 %v1289_v44  ;;  %v1722_v44 = vld [vmem:[%s5870_s9 + $0x8] sm:$0xff] }
 0x569   :  { %v5512_v46 = vpop.eup %5511  ;;  %5517 = vrcp.f32 %v1288_v45  ;;  %v1730_v45 = vld [vmem:[%s5875_s13] sm:$0xff] }
 0x56a   :  { %v5514_v47 = vpop.eup %5513  ;;  %v1291_v48 = vadd.f32 1.0, %v5512_v46  ;;  %v5268_v46 = vpack.c.bf16 %v1722_v44, %v1721_v43 }
 0x56b   :  { %v1290_v49 = vadd.f32 1.0, %v5514_v47  ;;  %v1731_v47 = vld [vmem:[%s5875_s13 + $0x8] sm:$0xff] }
 0x56c   :  { %5519 = vrcp.f32 %v1291_v48  ;;  %v5284_v48 = vpack.c.bf16 %v1731_v47, %v1730_v45  ;;  %v1964_v47 = vld [vmem:[%s4083_s26 + $0x18] sm:$0xff] }
 0x56d   :  { %5521 = vrcp.f32 %v1290_v49  ;;  %v1723_v49 = vld [vmem:[%s5870_s9 + $0x10] sm:$0xff] }
 0x572   :  { %v5516_v52 = vpop.eup %5515 }
 0x573   :  { %v5518_v54 = vpop.eup %5517  ;;  %v1301_v55 = vmul.f32 %v5516_v52, %v1172_v51  ;;  %v1732_v51 = vld [vmem:[%s5875_s13 + $0x10] sm:$0xff]  ;;  %v5272_v52 = vpack.c.bf16 %v1724_v50, %v1723_v49  ;;  %v1965_v49 = vld [vmem:[%s4083_s26 + $0x20] sm:$0xff]  ;;  %v1966_v50 = vld [vmem:[%s4083_s26 + $0x28] sm:$0xff] }
 0x574   :  { %v1300_v56 = vmul.f32 %v5518_v54, %v1167_v53  ;;  %v1733_v53 = vld [vmem:[%s5875_s13 + $0x18] sm:$0xff] }
 0x575   :  { %v5288_v54 = vpack.c.bf16 %v1733_v53, %v1732_v51  ;;  %v5308_v51 = vpack.c.bf16 %v1966_v50, %v1965_v49  ;;  %v2073_v49 = vld [vmem:[%s5925_s8] sm:$0xff]  ;;  %v2074_v50 = vld [vmem:[%s5925_s8 + $0x8] sm:$0xff] }
 0x576   :  { %v5520_v58 = vpop.eup %5519  ;;  %v5220_v60 = vpack.c.bf16 %v1301_v55, %v1300_v56 }
 0x577   :  { %v5522_v61 = vpop.eup %5521  ;;  %v1303_v62 = vmul.f32 %v5520_v58, %v1182_v57  ;;  %v1734_v57 = vld [vmem:[%s5875_s13 + $0x20] sm:$0xff] }
 0x578   :  { %5221 = vmatprep.subr.bf16.mxu1 %v5220_v60  ;;  %v1302_v3 = vmul.f32 %v5522_v61, %v1177_v59  ;;  %v1735_v59 = vld [vmem:[%s5875_s13 + $0x28] sm:$0xff]  ;;  %v1727_v61 = vld [vmem:[%s5870_s9 + $0x30] sm:$0xff] }
 0x579   :  { %5223 = vmatpush3.bf16.msra.mxu1 %v5220_v60  ;;  %v5292_v60 = vpack.c.bf16 %v1735_v59, %v1734_v57 }
 0x57a   :  { %v5224_v5 = vpack.c.bf16 %v1303_v62, %v1302_v3 }
 0x57c   :  { %5225 = vmatprep.subr.bf16.mxu1 %v5224_v5 }
 0x57d   :  { %5227 = vmatpush3.bf16.msra.mxu1 %v5224_v5 }
 0x57e   :  { %5229 = vmatprep.subr.bf16.mxu1 %v5228_v6 }
 0x580   :  { %4767 = vmatmul.mubr.msk.f32.vlgmr.msra.gmra.mrb[12].mxu1 %vm553_vm5, %v5819_v10 }
 0x581   :  { %4769 = vmatprep.mubr.msk.f32.mxu1 %vm553_vm5, %v5822_v12  ;;  %5231 = vmatpush3.bf16.msra.mxu1 %v5228_v6 }
 0x582   :  { %5233 = vmatprep.subr.bf16.mxu1 %v5232_v13 }
 0x584   :  { %4770 = vmatmul.mubr.msk.f32.gmra.mrb[14].mxu1 %vm553_vm5, %v5831_v18 }
 0x585   :  { %5235 = vmatpush3.bf16.msra.mxu1 %v5232_v13 }
 0x586   :  { %5237 = vmatprep.subr.bf16.mxu1 %v5236_v20 }
 0x589   :  { %5239 = vmatpush3.bf16.msra.mxu1 %v5236_v20 }
 0x58a   :  { %5241 = vmatprep.subr.bf16.mxu1 %v5240_v23 }
 0x58d   :  { %5243 = vmatpush3.bf16.msra.mxu1 %v5240_v23 }
 0x58e   :  { %5269 = vmatprep.subr.bf16.mxu1 %v5268_v46 }
 0x653   :  { %v4768_v24 = vpop.f32.mrb[12].mxu1 }
 0x654   :  { %v1398_v2 = vpop.f32.mrb[13].mxu1 }
 0x655   :  { %4788 = vmatprep.mubr.msk.f32.mxu1 %vm1417_vm7, %v1398_v2 }
 0x656   :  { %4789 = vmatmul.mubr.msk.f32.vlgmr.msra.gmra.mrb[16].mxu1 %vm1417_vm7, %v4768_v24 }
 0x657   :  { %v4771_v4 = vpop.f32.mrb[14].mxu1  ;;  %5271 = vmatpush3.bf16.msra.mxu1 %v5268_v46  ;;  %v1963_v46 = vld [vmem:[%s4083_s26 + $0x10] sm:$0xff] }
 0x658   :  { %v1408_v25 = vpop.f32.mrb[15].mxu1  ;;  %5273 = vmatprep.subr.bf16.mxu1 %v5272_v52 }
 0x659   :  { %4791 = vmatprep.mubr.msk.f32.mxu1 %vm1417_vm7, %v1408_v25 }
 0x65a   :  { %4792 = vmatmul.mubr.msk.f32.gmra.mrb[18].mxu1 %vm1417_vm7, %v4771_v4  ;;  %v1304_v4 = vld [vmem:[%s4076_s17] sm:$0xff] }
 0x65b   :  { %5275 = vmatpush3.bf16.msra.mxu1 %v5272_v52  ;;  %v4193_v52 = vld [vmem:[%s4082_s30] ss:$0 sm:$0xff]  ;;  %s5628_s30 = smov 29  }
 0x65c   :  { %s4090_s3 = sld [smem:[%s6161_s0 + %s5628_s30]]  }
 0x65d   :  { %s4102_s30 = sld [smem:[%s6161_s0 + %s5642_s27]]  }
 0x729   :  { %v4790_v11 = vpop.f32.mrb[16].mxu1 }
 0x72a   :  { %v5841_v26 = vsub.f32 %v1301_v55, %v4790_v11  ;;  %v1496_v27 = vpop.f32.mrb[17].mxu1  ;;  %v1725_v55 = vld [vmem:[%s5870_s9 + $0x20] sm:$0xff] }
 0x72b   :  { %v5843_v28 = vsub.f32 %v1300_v56, %v1496_v27  ;;  %v1726_v56 = vld [vmem:[%s5870_s9 + $0x28] sm:$0xff]  ;;  %v1308_v27 = vld [vmem:[%s4077_s21] sm:$0xff] }
 0x72c   :  { %v1520_v29 = vmul.f32 %v5841_v26, %v5841_v26  ;;  %v5276_v58 = vpack.c.bf16 %v1726_v56, %v1725_v55 }
 0x72d   :  { %v1519_v30 = vmul.f32 %v5843_v28, %v5843_v28  ;;  %v4793_v31 = vpop.f32.mrb[18].mxu1 }
 0x72e   :  { %v5849_v32 = vsub.f32 %v1303_v62, %v4793_v31  ;;  %v1506_v33 = vpop.f32.mrb[19].mxu1  ;;  %5277 = vmatprep.subr.bf16.mxu1 %v5276_v58  ;;  %v1728_v62 = vld [vmem:[%s5870_s9 + $0x38] sm:$0xff]  ;;  %s5623_s9 = smov 23  }
 0x72f   :  { %v5851_v34 = vsub.f32 %v1302_v3, %v1506_v33  ;;  %v5244_v35 = vpack.c.bf16 %v1520_v29, %v1519_v30  ;;  %5279 = vmatpush3.bf16.msra.mxu1 %v5276_v58  ;;  %v5280_v1 = vpack.c.bf16 %v1728_v62, %v1727_v61  ;;  %v1737_v3 = vld [vmem:[%s5875_s13 + $0x38] sm:$0xff]  ;;  %v1309_v30 = vld [vmem:[%s4077_s21 + $0x8] sm:$0xff]  ;;  %s4084_s12 = sld [smem:[%s6161_s0 + %s5623_s9]]   ;;  %s5624_s13 = smov 26  }
 0x730   :  { %v1522_v36 = vmul.f32 %v5849_v32, %v5849_v32  ;;  %v5296_v5 = vpack.c.bf16 %v1737_v3, %v1736_v0  ;;  %v1307_v33 = vld [vmem:[%s4076_s17 + $0x18] sm:$0xff]  ;;  %s4087_s16 = sld [smem:[%s6161_s0 + %s5624_s13]]  }
 0x731   :  { %v1521_v37 = vmul.f32 %v5851_v34, %v5851_v34  ;;  %5245 = vmatprep.subr.bf16.mxu0 %v5244_v35  ;;  %5281 = vmatprep.subr.bf16.mxu1 %v5280_v1  ;;  %s4098_s13 = sld [smem:[%s6161_s0 + %s5638_s10]]  }
 0x732   :  { %5247 = vmatpush3.bf16.msra.mxu0 %v5244_v35 }
 0x733   :  { %v5248_v38 = vpack.c.bf16 %v1522_v36, %v1521_v37  ;;  %5283 = vmatpush3.bf16.msra.mxu1 %v5280_v1  ;;  %v1306_v36 = vld [vmem:[%s4076_s17 + $0x10] sm:$0xff] }
 0x735   :  { %5249 = vmatprep.subr.bf16.mxu0 %v5248_v38 }
 0x736   :  { %5251 = vmatpush3.bf16.msra.mxu0 %v5248_v38 }
 0x737   :  { %5253 = vmatprep.subr.bf16.mxu0 %v5228_v6 }
 0x739   :  { %4803 = vmatmul.mubr.msk.f32.vlgmr.msra.gmra.mrb[20].mxu0 %vm553_vm5, %v5819_v10 }
 0x73a   :  { %4805 = vmatprep.mubr.msk.f32.mxu0 %vm553_vm5, %v5822_v12  ;;  %5255 = vmatpush3.bf16.msra.mxu0 %v5228_v6 }
 0x73b   :  { %5257 = vmatprep.subr.bf16.mxu0 %v5232_v13 }
 0x73d   :  { %4806 = vmatmul.mubr.msk.f32.gmra.mrb[22].mxu0 %vm553_vm5, %v5831_v18 }
 0x73e   :  { %5259 = vmatpush3.bf16.msra.mxu0 %v5232_v13 }
 0x73f   :  { %5261 = vmatprep.subr.bf16.mxu0 %v5236_v20 }
 0x742   :  { %5263 = vmatpush3.bf16.msra.mxu0 %v5236_v20 }
 0x743   :  { %5265 = vmatprep.subr.bf16.mxu0 %v5240_v23 }
 0x746   :  { %5267 = vmatpush3.bf16.msra.mxu0 %v5240_v23  ;;  %v1305_v23 = vld [vmem:[%s4076_s17 + $0x8] sm:$0xff]  ;;  %s5625_s17 = smov 28  }
 0x747   :  { %5285 = vmatprep.subr.bf16.mxu0 %v5284_v48  ;;  %s4089_s20 = sld [smem:[%s6161_s0 + %s5625_s17]]  }
 0x748   :  { %s4099_s17 = sld [smem:[%s6161_s0 + %s5639_s14]]  }
 0x80c   :  { %v4804_v39 = vpop.f32.mrb[20].mxu0 }
 0x80d   :  { %v1589_v40 = vpop.f32.mrb[21].mxu0 }
 0x80e   :  { %4824 = vmatprep.mubr.msk.f32.mxu0 %vm1417_vm7, %v1589_v40 }
 0x80f   :  { %4825 = vmatmul.mubr.msk.f32.vlgmr.msra.gmra.mrb[24].mxu0 %vm1417_vm7, %v4804_v39 }
 0x810   :  { %v4807_v41 = vpop.f32.mrb[22].mxu0  ;;  %5287 = vmatpush3.bf16.msra.mxu0 %v5284_v48  ;;  %v5304_v48 = vpack.c.bf16 %v1964_v47, %v1963_v46 }
 0x811   :  { %v1599_v42 = vpop.f32.mrb[23].mxu0  ;;  %5289 = vmatprep.subr.bf16.mxu0 %v5288_v54 }
 0x812   :  { %4827 = vmatprep.mubr.msk.f32.mxu0 %vm1417_vm7, %v1599_v42 }
 0x813   :  { %4828 = vmatmul.mubr.msk.f32.gmra.mrb[26].mxu0 %vm1417_vm7, %v4807_v41  ;;  %v1310_v41 = vld [vmem:[%s4077_s21 + $0x10] sm:$0xff] }
 0x814   :  { %5291 = vmatpush3.bf16.msra.mxu0 %v5288_v54 }
 0x815   :  { %5293 = vmatprep.subr.bf16.mxu0 %v5292_v60 }
 0x818   :  { %5295 = vmatpush3.bf16.msra.mxu0 %v5292_v60 }
 0x819   :  { %5297 = vmatprep.subr.bf16.mxu0 %v5296_v5 }
 0x81c   :  { %5299 = vmatpush3.bf16.msra.mxu0 %v5296_v5 }
 0x8e2   :  { %v4826_v6 = vpop.f32.mrb[24].mxu0 }
 0x8e3   :  { %v1692_v8 = vadd.f32 1e-12, %v4826_v6  ;;  %v1686_v9 = vpop.f32.mrb[25].mxu0 }
 0x8e4   :  { %v1687_v13 = vadd.f32 1e-12, %v1686_v9 }
 0x8e5   :  { %5523 = vrsqrt.f32 %v1692_v8 }
 0x8e6   :  { %5525 = vrsqrt.f32 %v1687_v13  ;;  %v4829_v14 = vpop.f32.mrb[26].mxu0 }
 0x8e7   :  { %v1702_v15 = vadd.f32 1e-12, %v4829_v14  ;;  %v1696_v20 = vpop.f32.mrb[27].mxu0 }
 0x8e8   :  { %v1697_v21 = vadd.f32 1e-12, %v1696_v20 }
 0x8e9   :  { %5527 = vrsqrt.f32 %v1702_v15 }
 0x8ea   :  { %5529 = vrsqrt.f32 %v1697_v21 }
 0x8ef   :  { %v5524_v22 = vpop.eup %5523 }
 0x8f0   :  { %v5526_v24 = vpop.eup %5525  ;;  %v1710_v2 = vmul.f32 %v5524_v22, %v5841_v26 }
 0x8f1   :  { %v1709_v25 = vmul.f32 %v5526_v24, %v5843_v28  ;;  %v1311_v28 = vld [vmem:[%s4077_s21 + $0x18] sm:$0xff]  ;;  %v4188_v24 = vld [vmem:[%s4080_s4] ss:$0 sm:$0xff]  ;;  %s5626_s21 = smov 25   ;;  %s5629_s4 = smov 27  }
 0x8f2   :  { %v1714_v11 = vmul.f32 %v1710_v2, %v1305_v23  ;;  %s4086_s25 = sld [smem:[%s6161_s0 + %s5626_s21]]  }
 0x8f3   :  { %v5528_v29 = vpop.eup %5527  ;;  %v1713_v31 = vmul.f32 %v1709_v25, %v1304_v4  ;;  %s4088_s7 = sld [smem:[%s6161_s0 + %s5629_s4]]  }
 0x8f4   :  { %v5530_v35 = vpop.eup %5529  ;;  %v1712_v37 = vmul.f32 %v5528_v29, %v5849_v32  ;;  %v1718_v40 = vadd.f32 %v1714_v11, %v1309_v30  ;;  %v1961_v32 = vld [vmem:[%s4083_s26] sm:$0xff]  ;;  %s4103_s21 = sld [smem:[%s6161_s0 + %s5640_s18]]  }
 0x8f5   :  { %v1717_v38 = vadd.f32 %v1713_v31, %v1308_v27  ;;  %v1711_v39 = vmul.f32 %v5530_v35, %v5851_v34  ;;  %v1962_v34 = vld [vmem:[%s4083_s26 + $0x8] sm:$0xff]  ;;  %s5627_s26 = smov 32   ;;  %s4105_s4 = sld [smem:[%s6161_s0 + %s5643_s1]]  }
 0x8f6   :  { %v1716_v42 = vmul.f32 %v1712_v37, %v1307_v33  ;;  %v5300_v45 = vpack.c.bf16 %v1962_v34, %v1961_v32  ;;  %s4093_s29 = sld [smem:[%s6161_s0 + %s5627_s26]]  }
 0x8f7   :  { %4846 = vmatprep.mubr.msk.f32.mxu1 %vm1417_vm7, %v1717_v38  ;;  %4868 = vmatprep.mubr.msk.f32.mxu0 %vm1417_vm7, %v1717_v38  ;;  %v1715_v26 = vmul.f32 %v1711_v39, %v1306_v36  ;;  %v4211_v38 = vld [vmem:[%s5925_s8 + $0x18] sm:$0xff]  ;;  %v4212_v39 = vld [vmem:[%s5925_s8 + $0x20] sm:$0xff]  ;;  %s4104_s26 = sld [smem:[%s6161_s0 + %s5641_s22]]  }
 0x8f8   :  { %4847 = vmatmul.mubr.msk.f32.vlgmr.msra.gmra.mrb[20].mxu1 %vm1417_vm7, %v1718_v40  ;;  %4869 = vmatmul.mubr.msk.f32.vlgmr.msra.gmra.mrb[28].mxu0 %vm1417_vm7, %v1718_v40  ;;  %v1720_v44 = vadd.f32 %v1716_v42, %v1311_v28  ;;  %v5320_v40 = vpack.c.bf16 %v4212_v39, %v4211_v38 }
 0x8f9   :  { %v1719_v43 = vadd.f32 %v1715_v26, %v1310_v41  ;;  %5301 = vmatprep.subr.bf16.mxu1 %v5300_v45  ;;  %v4202_v41 = vld [vmem:[%s4084_s12] ss:$0 sm:$0xff]  ;;  %s5631_s12 = smov 35  }
 0x8fa   :  { %5303 = vmatpush3.bf16.msra.mxu1 %v5300_v45  ;;  %s4096_s15 = sld [smem:[%s6161_s0 + %s5631_s12]]  }
 0x8fb   :  { %4849 = vmatprep.mubr.msk.f32.mxu1 %vm1417_vm7, %v1719_v43  ;;  %4871 = vmatprep.mubr.msk.f32.mxu0 %vm1417_vm7, %v1719_v43 }
 0x8fc   :  { %4850 = vmatmul.mubr.msk.f32.gmra.mrb[22].mxu1 %vm1417_vm7, %v1720_v44  ;;  %4872 = vmatmul.mubr.msk.f32.gmra.mrb[30].mxu0 %vm1417_vm7, %v1720_v44 }
 0x8fd   :  { %4900 = vmatprep.mubr.msk.f32.mxu0 %vm553_vm5, %v5681_v63  ;;  %5305 = vmatprep.subr.bf16.mxu1 %v5304_v48 }
 0x8fe   :  { %5307 = vmatpush3.bf16.msra.mxu1 %v5304_v48  ;;  %v4213_v48 = vld [vmem:[%s5925_s8 + $0x28] sm:$0xff] }
 0x8ff   :  { %5309 = vmatprep.subr.bf16.mxu1 %v5308_v51 }
 0x902   :  { %5311 = vmatpush3.bf16.msra.mxu1 %v5308_v51  ;;  %v5324_v51 = vpack.c.bf16 %v2074_v50, %v2073_v49  ;;  %v4239_v50 = vld [vmem:[%s4090_s3] ss:$0 sm:$0xff]  ;;  %s5636_s3 = smov 34  }
 0x903   :  { %5321 = vmatprep.subr.bf16.mxu1 %v5320_v40  ;;  %s4095_s6 = sld [smem:[%s6161_s0 + %s5636_s3]]  }
 0x9cb   :  { %v4848_v53 = vpop.f32.mrb[20].mxu1  ;;  %v4870_v54 = vpop.f32.mrb[28].mxu0 }
 0x9cc   :  { %v1920_v55 = vadd.f32 %v4870_v54, %v4193_v52  ;;  %v1823_v56 = vpop.f32.mrb[21].mxu1  ;;  %v1914_v57 = vpop.f32.mrb[29].mxu0  ;;  %v1829_v2 = vadd.f32 %v4848_v53, %v4188_v24 }
 0x9cd   :  { %v1915_v58 = vadd.f32 %v4193_v52, %v1914_v57  ;;  %v1824_v25 = vadd.f32 %v4188_v24, %v1823_v56  ;;  %v4226_v56 = vld [vmem:[%s5925_s8 + $0x30] sm:$0xff]  ;;  %v4227_v57 = vld [vmem:[%s5925_s8 + $0x38] sm:$0xff] }
 0x9ce   :  { %v4199_v59 = vmul.f32 -1.442695, %v1920_v55  ;;  %v2075_v55 = vld [vmem:[%s5925_s8 + $0x10] sm:$0xff] }
 0x9cf   :  { %v4198_v60 = vmul.f32 -1.442695, %v1915_v58  ;;  %v4851_v61 = vpop.f32.mrb[22].mxu1  ;;  %v4873_v62 = vpop.f32.mrb[30].mxu0 }
 0x9d0   :  { %5531 = vpow2.f32 %v4199_v59  ;;  %v1930_v0 = vadd.f32 %v4873_v62, %v4193_v52  ;;  %v1833_v1 = vpop.f32.mrb[23].mxu1  ;;  %v1924_v3 = vpop.f32.mrb[31].mxu0  ;;  %v1839_v30 = vadd.f32 %v4851_v61, %v4188_v24  ;;  %v4228_v61 = vld [vmem:[%s5925_s8 + $0x40] sm:$0xff]  ;;  %s5630_s8 = smov 33  }
 0x9d1   :  { %5533 = vpow2.f32 %v4198_v60  ;;  %v1925_v5 = vadd.f32 %v4193_v52, %v1924_v3  ;;  %v1834_v33 = vadd.f32 %v4188_v24, %v1833_v1  ;;  %v5336_v60 = vpack.c.bf16 %v4227_v57, %v4226_v56  ;;  %s4094_s11 = sld [smem:[%s6161_s0 + %s5630_s8]]  }
 0x9d2   :  { %v4201_v6 = vmul.f32 -1.442695, %v1930_v0 }
 0x9d3   :  { %v4200_v8 = vmul.f32 -1.442695, %v1925_v5 }
 0x9d4   :  { %5535 = vpow2.f32 %v4201_v6 }
 0x9d5   :  { %5537 = vpow2.f32 %v4200_v8 }
 0x9da   :  { %v5532_v9 = vpop.eup %5531 }
 0x9db   :  { %v5534_v13 = vpop.eup %5533  ;;  %v1946_v14 = vadd.f32 1.0, %v5532_v9 }
 0x9dc   :  { %v1945_v15 = vadd.f32 1.0, %v5534_v13 }
 0x9dd   :  { %5539 = vrcp.f32 %v1946_v14  ;;  %v2576_v14 = vld [vmem:[%s4087_s16] sm:$0xff] }
 0x9de   :  { %v5536_v20 = vpop.eup %5535  ;;  %5541 = vrcp.f32 %v1945_v15  ;;  %v2577_v15 = vld [vmem:[%s4087_s16 + $0x8] sm:$0xff] }
 0x9df   :  { %v5538_v21 = vpop.eup %5537  ;;  %v1948_v22 = vadd.f32 1.0, %v5536_v20  ;;  %v5340_v20 = vpack.c.bf16 %v2577_v15, %v2576_v14 }
 0x9e0   :  { %v1947_v23 = vadd.f32 1.0, %v5538_v21  ;;  %v2578_v21 = vld [vmem:[%s4087_s16 + $0x10] sm:$0xff]  ;;  %s5632_s16 = smov 30  }
 0x9e1   :  { %5543 = vrcp.f32 %v1948_v22  ;;  %v2580_v22 = vld [vmem:[%s4089_s20] sm:$0xff]  ;;  %s4091_s19 = sld [smem:[%s6161_s0 + %s5632_s16]]  }
 0x9e2   :  { %5545 = vrcp.f32 %v1947_v23  ;;  %v2581_v23 = vld [vmem:[%s4089_s20 + $0x8] sm:$0xff] }
 0x9e3   :  { %v5344_v24 = vpack.c.bf16 %v2581_v23, %v2580_v22 }
 0x9e7   :  { %v5540_v4 = vpop.eup %5539 }
 0x9e8   :  { %v5542_v11 = vpop.eup %5541  ;;  %v1958_v27 = vmul.f32 %v5540_v4, %v1829_v2  ;;  %v4233_v2 = vld [vmem:[%s4086_s25] ss:$0 sm:$0xff]  ;;  %s5634_s25 = smov 39  }
 0x9e9   :  { %v1957_v29 = vmul.f32 %v5542_v11, %v1824_v25  ;;  %s4100_s28 = sld [smem:[%s6161_s0 + %s5634_s25]]  }
 0x9eb   :  { %v5544_v31 = vpop.eup %5543  ;;  %4886 = vmatprep.mubr.msk.f32.mxu1 %vm1975_vm8, %v1957_v29 }
 0x9ec   :  { %v5546_v35 = vpop.eup %5545  ;;  %4887 = vmatmul.mubr.msk.f32.vlgmr.msra.gmra.mrb[24].mxu1 %vm1975_vm8, %v1958_v27  ;;  %v1960_v36 = vmul.f32 %v5544_v31, %v1839_v30 }
 0x9ed   :  { %v1959_v37 = vmul.f32 %v5546_v35, %v1834_v33  ;;  %5323 = vmatpush3.bf16.msra.mxu1 %v5320_v40 }
 0x9ee   :  { %4910 = vmatprep.subr.mxu1 %v4213_v48 }
 0x9ef   :  { %4889 = vmatprep.mubr.msk.f32.mxu1 %vm1975_vm8, %v1959_v37 }
 0x9f0   :  { %4890 = vmatmul.mubr.msk.f32.gmra.mrb[26].mxu1 %vm1975_vm8, %v1960_v36 }
 0x9f1   :  { %4911 = vmatpush3.msra.mxu1 %v4213_v48 }
 0x9f2   :  { %5325 = vmatprep.subr.bf16.mxu1 %v5324_v51 }
 0xabf   :  { %v4888_v42 = vpop.f32.mrb[24].mxu1 }
 0xac0   :  { %v5932_v26 = vadd.f32 %v4888_v42, %v4202_v41  ;;  %v2054_v28 = vpop.f32.mrb[25].mxu1 }
 0xac1   :  { %v5934_v43 = vadd.f32 %v4202_v41, %v2054_v28  ;;  %v2814_v28 = vld [vmem:[%s4093_s29] sm:$0xff] }
 0xac3   :  { %v4891_v44 = vpop.f32.mrb[26].mxu1  ;;  %v5312_v32 = vpack.c.bf16 %v5932_v26, %v5934_v43 }
 0xac4   :  { %v5938_v34 = vadd.f32 %v4891_v44, %v4202_v41  ;;  %v2064_v45 = vpop.f32.mrb[27].mxu1  ;;  %v2816_v44 = vld [vmem:[%s4093_s29 + $0x10] sm:$0xff] }
 0xac5   :  { %v5940_v46 = vadd.f32 %v4202_v41, %v2064_v45  ;;  %5313 = vmatprep.subr.bf16.mxu0 %v5312_v32  ;;  %v2582_v41 = vld [vmem:[%s4089_s20 + $0x10] sm:$0xff]  ;;  %s5633_s20 = smov 31  }
 0xac6   :  { %5315 = vmatpush3.bf16.msra.mxu0 %v5312_v32  ;;  %s4092_s24 = sld [smem:[%s6161_s0 + %s5633_s20]]  }
 0xac7   :  { %v5316_v47 = vpack.c.bf16 %v5938_v34, %v5940_v46 }
 0xac9   :  { %5317 = vmatprep.subr.bf16.mxu0 %v5316_v47 }
 0xaca   :  { %5319 = vmatpush3.bf16.msra.mxu0 %v5316_v47 }
 0xacd   :  { %4901 = vmatmul.mubr.msk.f32.vlgmr.msra.gmra.mrb[32].mxu0 %vm553_vm5, %v5712_v16 }
 0xace   :  { %4903 = vmatprep.mubr.msk.f32.mxu0 %vm553_vm5, %v5715_v17 }
 0xad1   :  { %4904 = vmatmul.mubr.msk.f32.gmra.mrb[34].mxu0 %vm553_vm5, %v5722_v19 }
 0xad2   :  { %4938 = vmatprep.mubr.msk.f32.mxu0 %vm553_vm5, %v5681_v63 }
 0xba0   :  { %v4902_v52 = vpop.f32.mrb[32].mxu0 }
 0xba1   :  { %v2142_v53 = vpop.f32.mrb[33].mxu0 }
 0xba2   :  { %v5328_v54 = vpack.c.bf16 %v4902_v52, %v2142_v53  ;;  %4912 = vmatprep.mubr.msk.f32.mxu1 %vm2165_vm9, %v2142_v53 }
 0xba3   :  { %4913 = vmatmul.mubr.msk.f32.vlgmr.msra.gmra.mrb[28].mxu1 %vm2165_vm9, %v4902_v52 }
 0xba4   :  { %v4905_v63 = vpop.f32.mrb[34].mxu0  ;;  %5329 = vmatprep.subr.bf16.mxu0 %v5328_v54  ;;  %5327 = vmatpush3.bf16.msra.mxu1 %v5324_v51 }
 0xba5   :  { %v2152_v58 = vpop.f32.mrb[35].mxu0  ;;  %5331 = vmatpush3.bf16.msra.mxu0 %v5328_v54  ;;  %4922 = vmatprep.subr.mxu1 %v2075_v55 }
 0xba6   :  { %v5332_v59 = vpack.c.bf16 %v4905_v63, %v2152_v58  ;;  %4915 = vmatprep.mubr.msk.f32.mxu1 %vm2165_vm9, %v2152_v58 }
 0xba7   :  { %4916 = vmatmul.mubr.msk.f32.gmra.mrb[30].mxu1 %vm2165_vm9, %v4905_v63 }
 0xba8   :  { %4924 = vmatprep.mubr.msk.f32.mxu1 %vm2165_vm9, %v5934_v43  ;;  %5333 = vmatprep.subr.bf16.mxu0 %v5332_v59 }
 0xba9   :  { %5335 = vmatpush3.bf16.msra.mxu0 %v5332_v59  ;;  %4923 = vmatpush3.msra.mxu1 %v2075_v55 }
 0xbaa   :  { %5337 = vmatprep.subr.bf16.mxu1 %v5336_v60  ;;  %5341 = vmatprep.subr.bf16.mxu0 %v5340_v20 }
 0xbab   :  { %4925 = vmatmul.mubr.msk.f32.vlgmr.msra.gmra.mrb[28].mxu1 %vm2165_vm9, %v5932_v26 }
 0xbac   :  { %4927 = vmatprep.mubr.msk.f32.mxu1 %vm2165_vm9, %v5940_v46  ;;  %4939 = vmatmul.mubr.msk.f32.vlgmr.msra.gmra.mrb[36].mxu0 %vm553_vm5, %v5712_v16 }
 0xbad   :  { %4941 = vmatprep.mubr.msk.f32.mxu0 %vm553_vm5, %v5715_v17  ;;  %5339 = vmatpush3.bf16.msra.mxu1 %v5336_v60 }
 0xbae   :  { %4948 = vmatprep.subr.mxu1 %v4228_v61  ;;  %5343 = vmatpush3.bf16.msra.mxu0 %v5340_v20 }
 0xbaf   :  { %4928 = vmatmul.mubr.msk.f32.gmra.mrb[30].mxu1 %vm2165_vm9, %v5938_v34  ;;  %4960 = vmatprep.subr.mxu0 %v2578_v21 }
 0xbb0   :  { %4942 = vmatmul.mubr.msk.f32.gmra.mrb[38].mxu0 %vm553_vm5, %v5722_v19 }
 0xbb1   :  { %4949 = vmatpush3.msra.mxu1 %v4228_v61 }
 0xbb2   :  { %4961 = vmatpush3.msra.mxu0 %v2578_v21 }
 0xbb3   :  { %5345 = vmatprep.subr.bf16.mxu0 %v5344_v24 }
 0xc7f   :  { %v4940_v62 = vpop.f32.mrb[36].mxu0 }
 0xc80   :  { %v2446_v0 = vmul.f32 2.0, %v4940_v62  ;;  %v2426_v1 = vpop.f32.mrb[37].mxu0 }
 0xc81   :  { %v2445_v3 = vmul.f32 2.0, %v2426_v1 }
 0xc82   :  { %v2450_v6 = vsub.f32 %v2446_v0, %v5932_v26 }
 0xc83   :  { %v2449_v5 = vsub.f32 %v2445_v3, %v5934_v43  ;;  %v4943_v16 = vpop.f32.mrb[38].mxu0 }
 0xc84   :  { %v2448_v17 = vmul.f32 2.0, %v4943_v16  ;;  %v2436_v8 = vpop.f32.mrb[39].mxu0 }
 0xc85   :  { %v2447_v9 = vmul.f32 2.0, %v2436_v8  ;;  %4950 = vmatprep.mubr.msk.f32.mxu1 %vm2165_vm9, %v2449_v5  ;;  %v4234_v8 = vld [vmem:[%s4088_s7] ss:$0 sm:$0xff] }
 0xc86   :  { %4951 = vmatmul.mubr.msk.f32.vlgmr.msra.gmra.mrb[28].mxu1 %vm2165_vm9, %v2450_v6  ;;  %v2452_v13 = vsub.f32 %v2448_v17, %v5938_v34 }
 0xc87   :  { %v2451_v19 = vsub.f32 %v2447_v9, %v5940_v46 }
 0xc89   :  { %4953 = vmatprep.mubr.msk.f32.mxu1 %vm2165_vm9, %v2451_v19 }
 0xc8a   :  { %4954 = vmatmul.mubr.msk.f32.gmra.mrb[30].mxu1 %vm2165_vm9, %v2452_v13 }
 0xc8b   :  { %4988 = vmatprep.mubr.msk.f32.mxu1 %vm553_vm5, %v5797_v7 }
 0xd59   :  { %v4952_v4 = vpop.f32.mrb[28].mxu1 }
 0xd5a   :  { %v2565_v25 = vadd.f32 %v4952_v4, %v4233_v2  ;;  %v2535_v11 = vpop.f32.mrb[29].mxu1 }
 0xd5b   :  { %v2564_v27 = vadd.f32 %v4233_v2, %v2535_v11 }
 0xd5c   :  { %v2569_v29 = vadd.f32 %v2565_v25, %v5932_v26 }
 0xd5d   :  { %v2568_v30 = vadd.f32 %v2564_v27, %v5934_v43  ;;  %v4955_v31 = vpop.f32.mrb[30].mxu1  ;;  %v2815_v43 = vld [vmem:[%s4093_s29 + $0x8] sm:$0xff] }
 0xd5e   :  { %v2567_v33 = vadd.f32 %v4955_v31, %v4233_v2  ;;  %v2545_v35 = vpop.f32.mrb[31].mxu1  ;;  %v2573_v38 = vmax.f32 %v2569_v29, 0.0  ;;  %v6011_v32 = vpack.c.bf16 %v2815_v43, %v2814_v28 }
 0xd5f   :  { %v2572_v36 = vmax.f32 %v2568_v30, 0.0  ;;  %v2566_v37 = vadd.f32 %v4233_v2, %v2545_v35 }
 0xd60   :  { %v2571_v39 = vadd.f32 %v2567_v33, %v5938_v34  ;;  %v2817_v34 = vld [vmem:[%s4093_s29 + $0x18] sm:$0xff]  ;;  %s5635_s29 = smov 36  }
 0xd61   :  { %v2570_v40 = vadd.f32 %v2566_v37, %v5940_v46  ;;  %4962 = vmatprep.mubr.msk.f32.mxu0 %vm2165_vm9, %v2572_v36  ;;  %v6013_v45 = vpack.c.bf16 %v2817_v34, %v2816_v44  ;;  %s4097_s2 = sld [smem:[%s6161_s0 + %s5635_s29]]  }
 0xd62   :  { %4963 = vmatmul.mubr.msk.f32.vlgmr.msra.gmra.mrb[40].mxu0 %vm2165_vm9, %v2573_v38  ;;  %v2575_v26 = vmax.f32 %v2571_v39, 0.0 }
 0xd63   :  { %v2574_v42 = vmax.f32 %v2570_v40, 0.0  ;;  %5347 = vmatpush3.bf16.msra.mxu0 %v5344_v24 }
 0xd64   :  { %4972 = vmatprep.subr.mxu0 %v2582_v41 }
 0xd65   :  { %4965 = vmatprep.mubr.msk.f32.mxu0 %vm2165_vm9, %v2574_v42 }
 0xd66   :  { %4966 = vmatmul.mubr.msk.f32.gmra.mrb[42].mxu0 %vm2165_vm9, %v2575_v26 }
 0xd67   :  { %4973 = vmatpush3.msra.mxu0 %v2582_v41  ;;  %4974 = vmatprep.mubr.msk.f32.mxu0 %vm2165_vm9, %v2572_v36 }
 0xd68   :  { %5357 = vmatprep.subr.bf16.mxu0 %v6011_v32 }
 0xd6a   :  { %4975 = vmatmul.mubr.msk.f32.vlgmr.msra.gmra.mrb[44].mxu0 %vm2165_vm9, %v2573_v38 }
 0xd6b   :  { %4977 = vmatprep.mubr.msk.f32.mxu0 %vm2165_vm9, %v2574_v42  ;;  %5359 = vmatpush3.bf16.msra.mxu0 %v6011_v32 }
 0xd6c   :  { %5361 = vmatprep.subr.bf16.mxu0 %v6013_v45 }
 0xd6e   :  { %4978 = vmatmul.mubr.msk.f32.gmra.mrb[46].mxu0 %vm2165_vm9, %v2575_v26 }
 0xd6f   :  { %5363 = vmatpush3.bf16.msra.mxu0 %v6013_v45 }
 0xd70   :  { %5373 = vmatprep.subr.bf16.mxu0 %v6011_v32 }
 0xe35   :  { %v4964_v46 = vpop.f32.mrb[40].mxu0 }
 0xe36   :  { %v2668_v47 = vpop.f32.mrb[41].mxu0  ;;  %v2674_v9 = vadd.f32 %v4964_v46, %v4234_v8 }
 0xe37   :  { %v2669_v13 = vadd.f32 %v4234_v8, %v2668_v47 }
 0xe39   :  { %v4967_v48 = vpop.f32.mrb[42].mxu0 }
 0xe3a   :  { %v2678_v49 = vpop.f32.mrb[43].mxu0  ;;  %v2684_v21 = vadd.f32 %v4967_v48, %v4234_v8  ;;  %v3212_v48 = vld [vmem:[%s4096_s15 + $0x8] sm:$0xff] }
 0xe3b   :  { %v2679_v23 = vadd.f32 %v4234_v8, %v2678_v49  ;;  %v2810_v8 = vld [vmem:[%s4092_s24] sm:$0xff] }
 0xe3d   :  { %v4976_v51 = vpop.f32.mrb[44].mxu0 }
 0xe3e   :  { %v2765_v52 = vadd.f32 %v4976_v51, %v4239_v50  ;;  %v2759_v53 = vpop.f32.mrb[45].mxu0  ;;  %v3209_v51 = vld [vmem:[%s4094_s11 + $0x18] sm:$0xff] }
 0xe3f   :  { %v2760_v54 = vadd.f32 %v4239_v50, %v2759_v53 }
 0xe40   :  { %v4245_v55 = vmul.f32 -1.442695, %v2765_v52  ;;  %v3213_v52 = vld [vmem:[%s4096_s15 + $0x10] sm:$0xff] }
 0xe41   :  { %v4244_v56 = vmul.f32 -1.442695, %v2760_v54  ;;  %v4979_v57 = vpop.f32.mrb[46].mxu0  ;;  %v3214_v54 = vld [vmem:[%s4096_s15 + $0x18] sm:$0xff] }
 0xe42   :  { %5547 = vpow2.f32 %v4245_v55  ;;  %v2775_v63 = vadd.f32 %v4979_v57, %v4239_v50  ;;  %v2769_v58 = vpop.f32.mrb[47].mxu0  ;;  %v5392_v55 = vpack.c.bf16 %v3214_v54, %v3213_v52 }
 0xe43   :  { %5549 = vpow2.f32 %v4244_v56  ;;  %v2770_v59 = vadd.f32 %v4239_v50, %v2769_v58  ;;  %v3208_v50 = vld [vmem:[%s4094_s11 + $0x10] sm:$0xff] }
 0xe44   :  { %v4247_v60 = vmul.f32 -1.442695, %v2775_v63  ;;  %v5384_v53 = vpack.c.bf16 %v3209_v51, %v3208_v50 }
 0xe45   :  { %v4246_v61 = vmul.f32 -1.442695, %v2770_v59 }
 0xe46   :  { %5551 = vpow2.f32 %v4247_v60 }
 0xe47   :  { %5553 = vpow2.f32 %v4246_v61 }
 0xe4c   :  { %v5548_v62 = vpop.eup %5547 }
 0xe4d   :  { %v5550_v0 = vpop.eup %5549  ;;  %v2791_v1 = vadd.f32 1.0, %v5548_v62 }
 0xe4e   :  { %v2790_v3 = vadd.f32 1.0, %v5550_v0 }
 0xe4f   :  { %5555 = vrcp.f32 %v2791_v1  ;;  %v2807_v1 = vld [vmem:[%s4091_s19 + $0x8] sm:$0xff] }
 0xe50   :  { %v5552_v5 = vpop.eup %5551  ;;  %5557 = vrcp.f32 %v2790_v3 }
 0xe51   :  { %v5554_v16 = vpop.eup %5553  ;;  %v2793_v6 = vadd.f32 1.0, %v5552_v5 }
 0xe52   :  { %v2792_v17 = vadd.f32 1.0, %v5554_v16  ;;  %v2806_v16 = vld [vmem:[%s4091_s19] sm:$0xff] }
 0xe53   :  { %5559 = vrcp.f32 %v2793_v6 }
 0xe54   :  { %5561 = vrcp.f32 %v2792_v17 }
 0xe59   :  { %v5556_v19 = vpop.eup %5555 }
 0xe5a   :  { %v5558_v14 = vpop.eup %5557  ;;  %v2803_v15 = vmul.f32 %v5556_v19, %v2674_v9  ;;  %v2811_v19 = vld [vmem:[%s4092_s24 + $0x8] sm:$0xff] }
 0xe5b   :  { %v2802_v20 = vmul.f32 %v5558_v14, %v2669_v13  ;;  %v2809_v14 = vld [vmem:[%s4091_s19 + $0x18] sm:$0xff] }
 0xe5d   :  { %v5560_v22 = vpop.eup %5559  ;;  %v5348_v24 = vpack.c.bf16 %v2803_v15, %v2802_v20 }
 0xe5e   :  { %v5562_v2 = vpop.eup %5561  ;;  %v2805_v4 = vmul.f32 %v5560_v22, %v2684_v21 }
 0xe5f   :  { %5349 = vmatprep.subr.bf16.mxu1 %v5348_v24  ;;  %v2804_v25 = vmul.f32 %v5562_v2, %v2679_v23  ;;  %v2812_v2 = vld [vmem:[%s4092_s24 + $0x10] sm:$0xff] }
 0xe60   :  { %5351 = vmatpush3.bf16.msra.mxu1 %v5348_v24 }
 0xe61   :  { %v5352_v11 = vpack.c.bf16 %v2805_v4, %v2804_v25 }
 0xe63   :  { %5353 = vmatprep.subr.bf16.mxu1 %v5352_v11 }
 0xe64   :  { %5355 = vmatpush3.bf16.msra.mxu1 %v5352_v11  ;;  %v2813_v11 = vld [vmem:[%s4092_s24 + $0x18] sm:$0xff] }
 0xe67   :  { %4989 = vmatmul.mubr.msk.f32.vlgmr.msra.gmra.mrb[32].mxu1 %vm553_vm5, %v5819_v10 }
 0xe68   :  { %4991 = vmatprep.mubr.msk.f32.mxu1 %vm553_vm5, %v5822_v12 }
 0xe6b   :  { %4992 = vmatmul.mubr.msk.f32.gmra.mrb[34].mxu1 %vm553_vm5, %v5831_v18 }
 0xe6c   :  { %5016 = vmatprep.mubr.msk.f32.mxu1 %vm553_vm5, %v5797_v7 }
 0xf3a   :  { %v4990_v27 = vpop.f32.mrb[32].mxu1 }
 0xf3b   :  { %v2884_v29 = vpop.f32.mrb[33].mxu1 }
 0xf3c   :  { %5002 = vmatprep.mubr.msk.f32.mxu0 %vm553_vm5, %v2884_v29 }
 0xf3d   :  { %5003 = vmatmul.mubr.msk.f32.vlgmr.msra.gmra.mrb[48].mxu0 %vm553_vm5, %v4990_v27 }
 0xf3e   :  { %v4993_v30 = vpop.f32.mrb[34].mxu1  ;;  %5375 = vmatpush3.bf16.msra.mxu0 %v6011_v32 }
 0xf3f   :  { %v2894_v31 = vpop.f32.mrb[35].mxu1  ;;  %5377 = vmatprep.subr.bf16.mxu0 %v6013_v45 }
 0xf40   :  { %5005 = vmatprep.mubr.msk.f32.mxu0 %vm553_vm5, %v2894_v31  ;;  %v3446_v31 = vld [vmem:[%s4100_s28] sm:$0xff] }
 0xf41   :  { %5006 = vmatmul.mubr.msk.f32.gmra.mrb[50].mxu0 %vm553_vm5, %v4993_v30  ;;  %v6092_v30 = vld [vmem:[%s5794_s23] sm:$0xff] }
 0xf42   :  { %5379 = vmatpush3.bf16.msra.mxu0 %v6013_v45 }
0x1010   :  { %v5004_v33 = vpop.f32.mrb[48].mxu0 }
0x1011   :  { %v6041_v7 = vsub.f32 %v2803_v15, %v5004_v33  ;;  %v2981_v35 = vpop.f32.mrb[49].mxu0  ;;  %v3447_v33 = vld [vmem:[%s4100_s28 + $0x8] sm:$0xff] }
0x1012   :  { %v6043_v36 = vsub.f32 %v2802_v20, %v2981_v35  ;;  %v2808_v20 = vld [vmem:[%s4091_s19 + $0x10] sm:$0xff]  ;;  %v4269_v35 = vld [vmem:[%s4097_s2] ss:$0 sm:$0xff] }
0x1013   :  { %v3005_v37 = vmul.f32 %v6041_v7, %v6041_v7 }
0x1014   :  { %v3004_v38 = vmul.f32 %v6043_v36, %v6043_v36  ;;  %v5007_v39 = vpop.f32.mrb[50].mxu0 }
0x1015   :  { %v6049_v40 = vsub.f32 %v2805_v4, %v5007_v39  ;;  %v2991_v41 = vpop.f32.mrb[51].mxu0 }
0x1016   :  { %v6051_v42 = vsub.f32 %v2804_v25, %v2991_v41  ;;  %v5364_v26 = vpack.c.bf16 %v3005_v37, %v3004_v38 }
0x1017   :  { %v3007_v28 = vmul.f32 %v6049_v40, %v6049_v40 }
0x1018   :  { %v3006_v43 = vmul.f32 %v6051_v42, %v6051_v42  ;;  %5365 = vmatprep.subr.bf16.mxu1 %v5364_v26 }
0x1019   :  { %5367 = vmatpush3.bf16.msra.mxu1 %v5364_v26 }
0x101a   :  { %v5368_v44 = vpack.c.bf16 %v3007_v28, %v3006_v43 }
0x101c   :  { %5369 = vmatprep.subr.bf16.mxu1 %v5368_v44 }
0x101d   :  { %5371 = vmatpush3.bf16.msra.mxu1 %v5368_v44 }
0x1020   :  { %5017 = vmatmul.mubr.msk.f32.vlgmr.msra.gmra.mrb[36].mxu1 %vm553_vm5, %v5819_v10  ;;  %v3206_v10 = vld [vmem:[%s4094_s11] sm:$0xff] }
0x1021   :  { %5019 = vmatprep.mubr.msk.f32.mxu1 %vm553_vm5, %v5822_v12  ;;  %v3207_v12 = vld [vmem:[%s4094_s11 + $0x8] sm:$0xff] }
0x1022   :  { %v5380_v47 = vpack.c.bf16 %v3207_v12, %v3206_v10 }
0x1024   :  { %5020 = vmatmul.mubr.msk.f32.gmra.mrb[38].mxu1 %vm553_vm5, %v5831_v18  ;;  %v3211_v18 = vld [vmem:[%s4096_s15] sm:$0xff]  ;;  %5381 = vmatprep.subr.bf16.mxu1 %v5380_v47 }
0x1025   :  { %v5388_v49 = vpack.c.bf16 %v3212_v48, %v3211_v18  ;;  %5383 = vmatpush3.bf16.msra.mxu1 %v5380_v47 }
0x1026   :  { %5385 = vmatprep.subr.bf16.mxu1 %v5384_v53 }
0x1027   :  { %5389 = vmatprep.subr.bf16.mxu0 %v5388_v49 }
0x1029   :  { %5387 = vmatpush3.bf16.msra.mxu1 %v5384_v53  ;;  %v4264_v53 = vld [vmem:[%s4095_s6] ss:$0 sm:$0xff] }
0x10f3   :  { %v5018_v32 = vpop.f32.mrb[36].mxu1 }
0x10f4   :  { %v3074_v34 = vpop.f32.mrb[37].mxu1 }
0x10f5   :  { %5030 = vmatprep.mubr.msk.f32.mxu0 %vm553_vm5, %v3074_v34 }
0x10f6   :  { %5031 = vmatmul.mubr.msk.f32.vlgmr.msra.gmra.mrb[52].mxu0 %vm553_vm5, %v5018_v32 }
0x10f7   :  { %v5021_v45 = vpop.f32.mrb[38].mxu1  ;;  %5391 = vmatpush3.bf16.msra.mxu0 %v5388_v49 }
0x10f8   :  { %v3084_v46 = vpop.f32.mrb[39].mxu1  ;;  %5393 = vmatprep.subr.bf16.mxu0 %v5392_v55 }
0x10f9   :  { %5033 = vmatprep.mubr.msk.f32.mxu0 %vm553_vm5, %v3084_v46 }
0x10fa   :  { %5034 = vmatmul.mubr.msk.f32.gmra.mrb[54].mxu0 %vm553_vm5, %v5021_v45 }
0x10fb   :  { %5395 = vmatpush3.bf16.msra.mxu0 %v5392_v55 }
0x11c9   :  { %v5032_v56 = vpop.f32.mrb[52].mxu0 }
0x11ca   :  { %v3177_v57 = vadd.f32 1e-12, %v5032_v56  ;;  %v3171_v63 = vpop.f32.mrb[53].mxu0 }
0x11cb   :  { %v3172_v58 = vadd.f32 1e-12, %v3171_v63 }
0x11cc   :  { %5563 = vrsqrt.f32 %v3177_v57 }
0x11cd   :  { %5565 = vrsqrt.f32 %v3172_v58  ;;  %v5035_v59 = vpop.f32.mrb[54].mxu0 }
0x11ce   :  { %v3187_v60 = vadd.f32 1e-12, %v5035_v59  ;;  %v3181_v61 = vpop.f32.mrb[55].mxu0 }
0x11cf   :  { %v3182_v62 = vadd.f32 1e-12, %v3181_v61 }
0x11d0   :  { %5567 = vrsqrt.f32 %v3187_v60 }
0x11d1   :  { %5569 = vrsqrt.f32 %v3182_v62 }
0x11d6   :  { %v5564_v0 = vpop.eup %5563 }
0x11d7   :  { %v5566_v3 = vpop.eup %5565  ;;  %v3195_v5 = vmul.f32 %v5564_v0, %v6041_v7  ;;  %v6099_v7 = vpack.c.bf16 %v3447_v33, %v3446_v31 }
0x11d8   :  { %v3194_v6 = vmul.f32 %v5566_v3, %v6043_v36 }
0x11d9   :  { %v3199_v17 = vmul.f32 %v3195_v5, %v2807_v1  ;;  %5405 = vmatprep.subr.bf16.mxu0 %v6099_v7 }
0x11da   :  { %v5568_v9 = vpop.eup %5567  ;;  %v3198_v13 = vmul.f32 %v3194_v6, %v2806_v16  ;;  %v5596_v16 = vld [vmem:[%s5794_s23 + $0x8] sm:$0xff]  ;;  %v5597_v6 = vld [vmem:[%s5794_s23 + $0x10] sm:$0xff] }
0x11db   :  { %v5570_v15 = vpop.eup %5569  ;;  %v3197_v21 = vmul.f32 %v5568_v9, %v6049_v40  ;;  %v3203_v24 = vadd.f32 %v3199_v17, %v2811_v19  ;;  %v5598_v17 = vld [vmem:[%s5794_s23 + $0x18] sm:$0xff]  ;;  %s5637_s23 = smov 40  }
0x11dc   :  { %v3202_v22 = vadd.f32 %v3198_v13, %v2810_v8  ;;  %v3196_v23 = vmul.f32 %v5570_v15, %v6051_v42  ;;  %s4101_s9 = sld [smem:[%s6161_s0 + %s5637_s23]]  }
0x11dd   :  { %v3201_v4 = vmul.f32 %v3197_v21, %v2809_v14 }
0x11de   :  { %5044 = vmatprep.mubr.msk.f32.mxu1 %vm553_vm5, %v3202_v22  ;;  %5058 = vmatprep.mubr.msk.f32.mxu0 %vm553_vm5, %v3202_v22  ;;  %v3200_v25 = vmul.f32 %v3196_v23, %v2808_v20 }
0x11df   :  { %5045 = vmatmul.mubr.msk.f32.vlgmr.msra.gmra.mrb[40].mxu1 %vm553_vm5, %v3203_v24  ;;  %5059 = vmatmul.mubr.msk.f32.vlgmr.msra.gmra.mrb[56].mxu0 %vm553_vm5, %v3203_v24  ;;  %v3205_v29 = vadd.f32 %v3201_v4, %v2813_v11 }
0x11e0   :  { %v3204_v27 = vadd.f32 %v3200_v25, %v2812_v2  ;;  %5407 = vmatpush3.bf16.msra.mxu0 %v6099_v7 }
0x11e1   :  { %5417 = vmatprep.subr.bf16.mxu0 %v6099_v7 }
0x11e2   :  { %5047 = vmatprep.mubr.msk.f32.mxu1 %vm553_vm5, %v3204_v27  ;;  %5061 = vmatprep.mubr.msk.f32.mxu0 %vm553_vm5, %v3204_v27 }
0x11e3   :  { %5048 = vmatmul.mubr.msk.f32.gmra.mrb[42].mxu1 %vm553_vm5, %v3205_v29  ;;  %5062 = vmatmul.mubr.msk.f32.gmra.mrb[58].mxu0 %vm553_vm5, %v3205_v29 }
0x11e4   :  { %5072 = vmatprep.mubr.msk.f32.mxu1 %vm553_vm5, %v6092_v30 }
0x12b2   :  { %v5046_v36 = vpop.f32.mrb[40].mxu1  ;;  %v5060_v37 = vpop.f32.mrb[56].mxu0 }
0x12b3   :  { %v3397_v38 = vadd.f32 %v5060_v37, %v4269_v35  ;;  %v3300_v39 = vpop.f32.mrb[41].mxu1  ;;  %v3391_v40 = vpop.f32.mrb[57].mxu0  ;;  %v3306_v54 = vadd.f32 %v5046_v36, %v4264_v53  ;;  %v3838_v37 = vld [vmem:[%s4101_s9 + $0x8] sm:$0xff] }
0x12b4   :  { %v3392_v41 = vadd.f32 %v4269_v35, %v3391_v40  ;;  %v3301_v56 = vadd.f32 %v4264_v53, %v3300_v39 }
0x12b5   :  { %v4275_v42 = vmul.f32 -1.442695, %v3397_v38 }
0x12b6   :  { %v4274_v26 = vmul.f32 -1.442695, %v3392_v41  ;;  %v5049_v28 = vpop.f32.mrb[42].mxu1  ;;  %v5063_v43 = vpop.f32.mrb[58].mxu0 }
0x12b7   :  { %5571 = vpow2.f32 %v4275_v42  ;;  %v3407_v44 = vadd.f32 %v5063_v43, %v4269_v35  ;;  %v3310_v32 = vpop.f32.mrb[43].mxu1  ;;  %v3401_v34 = vpop.f32.mrb[59].mxu0  ;;  %v3316_v59 = vadd.f32 %v5049_v28, %v4264_v53 }
0x12b8   :  { %5573 = vpow2.f32 %v4274_v26  ;;  %v3402_v45 = vadd.f32 %v4269_v35, %v3401_v34  ;;  %v3311_v61 = vadd.f32 %v4264_v53, %v3310_v32  ;;  %v3439_v34 = vld [vmem:[%s4098_s13 + $0x8] sm:$0xff]  ;;  %v3440_v53 = vld [vmem:[%s4098_s13 + $0x10] sm:$0xff] }
0x12b9   :  { %v4277_v46 = vmul.f32 -1.442695, %v3407_v44 }
0x12ba   :  { %v4276_v10 = vmul.f32 -1.442695, %v3402_v45 }
0x12bb   :  { %5575 = vpow2.f32 %v4277_v46 }
0x12bc   :  { %5577 = vpow2.f32 %v4276_v10  ;;  %v3438_v10 = vld [vmem:[%s4098_s13] sm:$0xff] }
0x12c1   :  { %v5572_v12 = vpop.eup %5571 }
0x12c2   :  { %v5574_v18 = vpop.eup %5573  ;;  %v3423_v47 = vadd.f32 1.0, %v5572_v12 }
0x12c3   :  { %v3422_v48 = vadd.f32 1.0, %v5574_v18  ;;  %v3442_v18 = vld [vmem:[%s4099_s17] sm:$0xff] }
0x12c4   :  { %5579 = vrcp.f32 %v3423_v47 }
0x12c5   :  { %v5576_v49 = vpop.eup %5575  ;;  %5581 = vrcp.f32 %v3422_v48 }
0x12c6   :  { %v5578_v50 = vpop.eup %5577  ;;  %v3425_v51 = vadd.f32 1.0, %v5576_v49 }
0x12c7   :  { %v3424_v52 = vadd.f32 1.0, %v5578_v50  ;;  %v3443_v50 = vld [vmem:[%s4099_s17 + $0x8] sm:$0xff] }
0x12c8   :  { %5583 = vrcp.f32 %v3425_v51  ;;  %v3441_v51 = vld [vmem:[%s4098_s13 + $0x18] sm:$0xff] }
0x12c9   :  { %5585 = vrcp.f32 %v3424_v52 }
0x12ce   :  { %v5580_v55 = vpop.eup %5579 }
0x12cf   :  { %v5582_v57 = vpop.eup %5581  ;;  %v3435_v63 = vmul.f32 %v5580_v55, %v3306_v54 }
0x12d0   :  { %v3434_v58 = vmul.f32 %v5582_v57, %v3301_v56 }
0x12d2   :  { %v5584_v60 = vpop.eup %5583  ;;  %v5396_v62 = vpack.c.bf16 %v3435_v63, %v3434_v58 }
0x12d3   :  { %v5586_v0 = vpop.eup %5585  ;;  %v3437_v1 = vmul.f32 %v5584_v60, %v3316_v59  ;;  %v3445_v60 = vld [vmem:[%s4099_s17 + $0x18] sm:$0xff] }
0x12d4   :  { %5397 = vmatprep.subr.bf16.mxu1 %v5396_v62  ;;  %v3436_v3 = vmul.f32 %v5586_v0, %v3311_v61  ;;  %v3947_v0 = vld [vmem:[%s4103_s21] sm:$0xff] }
0x12d5   :  { %5399 = vmatpush3.bf16.msra.mxu1 %v5396_v62 }
0x12d6   :  { %v5400_v5 = vpack.c.bf16 %v3437_v1, %v3436_v3 }
0x12d8   :  { %5401 = vmatprep.subr.bf16.mxu1 %v5400_v5 }
0x12d9   :  { %5403 = vmatpush3.bf16.msra.mxu1 %v5400_v5  ;;  %v94_v5 = vstv %s4104_s26 }
0x12da   :  { %95 = vst [vmem:[#allocation2] sm:$0x1] %v94_v5 }
0x12dc   :  { %5073 = vmatmul.mubr.msk.f32.vlgmr.msra.gmra.mrb[44].mxu1 %vm553_vm5, %v5596_v16 }
0x12dd   :  { %5075 = vmatprep.mubr.msk.f32.mxu1 %vm553_vm5, %v5597_v6 }
0x12e0   :  { %5076 = vmatmul.mubr.msk.f32.gmra.mrb[46].mxu1 %vm553_vm5, %v5598_v17 }
0x12e1   :  { %5096 = vmatprep.mubr.msk.f32.mxu1 %vm553_vm5, %v6092_v30 }
0x13af   :  { %v5074_v8 = vpop.f32.mrb[44].mxu1 }
0x13b0   :  { %v3514_v9 = vpop.f32.mrb[45].mxu1 }
0x13b1   :  { %5082 = vmatprep.mubr.msk.f32.mxu0 %vm3533_vm10, %v3514_v9 }
0x13b2   :  { %5083 = vmatmul.mubr.msk.f32.vlgmr.msra.gmra.mrb[60].mxu0 %vm3533_vm10, %v5074_v8 }
0x13b3   :  { %v5077_v19 = vpop.f32.mrb[46].mxu1  ;;  %5419 = vmatpush3.bf16.msra.mxu0 %v6099_v7 }
0x13b4   :  { %v3524_v13 = vpop.f32.mrb[47].mxu1 }
0x13b5   :  { %5085 = vmatprep.mubr.msk.f32.mxu0 %vm3533_vm10, %v3524_v13 }
0x13b6   :  { %5086 = vmatmul.mubr.msk.f32.gmra.mrb[62].mxu0 %vm3533_vm10, %v5077_v19 }
0x1485   :  { %v5084_v14 = vpop.f32.mrb[60].mxu0 }
0x1486   :  { %v3632_v15 = vsub.f32 %v3435_v63, %v5084_v14  ;;  %v3612_v20 = vpop.f32.mrb[61].mxu0  ;;  %v3444_v63 = vld [vmem:[%s4099_s17 + $0x10] sm:$0xff] }
0x1487   :  { %v3631_v21 = vsub.f32 %v3434_v58, %v3612_v20 }
0x1488   :  { %v3636_v22 = vmul.f32 %v3632_v15, %v3632_v15 }
0x1489   :  { %v3635_v23 = vmul.f32 %v3631_v21, %v3631_v21  ;;  %v5087_v24 = vpop.f32.mrb[62].mxu0 }
0x148a   :  { %v3634_v2 = vsub.f32 %v3437_v1, %v5087_v24  ;;  %v3622_v4 = vpop.f32.mrb[63].mxu0  ;;  %v3948_v1 = vld [vmem:[%s4103_s21 + $0x8] sm:$0xff]  ;;  %v4299_v24 = vld [vmem:[#allocation2] ss:$0 sm:$0xff] }
0x148b   :  { %v3633_v25 = vsub.f32 %v3436_v3, %v3622_v4  ;;  %v5408_v11 = vpack.c.bf16 %v3636_v22, %v3635_v23  ;;  %v5424_v3 = vpack.c.bf16 %v3948_v1, %v3947_v0 }
0x148c   :  { %v3638_v27 = vmul.f32 %v3634_v2, %v3634_v2 }
0x148d   :  { %v3637_v29 = vmul.f32 %v3633_v25, %v3633_v25  ;;  %5409 = vmatprep.subr.bf16.mxu1 %v5408_v11  ;;  %5425 = vmatprep.subr.bf16.mxu0 %v5424_v3 }
0x148e   :  { %5411 = vmatpush3.bf16.msra.mxu1 %v5408_v11 }
0x148f   :  { %v5412_v30 = vpack.c.bf16 %v3638_v27, %v3637_v29 }
0x1491   :  { %5413 = vmatprep.subr.bf16.mxu1 %v5412_v30 }
0x1492   :  { %5415 = vmatpush3.bf16.msra.mxu1 %v5412_v30 }
0x1493   :  { %5428 = vmatprep.subr.bf16.mxu1 %v6099_v7 }
0x1495   :  { %5097 = vmatmul.mubr.msk.f32.vlgmr.msra.gmra.mrb[48].mxu1 %vm553_vm5, %v5596_v16  ;;  %v4294_v16 = vld [vmem:[%s4102_s30] ss:$0 sm:$0xff] }
0x1496   :  { %5099 = vmatprep.mubr.msk.f32.mxu1 %vm553_vm5, %v5597_v6  ;;  %5429 = vmatpush3.bf16.msra.mxu1 %v6099_v7  ;;  %v3837_v7 = vld [vmem:[%s4101_s9] sm:$0xff] }
0x1497   :  { %v5420_v38 = vpack.c.bf16 %v3838_v37, %v3837_v7 }
0x1499   :  { %5100 = vmatmul.mubr.msk.f32.gmra.mrb[50].mxu1 %vm553_vm5, %v5598_v17  ;;  %5421 = vmatprep.subr.bf16.mxu1 %v5420_v38 }
0x1568   :  { %v5098_v31 = vpop.f32.mrb[48].mxu1 }
0x1569   :  { %v3705_v33 = vpop.f32.mrb[49].mxu1 }
0x156a   :  { %5106 = vmatprep.mubr.msk.f32.mxu0 %vm3533_vm10, %v3705_v33 }
0x156b   :  { %5107 = vmatmul.mubr.msk.f32.vlgmr.msra.gmra.mrb[64].mxu0 %vm3533_vm10, %v5098_v31 }
0x156c   :  { %v5101_v35 = vpop.f32.mrb[50].mxu1  ;;  %5427 = vmatpush3.bf16.msra.mxu0 %v5424_v3 }
0x156d   :  { %v3715_v36 = vpop.f32.mrb[51].mxu1 }
0x156e   :  { %5109 = vmatprep.mubr.msk.f32.mxu1 %vm3533_vm10, %v3715_v36 }
0x156f   :  { %5110 = vmatmul.mubr.msk.f32.vlgmr.msra.gmra.mrb[52].mxu1 %vm3533_vm10, %v5101_v35 }
0x1570   :  { %5423 = vmatpush3.bf16.msra.mxu1 %v5420_v38 }
0x163e   :  { %v5108_v39 = vpop.f32.mrb[64].mxu0 }
0x163f   :  { %v3808_v40 = vadd.f32 1e-12, %v5108_v39  ;;  %v3802_v41 = vpop.f32.mrb[65].mxu0 }
0x1640   :  { %v3803_v42 = vadd.f32 1e-12, %v3802_v41 }
0x1641   :  { %5587 = vrsqrt.f32 %v3808_v40 }
0x1642   :  { %5589 = vrsqrt.f32 %v3803_v42  ;;  %v5111_v26 = vpop.f32.mrb[52].mxu1 }
0x1643   :  { %v3818_v28 = vadd.f32 1e-12, %v5111_v26  ;;  %v3812_v43 = vpop.f32.mrb[53].mxu1 }
0x1644   :  { %v3813_v44 = vadd.f32 1e-12, %v3812_v43 }
0x1645   :  { %5591 = vrsqrt.f32 %v3818_v28 }
0x1646   :  { %5593 = vrsqrt.f32 %v3813_v44 }
0x164b   :  { %v5588_v32 = vpop.eup %5587 }
0x164c   :  { %v5590_v45 = vpop.eup %5589  ;;  %v3826_v46 = vmul.f32 %v5588_v32, %v3632_v15 }
0x164d   :  { %v3825_v12 = vmul.f32 %v5590_v45, %v3631_v21 }
0x164e   :  { %v3830_v47 = vmul.f32 %v3826_v46, %v3439_v34 }
0x164f   :  { %v5592_v48 = vpop.eup %5591  ;;  %v3829_v49 = vmul.f32 %v3825_v12, %v3438_v10 }
0x1650   :  { %v5594_v52 = vpop.eup %5593  ;;  %v3828_v54 = vmul.f32 %v5592_v48, %v3634_v2  ;;  %v3834_v57 = vadd.f32 %v3830_v47, %v3443_v50 }
0x1651   :  { %v3833_v55 = vadd.f32 %v3829_v49, %v3442_v18  ;;  %v3827_v56 = vmul.f32 %v5594_v52, %v3633_v25 }
0x1652   :  { %v3832_v58 = vmul.f32 %v3828_v54, %v3441_v51 }
0x1653   :  { %5116 = vmatprep.mubr.msk.f32.mxu1 %vm3533_vm10, %v3833_v55  ;;  %v3831_v59 = vmul.f32 %v3827_v56, %v3440_v53 }
0x1654   :  { %5117 = vmatmul.mubr.msk.f32.vlgmr.msra.gmra.mrb[54].mxu1 %vm3533_vm10, %v3834_v57  ;;  %v3836_v62 = vadd.f32 %v3832_v58, %v3445_v60 }
0x1655   :  { %v3835_v61 = vadd.f32 %v3831_v59, %v3444_v63 }
0x1657   :  { %5119 = vmatprep.mubr.msk.f32.mxu1 %vm3533_vm10, %v3835_v61 }
0x1658   :  { %5120 = vmatmul.mubr.msk.f32.gmra.mrb[56].mxu1 %vm3533_vm10, %v3836_v62 }
0x1727   :  { %v5118_v6 = vpop.f32.mrb[54].mxu1 }
0x1728   :  { %v3930_v17 = vadd.f32 %v5118_v6, %v4294_v16  ;;  %v3924_v8 = vpop.f32.mrb[55].mxu1 }
0x1729   :  { %v3925_v9 = vadd.f32 %v4294_v16, %v3924_v8 }
0x172a   :  { %v3944_v14 = vmax.f32 %v3930_v17, 0.0 }
0x172b   :  { %v3943_v19 = vmax.f32 %v3925_v9, 0.0  ;;  %v5121_v13 = vpop.f32.mrb[56].mxu1 }
0x172c   :  { %v3940_v15 = vadd.f32 %v5121_v13, %v4294_v16  ;;  %v3934_v20 = vpop.f32.mrb[57].mxu1 }
0x172d   :  { %v3935_v21 = vadd.f32 %v4294_v16, %v3934_v20  ;;  %5126 = vmatprep.mubr.msk.f32.mxu0 %vm3533_vm10, %v3943_v19 }
0x172e   :  { %5127 = vmatmul.mubr.msk.f32.vlgmr.msra.gmra.mrb[66].mxu0 %vm3533_vm10, %v3944_v14  ;;  %v3946_v23 = vmax.f32 %v3940_v15, 0.0 }
0x172f   :  { %v3945_v22 = vmax.f32 %v3935_v21, 0.0 }
0x1731   :  { %5129 = vmatprep.mubr.msk.f32.mxu0 %vm3533_vm10, %v3945_v22 }
0x1732   :  { %5130 = vmatmul.mubr.msk.f32.gmra.mrb[68].mxu0 %vm3533_vm10, %v3946_v23 }
0x1801   :  { %v5128_v2 = vpop.f32.mrb[66].mxu0 }
0x1802   :  { %v4040_v4 = vadd.f32 %v5128_v2, %v4299_v24  ;;  %v4034_v25 = vpop.f32.mrb[67].mxu0 }
0x1803   :  { %v4035_v11 = vadd.f32 %v4299_v24, %v4034_v25 }
0x1804   :  { %4055 = vst.msk [vmem:[%s4105_s4 + $0x8] sm:$0xff] %vm4053_vm11, %v4040_v4 }
0x1805   :  { %4054 = vst.msk [vmem:[%s4105_s4] sm:$0xff] %vm4053_vm11, %v4035_v11  ;;  %v5131_v27 = vpop.f32.mrb[68].mxu0 }
0x1806   :  { %v4050_v29 = vadd.f32 %v5131_v27, %v4299_v24  ;;  %v4044_v30 = vpop.f32.mrb[69].mxu0 }
0x1807   :  { %v4045_v31 = vadd.f32 %v4299_v24, %v4044_v30 }
0x1808   :  { %4057 = vst.msk [vmem:[%s4105_s4 + $0x18] sm:$0xff] %vm4053_vm11, %v4050_v29 }
0x1809   :  { %4056 = vst.msk [vmem:[%s4105_s4 + $0x10] sm:$0xff] %vm4053_vm11, %v4045_v31 }

</bundles_post_ra>
